<compile_context>
chip_gen: v6e
topology: v6e:2x2x1
jax: 0.10.0
libtpu: 0.0.40
codegen_flags: <defaults>
</compile_context>

<pallas_src>
import functools

import jax
import jax.numpy as jnp
from jax import lax
from jax.experimental import pallas as pl
from jax.experimental.pallas import tpu as pltpu

EPS = 1e-5


# ------------------------------------------------------------------
# Pallas kernels: (C_out, K) @ (K, M) matmul with fused epilogues.
# Blocks: p (K, M) bf16, w (C_out, K) bf16, g/b (C_out, 1) f32,
#         r (C_out, M) f32 residual, o (C_out, M) f32.
# ------------------------------------------------------------------
def _conv_in_relu_kernel(p_ref, w_ref, g_ref, b_ref, o_ref):
    acc = jnp.dot(w_ref[...], p_ref[...], preferred_element_type=jnp.float32)
    mean = jnp.mean(acc, axis=-1, keepdims=True)
    xc = acc - mean
    var = jnp.mean(xc * xc, axis=-1, keepdims=True)
    y = xc * lax.rsqrt(var + EPS)
    y = y * g_ref[...] + b_ref[...]
    o_ref[...] = jnp.maximum(y, 0.0)


def _conv_in_res_kernel(p_ref, w_ref, g_ref, b_ref, r_ref, o_ref):
    acc = jnp.dot(w_ref[...], p_ref[...], preferred_element_type=jnp.float32)
    mean = jnp.mean(acc, axis=-1, keepdims=True)
    xc = acc - mean
    var = jnp.mean(xc * xc, axis=-1, keepdims=True)
    y = xc * lax.rsqrt(var + EPS)
    y = y * g_ref[...] + b_ref[...]
    o_ref[...] = r_ref[...] + y          # residual add fused, no ReLU (matches ResidualBlock)


def _conv_tanh_kernel(p_ref, w_ref, o_ref):
    acc = jnp.dot(w_ref[...], p_ref[...], preferred_element_type=jnp.float32)
    o_ref[...] = jnp.tanh(acc)


def _conv_pallas(patches, w2, *, gamma=None, beta=None, residual=None, mode):
    """patches: (N, K, M) f32; w2: (C_out, K) f32; residual: (N, C_out, M) f32."""
    N, K, M = patches.shape
    c_out = w2.shape[0]

    p_bf = patches.astype(jnp.bfloat16)      # MXU operands in bf16 (f32 accumulation)
    w_bf = w2.astype(jnp.bfloat16)

    p_spec = pl.BlockSpec((None, K, M), lambda n: (n, 0, 0))
    w_spec = pl.BlockSpec((c_out, K), lambda n: (0, 0))
    o_spec = pl.BlockSpec((None, c_out, M), lambda n: (n, 0, 0))
    out_shape = jax.ShapeDtypeStruct((N, c_out, M), jnp.float32)

    if mode == "tanh":
        kernel = _conv_tanh_kernel
        in_specs = [p_spec, w_spec]
        args = (p_bf, w_bf)
    else:
        g2 = gamma.reshape(c_out, 1).astype(jnp.float32)
        b2 = beta.reshape(c_out, 1).astype(jnp.float32)
        gb_spec = pl.BlockSpec((c_out, 1), lambda n: (0, 0))
        if mode == "in_relu":
            kernel = _conv_in_relu_kernel
            in_specs = [p_spec, w_spec, gb_spec, gb_spec]
            args = (p_bf, w_bf, g2, b2)
        elif mode == "in_res":
            kernel = _conv_in_res_kernel
            r_spec = pl.BlockSpec((None, c_out, M), lambda n: (n, 0, 0))
            in_specs = [p_spec, w_spec, gb_spec, gb_spec, r_spec]
            args = (p_bf, w_bf, g2, b2, residual.astype(jnp.float32))
        else:
            raise ValueError(mode)

    return pl.pallas_call(
        kernel,
        out_shape=out_shape,
        grid_spec=pltpu.PrefetchScalarGridSpec(
            num_scalar_prefetch=0,
            grid=(N,),
            in_specs=in_specs,
            out_specs=o_spec,
        ),
        compiler_params=pltpu.CompilerParams(dimension_semantics=("parallel",)),
    )(*args)


# ------------------------------------------------------------------
# Glue: channel-major im2col (data movement only; MACs happen in Pallas)
# ------------------------------------------------------------------
def _im2col_nchw(xp, kh, kw, stride):
    """xp: already-padded (N, C, Hp, Wp) -> patches (N, kh*kw*C, Ho*Wo)."""
    N, C, Hp, Wp = xp.shape
    Ho = (Hp - kh) // stride + 1
    Wo = (Wp - kw) // stride + 1
    taps = []
    for dy in range(kh):
        for dx in range(kw):
            taps.append(lax.slice(
                xp,
                (0, 0, dy, dx),
                (N, C, dy + stride * (Ho - 1) + 1, dx + stride * (Wo - 1) + 1),
                (1, 1, stride, stride)))                      # (N, C, Ho, Wo)
    patches = jnp.stack(taps, axis=1)                          # (N, kh*kw, C, Ho, Wo)
    return patches.reshape(N, kh * kw * C, Ho * Wo), Ho, Wo


def _weight_matrix(w_oihw):
    """(C_out, C_in, kh, kw) -> (C_out, kh*kw*C_in) matching tap-major patch order."""
    c_out, c_in, kh, kw = w_oihw.shape
    return jnp.transpose(w_oihw, (0, 2, 3, 1)).reshape(c_out, kh * kw * c_in)


# ------------------------------------------------------------------
# Layer wrappers (NCHW in / NCHW out)
# ------------------------------------------------------------------
def conv_in_relu(x, w, gamma, beta, *, stride, pad):
    N = x.shape[0]
    c_out, c_in, kh, kw = w.shape
    xp = jnp.pad(x, ((0, 0), (0, 0), (pad, pad), (pad, pad)))
    patches, Ho, Wo = _im2col_nchw(xp, kh, kw, stride)
    out = _conv_pallas(patches, _weight_matrix(w), gamma=gamma, beta=beta, mode="in_relu")
    return out.reshape(N, c_out, Ho, Wo)


def conv_in_res(x, w, gamma, beta, residual, *, stride=1, pad=1):
    N = x.shape[0]
    c_out, c_in, kh, kw = w.shape
    xp = jnp.pad(x, ((0, 0), (0, 0), (pad, pad), (pad, pad)))
    patches, Ho, Wo = _im2col_nchw(xp, kh, kw, stride)
    r2 = residual.reshape(N, c_out, Ho * Wo)
    out = _conv_pallas(patches, _weight_matrix(w), gamma=gamma, beta=beta,
                       residual=r2, mode="in_res")
    return out.reshape(N, c_out, Ho, Wo)


def conv_tanh(x, w, *, stride, pad):
    N = x.shape[0]
    c_out, c_in, kh, kw = w.shape
    xp = jnp.pad(x, ((0, 0), (0, 0), (pad, pad), (pad, pad)))
    patches, Ho, Wo = _im2col_nchw(xp, kh, kw, stride)
    out = _conv_pallas(patches, _weight_matrix(w), mode="tanh")
    return out.reshape(N, c_out, Ho, Wo)


def conv_transpose_in_relu(x, wt, gamma, beta, *, stride=2, pad=1):
    """ConvTranspose2d(k, s, p, bias=False) + IN(affine) + ReLU.
    wt: PyTorch layout (C_in, C_out, kh, kw)."""
    N = x.shape[0]
    c_in, c_out, kh, kw = wt.shape
    edge = kh - 1 - pad
    # interior-dilate by (stride-1) and edge-pad, then it's a stride-1 conv
    xp = lax.pad(x, jnp.array(0.0, x.dtype),
                 ((0, 0, 0), (0, 0, 0),
                  (edge, edge, stride - 1), (edge, edge, stride - 1)))
    patches, Ho, Wo = _im2col_nchw(xp, kh, kw, 1)
    # flip spatially, swap in/out channels -> equivalent forward-conv weight
    w_conv = jnp.transpose(wt[:, :, ::-1, ::-1], (1, 0, 2, 3))   # (C_out, C_in, kh, kw)
    out = _conv_pallas(patches, _weight_matrix(w_conv), gamma=gamma, beta=beta, mode="in_relu")
    return out.reshape(N, c_out, Ho, Wo)


# ------------------------------------------------------------------
# Model: parameters + forward
# ------------------------------------------------------------------
def init_params(key, conv_dim=8, repeat_num=2):
    keys = iter(jax.random.split(key, 64))

    def conv_w(cout, cin, kh, kw):
        fan_in = cin * kh * kw
        return jax.random.normal(next(keys), (cout, cin, kh, kw), jnp.float32) / jnp.sqrt(fan_in)

    def in_affine(c):
        k1, k2 = jax.random.split(next(keys))
        g = 1.0 + 0.1 * jax.random.normal(k1, (c,), jnp.float32)
        b = 0.1 * jax.random.normal(k2, (c,), jnp.float32)
        return g, b

    params = {}
    params["c1_w"] = conv_w(conv_dim, 3, 7, 7)
    params["c1_g"], params["c1_b"] = in_affine(conv_dim)

    curr = conv_dim
    downs = []
    for _ in range(2):
        w = conv_w(curr * 2, curr, 4, 4)
        g, b = in_affine(curr * 2)
        downs.append((w, g, b))
        curr *= 2
    params["down"] = downs

    res = []
    for _ in range(repeat_num):
        w1 = conv_w(curr, curr, 3, 3)
        g1, b1 = in_affine(curr)
        w2 = conv_w(curr, curr, 3, 3)
        g2, b2 = in_affine(curr)
        res.append((w1, g1, b1, w2, g2, b2))
    params["res"] = res

    ups = []
    for _ in range(2):
        # ConvTranspose2d weight layout: (C_in, C_out, kh, kw)
        wt = jax.random.normal(next(keys), (curr, curr // 2, 4, 4), jnp.float32) / jnp.sqrt(curr * 16)
        g, b = in_affine(curr // 2)
        ups.append((wt, g, b))
        curr //= 2
    params["up"] = ups

    params["f_w"] = conv_w(3, curr, 7, 7)
    return params


def landmarks_detect_forward(x, noise, params):
    # x = x + randn_like(x) * 0.4 (noise supplied explicitly for determinism)
    x = x.astype(jnp.float32) + 0.4 * noise.astype(jnp.float32)

    # Conv7x7 s1 p3 + IN + ReLU
    x = conv_in_relu(x, params["c1_w"], params["c1_g"], params["c1_b"], stride=1, pad=3)
    # Two downsampling blocks: Conv4x4 s2 p1 + IN + ReLU
    for (w, g, b) in params["down"]:
        x = conv_in_relu(x, w, g, b, stride=2, pad=1)
    # Residual blocks: x + IN(conv3x3(ReLU(IN(conv3x3(x)))))
    for (w1, g1, b1, w2, g2, b2) in params["res"]:
        h = conv_in_relu(x, w1, g1, b1, stride=1, pad=1)
        x = conv_in_res(h, w2, g2, b2, residual=x, stride=1, pad=1)
    # Two upsampling blocks: ConvTranspose4x4 s2 p1 + IN + ReLU
    for (wt, g, b) in params["up"]:
        x = conv_transpose_in_relu(x, wt, g, b, stride=2, pad=1)
    # Final Conv7x7 s1 p3 -> 3 channels, Tanh
    x = conv_tanh(x, params["f_w"], stride=1, pad=3)
    return x  # (N, 3, H, W)


# ------------------------------------------------------------------
if __name__ == "__main__":
    key = jax.random.PRNGKey(0)
    k_param, k_x, k_noise = jax.random.split(key, 3)

    conv_dim = 8
    repeat_num = 2
    N, H, W = 2, 32, 32

    x = jax.random.normal(k_x, (N, 3, H, W), jnp.float32)        # NCHW, small
    noise = jax.random.normal(k_noise, (N, 3, H, W), jnp.float32)
    params = init_params(k_param, conv_dim=conv_dim, repeat_num=repeat_num)

    fwd = jax.jit(functools.partial(landmarks_detect_forward, params=params))
    out = fwd(x, noise)
    jax.block_until_ready(out)

    assert out.shape == (N, 3, H, W), out.shape
    assert bool(jnp.all(jnp.isfinite(out)))
    assert bool(jnp.all(jnp.abs(out) <= 1.0))   # tanh output range
    print("KERNEL_OK")
</pallas_src>

<mosaic_0001>
module attributes {stable_mosaic.version = 11 : i64} {
  func.func @_conv_in_relu_kernel(%arg0: i32, %arg1: memref<1x147x1024xbf16, #tpu.memory_space<vmem>>, %arg2: memref<8x147xbf16, #tpu.memory_space<vmem>>, %arg3: memref<8x1xf32, #tpu.memory_space<vmem>>, %arg4: memref<8x1xf32, #tpu.memory_space<vmem>>, %arg5: memref<1x8x1024xf32, #tpu.memory_space<vmem>>) attributes {dimension_semantics = [#tpu.dimension_semantics<parallel>], iteration_bounds = array<i64: 2>, scalar_prefetch = 0 : i64, scratch_operands = 0 : i64, tpu.core_type = #tpu.core_type<tc>, window_params = [{transform_indices = @transform_0, window_bounds = array<i64: 1, 147, 1024>}, {pipeline_mode = #tpu.pipeline_mode<synchronous>, transform_indices = @transform_1, window_bounds = array<i64: 8, 147>}, {pipeline_mode = #tpu.pipeline_mode<synchronous>, transform_indices = @transform_2, window_bounds = array<i64: 8, 1>}, {pipeline_mode = #tpu.pipeline_mode<synchronous>, transform_indices = @transform_3, window_bounds = array<i64: 8, 1>}, {transform_indices = @transform_4, window_bounds = array<i64: 1, 8, 1024>}]} {
    %c0 = arith.constant 0 : index
    %c0_0 = arith.constant 0 : index
    %0 = vector.load %arg2[%c0, %c0_0] : memref<8x147xbf16, #tpu.memory_space<vmem>>, vector<8x147xbf16>
    %c0_1 = arith.constant 0 : index
    %c0_2 = arith.constant 0 : index
    %c0_3 = arith.constant 0 : index
    %1 = vector.load %arg1[%c0_1, %c0_2, %c0_3] : memref<1x147x1024xbf16, #tpu.memory_space<vmem>>, vector<1x147x1024xbf16>
    %2 = vector.shape_cast %1 : vector<1x147x1024xbf16> to vector<147x1024xbf16>
    %cst = arith.constant dense<0.000000e+00> : vector<8x1024xf32>
    %3 = tpu.matmul %0, %2, %cst {dimension_numbers = #tpu.dot_dimension_numbers<[1], [0], [0], [1], [0, 0, 1, 1], [], []>} : vector<8x147xbf16>, vector<147x1024xbf16>, vector<8x1024xf32> -> vector<8x1024xf32>
    %cst_4 = arith.constant dense<0.000000e+00> : vector<8xf32>
    %4 = vector.multi_reduction <add>, %3, %cst_4 [1] : vector<8x1024xf32> to vector<8xf32>
    %5 = vector.shape_cast %4 : vector<8xf32> to vector<8x1xf32>
    %cst_5 = arith.constant 1.024000e+03 : f32
    %6 = vector.broadcast %cst_5 : f32 to vector<8x1xf32>
    %7 = arith.divf %5, %6 : vector<8x1xf32>
    %8 = vector.broadcast %7 : vector<8x1xf32> to vector<8x1024xf32>
    %9 = arith.subf %3, %8 : vector<8x1024xf32>
    %10 = arith.mulf %9, %9 : vector<8x1024xf32>
    %cst_6 = arith.constant dense<0.000000e+00> : vector<8xf32>
    %11 = vector.multi_reduction <add>, %10, %cst_6 [1] : vector<8x1024xf32> to vector<8xf32>
    %12 = vector.shape_cast %11 : vector<8xf32> to vector<8x1xf32>
    %cst_7 = arith.constant 1.024000e+03 : f32
    %13 = vector.broadcast %cst_7 : f32 to vector<8x1xf32>
    %14 = arith.divf %12, %13 : vector<8x1xf32>
    %cst_8 = arith.constant 9.99999974E-6 : f32
    %15 = vector.broadcast %cst_8 : f32 to vector<8x1xf32>
    %16 = arith.addf %14, %15 : vector<8x1xf32>
    %17 = math.rsqrt %16 : vector<8x1xf32>
    %18 = vector.broadcast %17 : vector<8x1xf32> to vector<8x1024xf32>
    %19 = arith.mulf %9, %18 : vector<8x1024xf32>
    %c0_9 = arith.constant 0 : index
    %c0_10 = arith.constant 0 : index
    %20 = vector.load %arg3[%c0_9, %c0_10] : memref<8x1xf32, #tpu.memory_space<vmem>>, vector<8x1xf32>
    %21 = vector.broadcast %20 : vector<8x1xf32> to vector<8x1024xf32>
    %22 = arith.mulf %19, %21 : vector<8x1024xf32>
    %c0_11 = arith.constant 0 : index
    %c0_12 = arith.constant 0 : index
    %23 = vector.load %arg4[%c0_11, %c0_12] : memref<8x1xf32, #tpu.memory_space<vmem>>, vector<8x1xf32>
    %24 = vector.broadcast %23 : vector<8x1xf32> to vector<8x1024xf32>
    %25 = arith.addf %22, %24 : vector<8x1024xf32>
    %cst_13 = arith.constant 0.000000e+00 : f32
    %26 = vector.broadcast %cst_13 : f32 to vector<8x1024xf32>
    %27 = arith.maximumf %25, %26 : vector<8x1024xf32>
    %c0_14 = arith.constant 0 : index
    %c0_15 = arith.constant 0 : index
    %c0_16 = arith.constant 0 : index
    %28 = vector.load %arg5[%c0_14, %c0_15, %c0_16] : memref<1x8x1024xf32, #tpu.memory_space<vmem>>, vector<1x8x1024xf32>
    %29 = vector.shape_cast %28 : vector<1x8x1024xf32> to vector<8x1024xf32>
    %30 = vector.shape_cast %27 : vector<8x1024xf32> to vector<1x8x1024xf32>
    tpu.vector_store %arg5[%c0_14, %c0_15, %c0_16], %30 {strides = array<i32>} : memref<1x8x1024xf32, #tpu.memory_space<vmem>>, vector<1x8x1024xf32>,
    return
  }
  func.func @transform_0(%arg0: i32) -> (i32, i32, i32) {
    %c0_i32 = arith.constant 0 : i32
    %c0_i32_0 = arith.constant 0 : i32
    %c0_i32_1 = arith.constant 0 : i32
    return %arg0, %c0_i32, %c0_i32_0 : i32, i32, i32
  }
  func.func @transform_1(%arg0: i32) -> (i32, i32) {
    %c0_i32 = arith.constant 0 : i32
    %c0_i32_0 = arith.constant 0 : i32
    %c0_i32_1 = arith.constant 0 : i32
    return %c0_i32, %c0_i32_0 : i32, i32
  }
  func.func @transform_2(%arg0: i32) -> (i32, i32) {
    %c0_i32 = arith.constant 0 : i32
    %c0_i32_0 = arith.constant 0 : i32
    %c0_i32_1 = arith.constant 0 : i32
    return %c0_i32, %c0_i32_0 : i32, i32
  }
  func.func @transform_3(%arg0: i32) -> (i32, i32) {
    %c0_i32 = arith.constant 0 : i32
    %c0_i32_0 = arith.constant 0 : i32
    %c0_i32_1 = arith.constant 0 : i32
    return %c0_i32, %c0_i32_0 : i32, i32
  }
  func.func @transform_4(%arg0: i32) -> (i32, i32, i32) {
    %c0_i32 = arith.constant 0 : i32
    %c0_i32_0 = arith.constant 0 : i32
    %c0_i32_1 = arith.constant 0 : i32
    return %arg0, %c0_i32, %c0_i32_0 : i32, i32, i32
  }
}

module attributes {stable_mosaic.version = 11 : i64} {
  func.func @_conv_in_relu_kernel(%arg0: i32, %arg1: memref<1x128x256xbf16, #tpu.memory_space<vmem>>, %arg2: memref<16x128xbf16, #tpu.memory_space<vmem>>, %arg3: memref<16x1xf32, #tpu.memory_space<vmem>>, %arg4: memref<16x1xf32, #tpu.memory_space<vmem>>, %arg5: memref<1x16x256xf32, #tpu.memory_space<vmem>>) attributes {dimension_semantics = [#tpu.dimension_semantics<parallel>], iteration_bounds = array<i64: 2>, scalar_prefetch = 0 : i64, scratch_operands = 0 : i64, tpu.core_type = #tpu.core_type<tc>, window_params = [{transform_indices = @transform_0, window_bounds = array<i64: 1, 128, 256>}, {pipeline_mode = #tpu.pipeline_mode<synchronous>, transform_indices = @transform_1, window_bounds = array<i64: 16, 128>}, {pipeline_mode = #tpu.pipeline_mode<synchronous>, transform_indices = @transform_2, window_bounds = array<i64: 16, 1>}, {pipeline_mode = #tpu.pipeline_mode<synchronous>, transform_indices = @transform_3, window_bounds = array<i64: 16, 1>}, {transform_indices = @transform_4, window_bounds = array<i64: 1, 16, 256>}]} {
    %c0 = arith.constant 0 : index
    %c0_0 = arith.constant 0 : index
    %0 = vector.load %arg2[%c0, %c0_0] : memref<16x128xbf16, #tpu.memory_space<vmem>>, vector<16x128xbf16>
    %c0_1 = arith.constant 0 : index
    %c0_2 = arith.constant 0 : index
    %c0_3 = arith.constant 0 : index
    %1 = vector.load %arg1[%c0_1, %c0_2, %c0_3] : memref<1x128x256xbf16, #tpu.memory_space<vmem>>, vector<1x128x256xbf16>
    %2 = vector.shape_cast %1 : vector<1x128x256xbf16> to vector<128x256xbf16>
    %cst = arith.constant dense<0.000000e+00> : vector<16x256xf32>
    %3 = tpu.matmul %0, %2, %cst {dimension_numbers = #tpu.dot_dimension_numbers<[1], [0], [0], [1], [0, 0, 1, 1], [], []>} : vector<16x128xbf16>, vector<128x256xbf16>, vector<16x256xf32> -> vector<16x256xf32>
    %cst_4 = arith.constant dense<0.000000e+00> : vector<16xf32>
    %4 = vector.multi_reduction <add>, %3, %cst_4 [1] : vector<16x256xf32> to vector<16xf32>
    %5 = vector.shape_cast %4 : vector<16xf32> to vector<16x1xf32>
    %cst_5 = arith.constant 2.560000e+02 : f32
    %6 = vector.broadcast %cst_5 : f32 to vector<16x1xf32>
    %7 = arith.divf %5, %6 : vector<16x1xf32>
    %8 = vector.broadcast %7 : vector<16x1xf32> to vector<16x256xf32>
    %9 = arith.subf %3, %8 : vector<16x256xf32>
    %10 = arith.mulf %9, %9 : vector<16x256xf32>
    %cst_6 = arith.constant dense<0.000000e+00> : vector<16xf32>
    %11 = vector.multi_reduction <add>, %10, %cst_6 [1] : vector<16x256xf32> to vector<16xf32>
    %12 = vector.shape_cast %11 : vector<16xf32> to vector<16x1xf32>
    %cst_7 = arith.constant 2.560000e+02 : f32
    %13 = vector.broadcast %cst_7 : f32 to vector<16x1xf32>
    %14 = arith.divf %12, %13 : vector<16x1xf32>
    %cst_8 = arith.constant 9.99999974E-6 : f32
    %15 = vector.broadcast %cst_8 : f32 to vector<16x1xf32>
    %16 = arith.addf %14, %15 : vector<16x1xf32>
    %17 = math.rsqrt %16 : vector<16x1xf32>
    %18 = vector.broadcast %17 : vector<16x1xf32> to vector<16x256xf32>
    %19 = arith.mulf %9, %18 : vector<16x256xf32>
    %c0_9 = arith.constant 0 : index
    %c0_10 = arith.constant 0 : index
    %20 = vector.load %arg3[%c0_9, %c0_10] : memref<16x1xf32, #tpu.memory_space<vmem>>, vector<16x1xf32>
    %21 = vector.broadcast %20 : vector<16x1xf32> to vector<16x256xf32>
    %22 = arith.mulf %19, %21 : vector<16x256xf32>
    %c0_11 = arith.constant 0 : index
    %c0_12 = arith.constant 0 : index
    %23 = vector.load %arg4[%c0_11, %c0_12] : memref<16x1xf32, #tpu.memory_space<vmem>>, vector<16x1xf32>
    %24 = vector.broadcast %23 : vector<16x1xf32> to vector<16x256xf32>
    %25 = arith.addf %22, %24 : vector<16x256xf32>
    %cst_13 = arith.constant 0.000000e+00 : f32
    %26 = vector.broadcast %cst_13 : f32 to vector<16x256xf32>
    %27 = arith.maximumf %25, %26 : vector<16x256xf32>
    %c0_14 = arith.constant 0 : index
    %c0_15 = arith.constant 0 : index
    %c0_16 = arith.constant 0 : index
    %28 = vector.load %arg5[%c0_14, %c0_15, %c0_16] : memref<1x16x256xf32, #tpu.memory_space<vmem>>, vector<1x16x256xf32>
    %29 = vector.shape_cast %28 : vector<1x16x256xf32> to vector<16x256xf32>
    %30 = vector.shape_cast %27 : vector<16x256xf32> to vector<1x16x256xf32>
    tpu.vector_store %arg5[%c0_14, %c0_15, %c0_16], %30 {strides = array<i32>} : memref<1x16x256xf32, #tpu.memory_space<vmem>>, vector<1x16x256xf32>,
    return
  }
  func.func @transform_0(%arg0: i32) -> (i32, i32, i32) {
    %c0_i32 = arith.constant 0 : i32
    %c0_i32_0 = arith.constant 0 : i32
    %c0_i32_1 = arith.constant 0 : i32
    return %arg0, %c0_i32, %c0_i32_0 : i32, i32, i32
  }
  func.func @transform_1(%arg0: i32) -> (i32, i32) {
    %c0_i32 = arith.constant 0 : i32
    %c0_i32_0 = arith.constant 0 : i32
    %c0_i32_1 = arith.constant 0 : i32
    return %c0_i32, %c0_i32_0 : i32, i32
  }
  func.func @transform_2(%arg0: i32) -> (i32, i32) {
    %c0_i32 = arith.constant 0 : i32
    %c0_i32_0 = arith.constant 0 : i32
    %c0_i32_1 = arith.constant 0 : i32
    return %c0_i32, %c0_i32_0 : i32, i32
  }
  func.func @transform_3(%arg0: i32) -> (i32, i32) {
    %c0_i32 = arith.constant 0 : i32
    %c0_i32_0 = arith.constant 0 : i32
    %c0_i32_1 = arith.constant 0 : i32
    return %c0_i32, %c0_i32_0 : i32, i32
  }
  func.func @transform_4(%arg0: i32) -> (i32, i32, i32) {
    %c0_i32 = arith.constant 0 : i32
    %c0_i32_0 = arith.constant 0 : i32
    %c0_i32_1 = arith.constant 0 : i32
    return %arg0, %c0_i32, %c0_i32_0 : i32, i32, i32
  }
}

module attributes {stable_mosaic.version = 11 : i64} {
  func.func @_conv_in_relu_kernel(%arg0: i32, %arg1: memref<1x256x64xbf16, #tpu.memory_space<vmem>>, %arg2: memref<32x256xbf16, #tpu.memory_space<vmem>>, %arg3: memref<32x1xf32, #tpu.memory_space<vmem>>, %arg4: memref<32x1xf32, #tpu.memory_space<vmem>>, %arg5: memref<1x32x64xf32, #tpu.memory_space<vmem>>) attributes {dimension_semantics = [#tpu.dimension_semantics<parallel>], iteration_bounds = array<i64: 2>, scalar_prefetch = 0 : i64, scratch_operands = 0 : i64, tpu.core_type = #tpu.core_type<tc>, window_params = [{transform_indices = @transform_0, window_bounds = array<i64: 1, 256, 64>}, {pipeline_mode = #tpu.pipeline_mode<synchronous>, transform_indices = @transform_1, window_bounds = array<i64: 32, 256>}, {pipeline_mode = #tpu.pipeline_mode<synchronous>, transform_indices = @transform_2, window_bounds = array<i64: 32, 1>}, {pipeline_mode = #tpu.pipeline_mode<synchronous>, transform_indices = @transform_3, window_bounds = array<i64: 32, 1>}, {transform_indices = @transform_4, window_bounds = array<i64: 1, 32, 64>}]} {
    %c0 = arith.constant 0 : index
    %c0_0 = arith.constant 0 : index
    %0 = vector.load %arg2[%c0, %c0_0] : memref<32x256xbf16, #tpu.memory_space<vmem>>, vector<32x256xbf16>
    %c0_1 = arith.constant 0 : index
    %c0_2 = arith.constant 0 : index
    %c0_3 = arith.constant 0 : index
    %1 = vector.load %arg1[%c0_1, %c0_2, %c0_3] : memref<1x256x64xbf16, #tpu.memory_space<vmem>>, vector<1x256x64xbf16>
    %2 = vector.shape_cast %1 : vector<1x256x64xbf16> to vector<256x64xbf16>
    %cst = arith.constant dense<0.000000e+00> : vector<32x64xf32>
    %3 = tpu.matmul %0, %2, %cst {dimension_numbers = #tpu.dot_dimension_numbers<[1], [0], [0], [1], [0, 0, 1, 1], [], []>} : vector<32x256xbf16>, vector<256x64xbf16>, vector<32x64xf32> -> vector<32x64xf32>
    %cst_4 = arith.constant dense<0.000000e+00> : vector<32xf32>
    %4 = vector.multi_reduction <add>, %3, %cst_4 [1] : vector<32x64xf32> to vector<32xf32>
    %5 = vector.shape_cast %4 : vector<32xf32> to vector<32x1xf32>
    %cst_5 = arith.constant 6.400000e+01 : f32
    %6 = vector.broadcast %cst_5 : f32 to vector<32x1xf32>
    %7 = arith.divf %5, %6 : vector<32x1xf32>
    %8 = vector.broadcast %7 : vector<32x1xf32> to vector<32x64xf32>
    %9 = arith.subf %3, %8 : vector<32x64xf32>
    %10 = arith.mulf %9, %9 : vector<32x64xf32>
    %cst_6 = arith.constant dense<0.000000e+00> : vector<32xf32>
    %11 = vector.multi_reduction <add>, %10, %cst_6 [1] : vector<32x64xf32> to vector<32xf32>
    %12 = vector.shape_cast %11 : vector<32xf32> to vector<32x1xf32>
    %cst_7 = arith.constant 6.400000e+01 : f32
    %13 = vector.broadcast %cst_7 : f32 to vector<32x1xf32>
    %14 = arith.divf %12, %13 : vector<32x1xf32>
    %cst_8 = arith.constant 9.99999974E-6 : f32
    %15 = vector.broadcast %cst_8 : f32 to vector<32x1xf32>
    %16 = arith.addf %14, %15 : vector<32x1xf32>
    %17 = math.rsqrt %16 : vector<32x1xf32>
    %18 = vector.broadcast %17 : vector<32x1xf32> to vector<32x64xf32>
    %19 = arith.mulf %9, %18 : vector<32x64xf32>
    %c0_9 = arith.constant 0 : index
    %c0_10 = arith.constant 0 : index
    %20 = vector.load %arg3[%c0_9, %c0_10] : memref<32x1xf32, #tpu.memory_space<vmem>>, vector<32x1xf32>
    %21 = vector.broadcast %20 : vector<32x1xf32> to vector<32x64xf32>
    %22 = arith.mulf %19, %21 : vector<32x64xf32>
    %c0_11 = arith.constant 0 : index
    %c0_12 = arith.constant 0 : index
    %23 = vector.load %arg4[%c0_11, %c0_12] : memref<32x1xf32, #tpu.memory_space<vmem>>, vector<32x1xf32>
    %24 = vector.broadcast %23 : vector<32x1xf32> to vector<32x64xf32>
    %25 = arith.addf %22, %24 : vector<32x64xf32>
    %cst_13 = arith.constant 0.000000e+00 : f32
    %26 = vector.broadcast %cst_13 : f32 to vector<32x64xf32>
    %27 = arith.maximumf %25, %26 : vector<32x64xf32>
    %c0_14 = arith.constant 0 : index
    %c0_15 = arith.constant 0 : index
    %c0_16 = arith.constant 0 : index
    %28 = vector.load %arg5[%c0_14, %c0_15, %c0_16] : memref<1x32x64xf32, #tpu.memory_space<vmem>>, vector<1x32x64xf32>
    %29 = vector.shape_cast %28 : vector<1x32x64xf32> to vector<32x64xf32>
    %30 = vector.shape_cast %27 : vector<32x64xf32> to vector<1x32x64xf32>
    tpu.vector_store %arg5[%c0_14, %c0_15, %c0_16], %30 {strides = array<i32>} : memref<1x32x64xf32, #tpu.memory_space<vmem>>, vector<1x32x64xf32>,
    return
  }
  func.func @transform_0(%arg0: i32) -> (i32, i32, i32) {
    %c0_i32 = arith.constant 0 : i32
    %c0_i32_0 = arith.constant 0 : i32
    %c0_i32_1 = arith.constant 0 : i32
    return %arg0, %c0_i32, %c0_i32_0 : i32, i32, i32
  }
  func.func @transform_1(%arg0: i32) -> (i32, i32) {
    %c0_i32 = arith.constant 0 : i32
    %c0_i32_0 = arith.constant 0 : i32
    %c0_i32_1 = arith.constant 0 : i32
    return %c0_i32, %c0_i32_0 : i32, i32
  }
  func.func @transform_2(%arg0: i32) -> (i32, i32) {
    %c0_i32 = arith.constant 0 : i32
    %c0_i32_0 = arith.constant 0 : i32
    %c0_i32_1 = arith.constant 0 : i32
    return %c0_i32, %c0_i32_0 : i32, i32
  }
  func.func @transform_3(%arg0: i32) -> (i32, i32) {
    %c0_i32 = arith.constant 0 : i32
    %c0_i32_0 = arith.constant 0 : i32
    %c0_i32_1 = arith.constant 0 : i32
    return %c0_i32, %c0_i32_0 : i32, i32
  }
  func.func @transform_4(%arg0: i32) -> (i32, i32, i32) {
    %c0_i32 = arith.constant 0 : i32
    %c0_i32_0 = arith.constant 0 : i32
    %c0_i32_1 = arith.constant 0 : i32
    return %arg0, %c0_i32, %c0_i32_0 : i32, i32, i32
  }
}

module attributes {stable_mosaic.version = 11 : i64} {
  func.func @_conv_in_relu_kernel(%arg0: i32, %arg1: memref<1x288x64xbf16, #tpu.memory_space<vmem>>, %arg2: memref<32x288xbf16, #tpu.memory_space<vmem>>, %arg3: memref<32x1xf32, #tpu.memory_space<vmem>>, %arg4: memref<32x1xf32, #tpu.memory_space<vmem>>, %arg5: memref<1x32x64xf32, #tpu.memory_space<vmem>>) attributes {dimension_semantics = [#tpu.dimension_semantics<parallel>], iteration_bounds = array<i64: 2>, scalar_prefetch = 0 : i64, scratch_operands = 0 : i64, tpu.core_type = #tpu.core_type<tc>, window_params = [{transform_indices = @transform_0, window_bounds = array<i64: 1, 288, 64>}, {pipeline_mode = #tpu.pipeline_mode<synchronous>, transform_indices = @transform_1, window_bounds = array<i64: 32, 288>}, {pipeline_mode = #tpu.pipeline_mode<synchronous>, transform_indices = @transform_2, window_bounds = array<i64: 32, 1>}, {pipeline_mode = #tpu.pipeline_mode<synchronous>, transform_indices = @transform_3, window_bounds = array<i64: 32, 1>}, {transform_indices = @transform_4, window_bounds = array<i64: 1, 32, 64>}]} {
    %c0 = arith.constant 0 : index
    %c0_0 = arith.constant 0 : index
    %0 = vector.load %arg2[%c0, %c0_0] : memref<32x288xbf16, #tpu.memory_space<vmem>>, vector<32x288xbf16>
    %c0_1 = arith.constant 0 : index
    %c0_2 = arith.constant 0 : index
    %c0_3 = arith.constant 0 : index
    %1 = vector.load %arg1[%c0_1, %c0_2, %c0_3] : memref<1x288x64xbf16, #tpu.memory_space<vmem>>, vector<1x288x64xbf16>
    %2 = vector.shape_cast %1 : vector<1x288x64xbf16> to vector<288x64xbf16>
    %cst = arith.constant dense<0.000000e+00> : vector<32x64xf32>
    %3 = tpu.matmul %0, %2, %cst {dimension_numbers = #tpu.dot_dimension_numbers<[1], [0], [0], [1], [0, 0, 1, 1], [], []>} : vector<32x288xbf16>, vector<288x64xbf16>, vector<32x64xf32> -> vector<32x64xf32>
    %cst_4 = arith.constant dense<0.000000e+00> : vector<32xf32>
    %4 = vector.multi_reduction <add>, %3, %cst_4 [1] : vector<32x64xf32> to vector<32xf32>
    %5 = vector.shape_cast %4 : vector<32xf32> to vector<32x1xf32>
    %cst_5 = arith.constant 6.400000e+01 : f32
    %6 = vector.broadcast %cst_5 : f32 to vector<32x1xf32>
    %7 = arith.divf %5, %6 : vector<32x1xf32>
    %8 = vector.broadcast %7 : vector<32x1xf32> to vector<32x64xf32>
    %9 = arith.subf %3, %8 : vector<32x64xf32>
    %10 = arith.mulf %9, %9 : vector<32x64xf32>
    %cst_6 = arith.constant dense<0.000000e+00> : vector<32xf32>
    %11 = vector.multi_reduction <add>, %10, %cst_6 [1] : vector<32x64xf32> to vector<32xf32>
    %12 = vector.shape_cast %11 : vector<32xf32> to vector<32x1xf32>
    %cst_7 = arith.constant 6.400000e+01 : f32
    %13 = vector.broadcast %cst_7 : f32 to vector<32x1xf32>
    %14 = arith.divf %12, %13 : vector<32x1xf32>
    %cst_8 = arith.constant 9.99999974E-6 : f32
    %15 = vector.broadcast %cst_8 : f32 to vector<32x1xf32>
    %16 = arith.addf %14, %15 : vector<32x1xf32>
    %17 = math.rsqrt %16 : vector<32x1xf32>
    %18 = vector.broadcast %17 : vector<32x1xf32> to vector<32x64xf32>
    %19 = arith.mulf %9, %18 : vector<32x64xf32>
    %c0_9 = arith.constant 0 : index
    %c0_10 = arith.constant 0 : index
    %20 = vector.load %arg3[%c0_9, %c0_10] : memref<32x1xf32, #tpu.memory_space<vmem>>, vector<32x1xf32>
    %21 = vector.broadcast %20 : vector<32x1xf32> to vector<32x64xf32>
    %22 = arith.mulf %19, %21 : vector<32x64xf32>
    %c0_11 = arith.constant 0 : index
    %c0_12 = arith.constant 0 : index
    %23 = vector.load %arg4[%c0_11, %c0_12] : memref<32x1xf32, #tpu.memory_space<vmem>>, vector<32x1xf32>
    %24 = vector.broadcast %23 : vector<32x1xf32> to vector<32x64xf32>
    %25 = arith.addf %22, %24 : vector<32x64xf32>
    %cst_13 = arith.constant 0.000000e+00 : f32
    %26 = vector.broadcast %cst_13 : f32 to vector<32x64xf32>
    %27 = arith.maximumf %25, %26 : vector<32x64xf32>
    %c0_14 = arith.constant 0 : index
    %c0_15 = arith.constant 0 : index
    %c0_16 = arith.constant 0 : index
    %28 = vector.load %arg5[%c0_14, %c0_15, %c0_16] : memref<1x32x64xf32, #tpu.memory_space<vmem>>, vector<1x32x64xf32>
    %29 = vector.shape_cast %28 : vector<1x32x64xf32> to vector<32x64xf32>
    %30 = vector.shape_cast %27 : vector<32x64xf32> to vector<1x32x64xf32>
    tpu.vector_store %arg5[%c0_14, %c0_15, %c0_16], %30 {strides = array<i32>} : memref<1x32x64xf32, #tpu.memory_space<vmem>>, vector<1x32x64xf32>,
    return
  }
  func.func @transform_0(%arg0: i32) -> (i32, i32, i32) {
    %c0_i32 = arith.constant 0 : i32
    %c0_i32_0 = arith.constant 0 : i32
    %c0_i32_1 = arith.constant 0 : i32
    return %arg0, %c0_i32, %c0_i32_0 : i32, i32, i32
  }
  func.func @transform_1(%arg0: i32) -> (i32, i32) {
    %c0_i32 = arith.constant 0 : i32
    %c0_i32_0 = arith.constant 0 : i32
    %c0_i32_1 = arith.constant 0 : i32
    return %c0_i32, %c0_i32_0 : i32, i32
  }
  func.func @transform_2(%arg0: i32) -> (i32, i32) {
    %c0_i32 = arith.constant 0 : i32
    %c0_i32_0 = arith.constant 0 : i32
    %c0_i32_1 = arith.constant 0 : i32
    return %c0_i32, %c0_i32_0 : i32, i32
  }
  func.func @transform_3(%arg0: i32) -> (i32, i32) {
    %c0_i32 = arith.constant 0 : i32
    %c0_i32_0 = arith.constant 0 : i32
    %c0_i32_1 = arith.constant 0 : i32
    return %c0_i32, %c0_i32_0 : i32, i32
  }
  func.func @transform_4(%arg0: i32) -> (i32, i32, i32) {
    %c0_i32 = arith.constant 0 : i32
    %c0_i32_0 = arith.constant 0 : i32
    %c0_i32_1 = arith.constant 0 : i32
    return %arg0, %c0_i32, %c0_i32_0 : i32, i32, i32
  }
}

module attributes {stable_mosaic.version = 11 : i64} {
  func.func @_conv_in_res_kernel(%arg0: i32, %arg1: memref<1x288x64xbf16, #tpu.memory_space<vmem>>, %arg2: memref<32x288xbf16, #tpu.memory_space<vmem>>, %arg3: memref<32x1xf32, #tpu.memory_space<vmem>>, %arg4: memref<32x1xf32, #tpu.memory_space<vmem>>, %arg5: memref<1x32x64xf32, #tpu.memory_space<vmem>>, %arg6: memref<1x32x64xf32, #tpu.memory_space<vmem>>) attributes {dimension_semantics = [#tpu.dimension_semantics<parallel>], iteration_bounds = array<i64: 2>, scalar_prefetch = 0 : i64, scratch_operands = 0 : i64, tpu.core_type = #tpu.core_type<tc>, window_params = [{transform_indices = @transform_0, window_bounds = array<i64: 1, 288, 64>}, {pipeline_mode = #tpu.pipeline_mode<synchronous>, transform_indices = @transform_1, window_bounds = array<i64: 32, 288>}, {pipeline_mode = #tpu.pipeline_mode<synchronous>, transform_indices = @transform_2, window_bounds = array<i64: 32, 1>}, {pipeline_mode = #tpu.pipeline_mode<synchronous>, transform_indices = @transform_3, window_bounds = array<i64: 32, 1>}, {transform_indices = @transform_4, window_bounds = array<i64: 1, 32, 64>}, {transform_indices = @transform_5, window_bounds = array<i64: 1, 32, 64>}]} {
    %c0 = arith.constant 0 : index
    %c0_0 = arith.constant 0 : index
    %0 = vector.load %arg2[%c0, %c0_0] : memref<32x288xbf16, #tpu.memory_space<vmem>>, vector<32x288xbf16>
    %c0_1 = arith.constant 0 : index
    %c0_2 = arith.constant 0 : index
    %c0_3 = arith.constant 0 : index
    %1 = vector.load %arg1[%c0_1, %c0_2, %c0_3] : memref<1x288x64xbf16, #tpu.memory_space<vmem>>, vector<1x288x64xbf16>
    %2 = vector.shape_cast %1 : vector<1x288x64xbf16> to vector<288x64xbf16>
    %cst = arith.constant dense<0.000000e+00> : vector<32x64xf32>
    %3 = tpu.matmul %0, %2, %cst {dimension_numbers = #tpu.dot_dimension_numbers<[1], [0], [0], [1], [0, 0, 1, 1], [], []>} : vector<32x288xbf16>, vector<288x64xbf16>, vector<32x64xf32> -> vector<32x64xf32>
    %cst_4 = arith.constant dense<0.000000e+00> : vector<32xf32>
    %4 = vector.multi_reduction <add>, %3, %cst_4 [1] : vector<32x64xf32> to vector<32xf32>
    %5 = vector.shape_cast %4 : vector<32xf32> to vector<32x1xf32>
    %cst_5 = arith.constant 6.400000e+01 : f32
    %6 = vector.broadcast %cst_5 : f32 to vector<32x1xf32>
    %7 = arith.divf %5, %6 : vector<32x1xf32>
    %8 = vector.broadcast %7 : vector<32x1xf32> to vector<32x64xf32>
    %9 = arith.subf %3, %8 : vector<32x64xf32>
    %10 = arith.mulf %9, %9 : vector<32x64xf32>
    %cst_6 = arith.constant dense<0.000000e+00> : vector<32xf32>
    %11 = vector.multi_reduction <add>, %10, %cst_6 [1] : vector<32x64xf32> to vector<32xf32>
    %12 = vector.shape_cast %11 : vector<32xf32> to vector<32x1xf32>
    %cst_7 = arith.constant 6.400000e+01 : f32
    %13 = vector.broadcast %cst_7 : f32 to vector<32x1xf32>
    %14 = arith.divf %12, %13 : vector<32x1xf32>
    %cst_8 = arith.constant 9.99999974E-6 : f32
    %15 = vector.broadcast %cst_8 : f32 to vector<32x1xf32>
    %16 = arith.addf %14, %15 : vector<32x1xf32>
    %17 = math.rsqrt %16 : vector<32x1xf32>
    %18 = vector.broadcast %17 : vector<32x1xf32> to vector<32x64xf32>
    %19 = arith.mulf %9, %18 : vector<32x64xf32>
    %c0_9 = arith.constant 0 : index
    %c0_10 = arith.constant 0 : index
    %20 = vector.load %arg3[%c0_9, %c0_10] : memref<32x1xf32, #tpu.memory_space<vmem>>, vector<32x1xf32>
    %21 = vector.broadcast %20 : vector<32x1xf32> to vector<32x64xf32>
    %22 = arith.mulf %19, %21 : vector<32x64xf32>
    %c0_11 = arith.constant 0 : index
    %c0_12 = arith.constant 0 : index
    %23 = vector.load %arg4[%c0_11, %c0_12] : memref<32x1xf32, #tpu.memory_space<vmem>>, vector<32x1xf32>
    %24 = vector.broadcast %23 : vector<32x1xf32> to vector<32x64xf32>
    %25 = arith.addf %22, %24 : vector<32x64xf32>
    %c0_13 = arith.constant 0 : index
    %c0_14 = arith.constant 0 : index
    %c0_15 = arith.constant 0 : index
    %26 = vector.load %arg5[%c0_13, %c0_14, %c0_15] : memref<1x32x64xf32, #tpu.memory_space<vmem>>, vector<1x32x64xf32>
    %27 = vector.shape_cast %26 : vector<1x32x64xf32> to vector<32x64xf32>
    %28 = arith.addf %27, %25 : vector<32x64xf32>
    %c0_16 = arith.constant 0 : index
    %c0_17 = arith.constant 0 : index
    %c0_18 = arith.constant 0 : index
    %29 = vector.load %arg6[%c0_16, %c0_17, %c0_18] : memref<1x32x64xf32, #tpu.memory_space<vmem>>, vector<1x32x64xf32>
    %30 = vector.shape_cast %29 : vector<1x32x64xf32> to vector<32x64xf32>
    %31 = vector.shape_cast %28 : vector<32x64xf32> to vector<1x32x64xf32>
    tpu.vector_store %arg6[%c0_16, %c0_17, %c0_18], %31 {strides = array<i32>} : memref<1x32x64xf32, #tpu.memory_space<vmem>>, vector<1x32x64xf32>,
    return
  }
  func.func @transform_0(%arg0: i32) -> (i32, i32, i32) {
    %c0_i32 = arith.constant 0 : i32
    %c0_i32_0 = arith.constant 0 : i32
    %c0_i32_1 = arith.constant 0 : i32
    return %arg0, %c0_i32, %c0_i32_0 : i32, i32, i32
  }
  func.func @transform_1(%arg0: i32) -> (i32, i32) {
    %c0_i32 = arith.constant 0 : i32
    %c0_i32_0 = arith.constant 0 : i32
    %c0_i32_1 = arith.constant 0 : i32
    return %c0_i32, %c0_i32_0 : i32, i32
  }
  func.func @transform_2(%arg0: i32) -> (i32, i32) {
    %c0_i32 = arith.constant 0 : i32
    %c0_i32_0 = arith.constant 0 : i32
    %c0_i32_1 = arith.constant 0 : i32
    return %c0_i32, %c0_i32_0 : i32, i32
  }
  func.func @transform_3(%arg0: i32) -> (i32, i32) {
    %c0_i32 = arith.constant 0 : i32
    %c0_i32_0 = arith.constant 0 : i32
    %c0_i32_1 = arith.constant 0 : i32
    return %c0_i32, %c0_i32_0 : i32, i32
  }
  func.func @transform_4(%arg0: i32) -> (i32, i32, i32) {
    %c0_i32 = arith.constant 0 : i32
    %c0_i32_0 = arith.constant 0 : i32
    %c0_i32_1 = arith.constant 0 : i32
    return %arg0, %c0_i32, %c0_i32_0 : i32, i32, i32
  }
  func.func @transform_5(%arg0: i32) -> (i32, i32, i32) {
    %c0_i32 = arith.constant 0 : i32
    %c0_i32_0 = arith.constant 0 : i32
    %c0_i32_1 = arith.constant 0 : i32
    return %arg0, %c0_i32, %c0_i32_0 : i32, i32, i32
  }
}

module attributes {stable_mosaic.version = 11 : i64} {
  func.func @_conv_in_relu_kernel(%arg0: i32, %arg1: memref<1x512x256xbf16, #tpu.memory_space<vmem>>, %arg2: memref<16x512xbf16, #tpu.memory_space<vmem>>, %arg3: memref<16x1xf32, #tpu.memory_space<vmem>>, %arg4: memref<16x1xf32, #tpu.memory_space<vmem>>, %arg5: memref<1x16x256xf32, #tpu.memory_space<vmem>>) attributes {dimension_semantics = [#tpu.dimension_semantics<parallel>], iteration_bounds = array<i64: 2>, scalar_prefetch = 0 : i64, scratch_operands = 0 : i64, tpu.core_type = #tpu.core_type<tc>, window_params = [{transform_indices = @transform_0, window_bounds = array<i64: 1, 512, 256>}, {pipeline_mode = #tpu.pipeline_mode<synchronous>, transform_indices = @transform_1, window_bounds = array<i64: 16, 512>}, {pipeline_mode = #tpu.pipeline_mode<synchronous>, transform_indices = @transform_2, window_bounds = array<i64: 16, 1>}, {pipeline_mode = #tpu.pipeline_mode<synchronous>, transform_indices = @transform_3, window_bounds = array<i64: 16, 1>}, {transform_indices = @transform_4, window_bounds = array<i64: 1, 16, 256>}]} {
    %c0 = arith.constant 0 : index
    %c0_0 = arith.constant 0 : index
    %0 = vector.load %arg2[%c0, %c0_0] : memref<16x512xbf16, #tpu.memory_space<vmem>>, vector<16x512xbf16>
    %c0_1 = arith.constant 0 : index
    %c0_2 = arith.constant 0 : index
    %c0_3 = arith.constant 0 : index
    %1 = vector.load %arg1[%c0_1, %c0_2, %c0_3] : memref<1x512x256xbf16, #tpu.memory_space<vmem>>, vector<1x512x256xbf16>
    %2 = vector.shape_cast %1 : vector<1x512x256xbf16> to vector<512x256xbf16>
    %cst = arith.constant dense<0.000000e+00> : vector<16x256xf32>
    %3 = tpu.matmul %0, %2, %cst {dimension_numbers = #tpu.dot_dimension_numbers<[1], [0], [0], [1], [0, 0, 1, 1], [], []>} : vector<16x512xbf16>, vector<512x256xbf16>, vector<16x256xf32> -> vector<16x256xf32>
    %cst_4 = arith.constant dense<0.000000e+00> : vector<16xf32>
    %4 = vector.multi_reduction <add>, %3, %cst_4 [1] : vector<16x256xf32> to vector<16xf32>
    %5 = vector.shape_cast %4 : vector<16xf32> to vector<16x1xf32>
    %cst_5 = arith.constant 2.560000e+02 : f32
    %6 = vector.broadcast %cst_5 : f32 to vector<16x1xf32>
    %7 = arith.divf %5, %6 : vector<16x1xf32>
    %8 = vector.broadcast %7 : vector<16x1xf32> to vector<16x256xf32>
    %9 = arith.subf %3, %8 : vector<16x256xf32>
    %10 = arith.mulf %9, %9 : vector<16x256xf32>
    %cst_6 = arith.constant dense<0.000000e+00> : vector<16xf32>
    %11 = vector.multi_reduction <add>, %10, %cst_6 [1] : vector<16x256xf32> to vector<16xf32>
    %12 = vector.shape_cast %11 : vector<16xf32> to vector<16x1xf32>
    %cst_7 = arith.constant 2.560000e+02 : f32
    %13 = vector.broadcast %cst_7 : f32 to vector<16x1xf32>
    %14 = arith.divf %12, %13 : vector<16x1xf32>
    %cst_8 = arith.constant 9.99999974E-6 : f32
    %15 = vector.broadcast %cst_8 : f32 to vector<16x1xf32>
    %16 = arith.addf %14, %15 : vector<16x1xf32>
    %17 = math.rsqrt %16 : vector<16x1xf32>
    %18 = vector.broadcast %17 : vector<16x1xf32> to vector<16x256xf32>
    %19 = arith.mulf %9, %18 : vector<16x256xf32>
    %c0_9 = arith.constant 0 : index
    %c0_10 = arith.constant 0 : index
    %20 = vector.load %arg3[%c0_9, %c0_10] : memref<16x1xf32, #tpu.memory_space<vmem>>, vector<16x1xf32>
    %21 = vector.broadcast %20 : vector<16x1xf32> to vector<16x256xf32>
    %22 = arith.mulf %19, %21 : vector<16x256xf32>
    %c0_11 = arith.constant 0 : index
    %c0_12 = arith.constant 0 : index
    %23 = vector.load %arg4[%c0_11, %c0_12] : memref<16x1xf32, #tpu.memory_space<vmem>>, vector<16x1xf32>
    %24 = vector.broadcast %23 : vector<16x1xf32> to vector<16x256xf32>
    %25 = arith.addf %22, %24 : vector<16x256xf32>
    %cst_13 = arith.constant 0.000000e+00 : f32
    %26 = vector.broadcast %cst_13 : f32 to vector<16x256xf32>
    %27 = arith.maximumf %25, %26 : vector<16x256xf32>
    %c0_14 = arith.constant 0 : index
    %c0_15 = arith.constant 0 : index
    %c0_16 = arith.constant 0 : index
    %28 = vector.load %arg5[%c0_14, %c0_15, %c0_16] : memref<1x16x256xf32, #tpu.memory_space<vmem>>, vector<1x16x256xf32>
    %29 = vector.shape_cast %28 : vector<1x16x256xf32> to vector<16x256xf32>
    %30 = vector.shape_cast %27 : vector<16x256xf32> to vector<1x16x256xf32>
    tpu.vector_store %arg5[%c0_14, %c0_15, %c0_16], %30 {strides = array<i32>} : memref<1x16x256xf32, #tpu.memory_space<vmem>>, vector<1x16x256xf32>,
    return
  }
  func.func @transform_0(%arg0: i32) -> (i32, i32, i32) {
    %c0_i32 = arith.constant 0 : i32
    %c0_i32_0 = arith.constant 0 : i32
    %c0_i32_1 = arith.constant 0 : i32
    return %arg0, %c0_i32, %c0_i32_0 : i32, i32, i32
  }
  func.func @transform_1(%arg0: i32) -> (i32, i32) {
    %c0_i32 = arith.constant 0 : i32
    %c0_i32_0 = arith.constant 0 : i32
    %c0_i32_1 = arith.constant 0 : i32
    return %c0_i32, %c0_i32_0 : i32, i32
  }
  func.func @transform_2(%arg0: i32) -> (i32, i32) {
    %c0_i32 = arith.constant 0 : i32
    %c0_i32_0 = arith.constant 0 : i32
    %c0_i32_1 = arith.constant 0 : i32
    return %c0_i32, %c0_i32_0 : i32, i32
  }
  func.func @transform_3(%arg0: i32) -> (i32, i32) {
    %c0_i32 = arith.constant 0 : i32
    %c0_i32_0 = arith.constant 0 : i32
    %c0_i32_1 = arith.constant 0 : i32
    return %c0_i32, %c0_i32_0 : i32, i32
  }
  func.func @transform_4(%arg0: i32) -> (i32, i32, i32) {
    %c0_i32 = arith.constant 0 : i32
    %c0_i32_0 = arith.constant 0 : i32
    %c0_i32_1 = arith.constant 0 : i32
    return %arg0, %c0_i32, %c0_i32_0 : i32, i32, i32
  }
}

module attributes {stable_mosaic.version = 11 : i64} {
  func.func @_conv_in_relu_kernel(%arg0: i32, %arg1: memref<1x256x1024xbf16, #tpu.memory_space<vmem>>, %arg2: memref<8x256xbf16, #tpu.memory_space<vmem>>, %arg3: memref<8x1xf32, #tpu.memory_space<vmem>>, %arg4: memref<8x1xf32, #tpu.memory_space<vmem>>, %arg5: memref<1x8x1024xf32, #tpu.memory_space<vmem>>) attributes {dimension_semantics = [#tpu.dimension_semantics<parallel>], iteration_bounds = array<i64: 2>, scalar_prefetch = 0 : i64, scratch_operands = 0 : i64, tpu.core_type = #tpu.core_type<tc>, window_params = [{transform_indices = @transform_0, window_bounds = array<i64: 1, 256, 1024>}, {pipeline_mode = #tpu.pipeline_mode<synchronous>, transform_indices = @transform_1, window_bounds = array<i64: 8, 256>}, {pipeline_mode = #tpu.pipeline_mode<synchronous>, transform_indices = @transform_2, window_bounds = array<i64: 8, 1>}, {pipeline_mode = #tpu.pipeline_mode<synchronous>, transform_indices = @transform_3, window_bounds = array<i64: 8, 1>}, {transform_indices = @transform_4, window_bounds = array<i64: 1, 8, 1024>}]} {
    %c0 = arith.constant 0 : index
    %c0_0 = arith.constant 0 : index
    %0 = vector.load %arg2[%c0, %c0_0] : memref<8x256xbf16, #tpu.memory_space<vmem>>, vector<8x256xbf16>
    %c0_1 = arith.constant 0 : index
    %c0_2 = arith.constant 0 : index
    %c0_3 = arith.constant 0 : index
    %1 = vector.load %arg1[%c0_1, %c0_2, %c0_3] : memref<1x256x1024xbf16, #tpu.memory_space<vmem>>, vector<1x256x1024xbf16>
    %2 = vector.shape_cast %1 : vector<1x256x1024xbf16> to vector<256x1024xbf16>
    %cst = arith.constant dense<0.000000e+00> : vector<8x1024xf32>
    %3 = tpu.matmul %0, %2, %cst {dimension_numbers = #tpu.dot_dimension_numbers<[1], [0], [0], [1], [0, 0, 1, 1], [], []>} : vector<8x256xbf16>, vector<256x1024xbf16>, vector<8x1024xf32> -> vector<8x1024xf32>
    %cst_4 = arith.constant dense<0.000000e+00> : vector<8xf32>
    %4 = vector.multi_reduction <add>, %3, %cst_4 [1] : vector<8x1024xf32> to vector<8xf32>
    %5 = vector.shape_cast %4 : vector<8xf32> to vector<8x1xf32>
    %cst_5 = arith.constant 1.024000e+03 : f32
    %6 = vector.broadcast %cst_5 : f32 to vector<8x1xf32>
    %7 = arith.divf %5, %6 : vector<8x1xf32>
    %8 = vector.broadcast %7 : vector<8x1xf32> to vector<8x1024xf32>
    %9 = arith.subf %3, %8 : vector<8x1024xf32>
    %10 = arith.mulf %9, %9 : vector<8x1024xf32>
    %cst_6 = arith.constant dense<0.000000e+00> : vector<8xf32>
    %11 = vector.multi_reduction <add>, %10, %cst_6 [1] : vector<8x1024xf32> to vector<8xf32>
    %12 = vector.shape_cast %11 : vector<8xf32> to vector<8x1xf32>
    %cst_7 = arith.constant 1.024000e+03 : f32
    %13 = vector.broadcast %cst_7 : f32 to vector<8x1xf32>
    %14 = arith.divf %12, %13 : vector<8x1xf32>
    %cst_8 = arith.constant 9.99999974E-6 : f32
    %15 = vector.broadcast %cst_8 : f32 to vector<8x1xf32>
    %16 = arith.addf %14, %15 : vector<8x1xf32>
    %17 = math.rsqrt %16 : vector<8x1xf32>
    %18 = vector.broadcast %17 : vector<8x1xf32> to vector<8x1024xf32>
    %19 = arith.mulf %9, %18 : vector<8x1024xf32>
    %c0_9 = arith.constant 0 : index
    %c0_10 = arith.constant 0 : index
    %20 = vector.load %arg3[%c0_9, %c0_10] : memref<8x1xf32, #tpu.memory_space<vmem>>, vector<8x1xf32>
    %21 = vector.broadcast %20 : vector<8x1xf32> to vector<8x1024xf32>
    %22 = arith.mulf %19, %21 : vector<8x1024xf32>
    %c0_11 = arith.constant 0 : index
    %c0_12 = arith.constant 0 : index
    %23 = vector.load %arg4[%c0_11, %c0_12] : memref<8x1xf32, #tpu.memory_space<vmem>>, vector<8x1xf32>
    %24 = vector.broadcast %23 : vector<8x1xf32> to vector<8x1024xf32>
    %25 = arith.addf %22, %24 : vector<8x1024xf32>
    %cst_13 = arith.constant 0.000000e+00 : f32
    %26 = vector.broadcast %cst_13 : f32 to vector<8x1024xf32>
    %27 = arith.maximumf %25, %26 : vector<8x1024xf32>
    %c0_14 = arith.constant 0 : index
    %c0_15 = arith.constant 0 : index
    %c0_16 = arith.constant 0 : index
    %28 = vector.load %arg5[%c0_14, %c0_15, %c0_16] : memref<1x8x1024xf32, #tpu.memory_space<vmem>>, vector<1x8x1024xf32>
    %29 = vector.shape_cast %28 : vector<1x8x1024xf32> to vector<8x1024xf32>
    %30 = vector.shape_cast %27 : vector<8x1024xf32> to vector<1x8x1024xf32>
    tpu.vector_store %arg5[%c0_14, %c0_15, %c0_16], %30 {strides = array<i32>} : memref<1x8x1024xf32, #tpu.memory_space<vmem>>, vector<1x8x1024xf32>,
    return
  }
  func.func @transform_0(%arg0: i32) -> (i32, i32, i32) {
    %c0_i32 = arith.constant 0 : i32
    %c0_i32_0 = arith.constant 0 : i32
    %c0_i32_1 = arith.constant 0 : i32
    return %arg0, %c0_i32, %c0_i32_0 : i32, i32, i32
  }
  func.func @transform_1(%arg0: i32) -> (i32, i32) {
    %c0_i32 = arith.constant 0 : i32
    %c0_i32_0 = arith.constant 0 : i32
    %c0_i32_1 = arith.constant 0 : i32
    return %c0_i32, %c0_i32_0 : i32, i32
  }
  func.func @transform_2(%arg0: i32) -> (i32, i32) {
    %c0_i32 = arith.constant 0 : i32
    %c0_i32_0 = arith.constant 0 : i32
    %c0_i32_1 = arith.constant 0 : i32
    return %c0_i32, %c0_i32_0 : i32, i32
  }
  func.func @transform_3(%arg0: i32) -> (i32, i32) {
    %c0_i32 = arith.constant 0 : i32
    %c0_i32_0 = arith.constant 0 : i32
    %c0_i32_1 = arith.constant 0 : i32
    return %c0_i32, %c0_i32_0 : i32, i32
  }
  func.func @transform_4(%arg0: i32) -> (i32, i32, i32) {
    %c0_i32 = arith.constant 0 : i32
    %c0_i32_0 = arith.constant 0 : i32
    %c0_i32_1 = arith.constant 0 : i32
    return %arg0, %c0_i32, %c0_i32_0 : i32, i32, i32
  }
}

module attributes {stable_mosaic.version = 11 : i64} {
  func.func @_conv_tanh_kernel(%arg0: i32, %arg1: memref<1x392x1024xbf16, #tpu.memory_space<vmem>>, %arg2: memref<3x392xbf16, #tpu.memory_space<vmem>>, %arg3: memref<1x3x1024xf32, #tpu.memory_space<vmem>>) attributes {dimension_semantics = [#tpu.dimension_semantics<parallel>], iteration_bounds = array<i64: 2>, scalar_prefetch = 0 : i64, scratch_operands = 0 : i64, tpu.core_type = #tpu.core_type<tc>, window_params = [{transform_indices = @transform_0, window_bounds = array<i64: 1, 392, 1024>}, {pipeline_mode = #tpu.pipeline_mode<synchronous>, transform_indices = @transform_1, window_bounds = array<i64: 3, 392>}, {transform_indices = @transform_2, window_bounds = array<i64: 1, 3, 1024>}]} {
    %c0 = arith.constant 0 : index
    %c0_0 = arith.constant 0 : index
    %0 = vector.load %arg2[%c0, %c0_0] : memref<3x392xbf16, #tpu.memory_space<vmem>>, vector<3x392xbf16>
    %c0_1 = arith.constant 0 : index
    %c0_2 = arith.constant 0 : index
    %c0_3 = arith.constant 0 : index
    %1 = vector.load %arg1[%c0_1, %c0_2, %c0_3] : memref<1x392x1024xbf16, #tpu.memory_space<vmem>>, vector<1x392x1024xbf16>
    %2 = vector.shape_cast %1 : vector<1x392x1024xbf16> to vector<392x1024xbf16>
    %cst = arith.constant dense<0.000000e+00> : vector<3x1024xf32>
    %3 = tpu.matmul %0, %2, %cst {dimension_numbers = #tpu.dot_dimension_numbers<[1], [0], [0], [1], [0, 0, 1, 1], [], []>} : vector<3x392xbf16>, vector<392x1024xbf16>, vector<3x1024xf32> -> vector<3x1024xf32>
    %4 = math.tanh %3 : vector<3x1024xf32>
    %c0_4 = arith.constant 0 : index
    %c0_5 = arith.constant 0 : index
    %c0_6 = arith.constant 0 : index
    %5 = vector.load %arg3[%c0_4, %c0_5, %c0_6] : memref<1x3x1024xf32, #tpu.memory_space<vmem>>, vector<1x3x1024xf32>
    %6 = vector.shape_cast %5 : vector<1x3x1024xf32> to vector<3x1024xf32>
    %7 = vector.shape_cast %4 : vector<3x1024xf32> to vector<1x3x1024xf32>
    tpu.vector_store %arg3[%c0_4, %c0_5, %c0_6], %7 {strides = array<i32>} : memref<1x3x1024xf32, #tpu.memory_space<vmem>>, vector<1x3x1024xf32>,
    return
  }
  func.func @transform_0(%arg0: i32) -> (i32, i32, i32) {
    %c0_i32 = arith.constant 0 : i32
    %c0_i32_0 = arith.constant 0 : i32
    %c0_i32_1 = arith.constant 0 : i32
    return %arg0, %c0_i32, %c0_i32_0 : i32, i32, i32
  }
  func.func @transform_1(%arg0: i32) -> (i32, i32) {
    %c0_i32 = arith.constant 0 : i32
    %c0_i32_0 = arith.constant 0 : i32
    %c0_i32_1 = arith.constant 0 : i32
    return %c0_i32, %c0_i32_0 : i32, i32
  }
  func.func @transform_2(%arg0: i32) -> (i32, i32, i32) {
    %c0_i32 = arith.constant 0 : i32
    %c0_i32_0 = arith.constant 0 : i32
    %c0_i32_1 = arith.constant 0 : i32
    return %arg0, %c0_i32, %c0_i32_0 : i32, i32, i32
  }
}

</mosaic_0001>

<bundles_post_ra>
// kernel: landmarks_detect_forward.10
= control target key start
LH: loop header
LB: loop body
LE: loop exit
PB: predicated region body
PF: predicated region fallthrough
CT: control target
= control target key end

     0   :  { %s1161_s15 = smov 0   ;;  %s1301_s0 = inlined_call_operand.vmem [shape: bf16[2,147,1024], index: 0, kind: input, shape index: {}]   ;;  %s1302_s1 = inlined_call_operand.vmem [shape: bf16[8,147], index: 1, kind: input, shape index: {}]   ;;  %s1303_s2 = inlined_call_operand.vmem [shape: f32[8,1], index: 2, kind: input, shape index: {}]   ;;  %s1304_s3 = inlined_call_operand.vmem [shape: f32[8,1], index: 3, kind: input, shape index: {}]   ;;  %s1305_s4 = inlined_call_operand.vmem [shape: f32[2,8,1024], index: 4, kind: output, shape index: {}]  }
   0x1 LB: > { %s1004_s16 = sadd.s32 4294967295, %s1132_s15   ;;  %p1008_p0 = scmp.ge.s32.totalorder %s1132_s15, 1  ;;  %s1132_s15 = sphi %s1161_s15, %s14_s15  }
   0x2   : > { %p162_p1 = scmp.lt.s32.totalorder %s1132_s15, 3 }
   0x4   : > { %p163_p2 = pnand %p1008_p0, %p162_p1 }
   0x5   : > { %p188_p3 = scmp.lt.s32.totalorder (!%p163_p2), %s1004_s16, 1 }
   0x6   : > { %166 = sbr.rel (%p163_p2) target bundleno = 626 (0x272), region = 36 }
   0xb   : > { %v1172_v0 = vld [vmem:[%s1302_s1] sm:$0xff]  ;;  %vm662_vm0 = vcmask 154624   ;;  %s1307_s16 = smov (!%p188_p3, %s1004_s16), 1  ;;  %vm666_vm1 = vcmask 1040384   ;;  %vm667_vm2 = vcmask 1041408   ;;  %v1134_v61 = vmov 65535  }
   0xc   : > { %v1176_v1 = vcombine.high %v1172_v0, %v1172_v0  ;;  %s1101_s19 = smul.u32 608, %s1307_s16  ;;  %v668_v62 = vsel %vm666_vm1, 4294967295, %v1134_v61  ;;  %s1100_s27 = sshll.u32 %s1307_s16, 6 }
   0xd   : > { %s197_s30 = scalar_lea.vmem %s1305_s4, %s1100_s27 }
   0xe   : > { %1094 = vmatprep.mubr.msk.bf16.mxu0 %vm662_vm0, %v1176_v1  ;;  %1095 = vmatprep.mubr.msk.bf16.mxu1 %vm662_vm0, %v1176_v1  ;;  %s1188_s22 = scalar_lea.vmem %s1301_s0, %s1101_s19 }
   0xf   : > { %v256_v2 = vld [vmem:[%s1188_s22 + $0x1c0] sm:$0xff]  ;;  %v257_v4 = vld [vmem:[%s1188_s22 + $0x1c8] sm:$0xff] }
  0x10   : > { %v260_v3 = vld [vmem:[%s1188_s22 + $0x1e0] sm:$0xff]  ;;  %v261_v6 = vld [vmem:[%s1188_s22 + $0x1e8] sm:$0xff] }
  0x11   : > { %v1071_v5 = vcombine.high %v256_v2, %v260_v3  ;;  %v1070_v7 = vcombine.low %v256_v2, %v260_v3  ;;  %v248_v8 = vld [vmem:[%s1188_s22 + $0x180] sm:$0xff]  ;;  %v1073_v10 = vcombine.high %v257_v4, %v261_v6  ;;  %v1072_v11 = vcombine.low %v257_v4, %v261_v6  ;;  %v249_v13 = vld [vmem:[%s1188_s22 + $0x188] sm:$0xff] }
  0x12   : > { %v252_v9 = vld [vmem:[%s1188_s22 + $0x1a0] sm:$0xff]  ;;  %v253_v14 = vld [vmem:[%s1188_s22 + $0x1a8] sm:$0xff] }
  0x13   : > { %v1063_v12 = vcombine.high %v248_v8, %v252_v9  ;;  %v240_v15 = vld [vmem:[%s1188_s22 + $0x140] sm:$0xff]  ;;  %694 = vmatprep.subr.bf16.mxu0 %v1071_v5  ;;  %v1065_v16 = vcombine.high %v249_v13, %v253_v14  ;;  %v241_v18 = vld [vmem:[%s1188_s22 + $0x148] sm:$0xff]  ;;  %735 = vmatprep.subr.bf16.mxu1 %v1073_v10  ;;  %v1062_v20 = vcombine.low %v248_v8, %v252_v9 }
  0x14   : > { %v244_v17 = vld [vmem:[%s1188_s22 + $0x160] sm:$0xff]  ;;  %v245_v19 = vld [vmem:[%s1188_s22 + $0x168] sm:$0xff]  ;;  %695 = vmatpush1.bf16.msra.mxu0 %v1070_v7  ;;  %736 = vmatpush1.bf16.msra.mxu1 %v1072_v11  ;;  %v1064_v21 = vcombine.low %v249_v13, %v253_v14  ;;  %v1224_v7 = vsel %vm667_vm2, %v668_v62, 0  ;;  %v218_v62 = vld [vmem:[%s1188_s22 + $0x90] sm:$0xff] }
  0x15   : > { %696 = vmatprep.subr.bf16.mxu0 %v1063_v12  ;;  %v1055_v22 = vcombine.high %v240_v15, %v244_v17  ;;  %737 = vmatprep.subr.bf16.mxu1 %v1065_v16  ;;  %v1057_v23 = vcombine.high %v241_v18, %v245_v19  ;;  %v232_v24 = vld [vmem:[%s1188_s22 + $0x100] sm:$0xff]  ;;  %v233_v26 = vld [vmem:[%s1188_s22 + $0x108] sm:$0xff]  ;;  %v1054_v28 = vcombine.low %v240_v15, %v244_v17 }
  0x16   : > { %v236_v25 = vld [vmem:[%s1188_s22 + $0x120] sm:$0xff]  ;;  %v237_v27 = vld [vmem:[%s1188_s22 + $0x128] sm:$0xff]  ;;  %v1056_v29 = vcombine.low %v241_v18, %v245_v19 }
  0x17   : > { %v1047_v30 = vcombine.high %v232_v24, %v236_v25  ;;  %v1049_v31 = vcombine.high %v233_v26, %v237_v27  ;;  %v224_v32 = vld [vmem:[%s1188_s22 + $0xc0] sm:$0xff]  ;;  %v225_v34 = vld [vmem:[%s1188_s22 + $0xc8] sm:$0xff]  ;;  %v1046_v36 = vcombine.low %v232_v24, %v236_v25  ;;  %v1048_v37 = vcombine.low %v233_v26, %v237_v27  ;;  %v262_v24 = vld [vmem:[%s1188_s22 + $0x1f0] sm:$0xff] }
  0x18   : > { %697 = vmatpush1.bf16.msra.mxu0 %v1062_v20  ;;  %738 = vmatpush1.bf16.msra.mxu1 %v1064_v21  ;;  %v228_v33 = vld [vmem:[%s1188_s22 + $0xe0] sm:$0xff]  ;;  %v229_v35 = vld [vmem:[%s1188_s22 + $0xe8] sm:$0xff]  ;;  %v259_v25 = vld [vmem:[%s1188_s22 + $0x1d8] sm:$0xff] }
  0x19   : > { %698 = vmatprep.subr.bf16.mxu0 %v1055_v22  ;;  %739 = vmatprep.subr.bf16.mxu1 %v1057_v23  ;;  %v1039_v38 = vcombine.high %v224_v32, %v228_v33  ;;  %v1041_v39 = vcombine.high %v225_v34, %v229_v35  ;;  %v216_v40 = vld [vmem:[%s1188_s22 + $0x80] sm:$0xff]  ;;  %v217_v42 = vld [vmem:[%s1188_s22 + $0x88] sm:$0xff]  ;;  %v1038_v44 = vcombine.low %v224_v32, %v228_v33  ;;  %v258_v23 = vld [vmem:[%s1188_s22 + $0x1d0] sm:$0xff] }
  0x1a   : > { %v220_v41 = vld [vmem:[%s1188_s22 + $0xa0] sm:$0xff]  ;;  %v221_v43 = vld [vmem:[%s1188_s22 + $0xa8] sm:$0xff]  ;;  %v1040_v45 = vcombine.low %v225_v34, %v229_v35  ;;  %v263_v26 = vld [vmem:[%s1188_s22 + $0x1f8] sm:$0xff]  ;;  %v1242_v33 = vcombine.low %v1172_v0, %v1172_v0 }
  0x1b   : > { %v1031_v46 = vcombine.high %v216_v40, %v220_v41  ;;  %v1033_v47 = vcombine.high %v217_v42, %v221_v43  ;;  %v208_v48 = vld [vmem:[%s1188_s22 + $0x40] sm:$0xff]  ;;  %v209_v50 = vld [vmem:[%s1188_s22 + $0x48] sm:$0xff]  ;;  %v1030_v52 = vcombine.low %v216_v40, %v220_v41  ;;  %v1032_v53 = vcombine.low %v217_v42, %v221_v43  ;;  %v254_v32 = vld [vmem:[%s1188_s22 + $0x1b0] sm:$0xff] }
  0x1c   : > { %699 = vmatpush1.bf16.msra.mxu0 %v1054_v28  ;;  %740 = vmatpush1.bf16.msra.mxu1 %v1056_v29  ;;  %v212_v49 = vld [vmem:[%s1188_s22 + $0x60] sm:$0xff]  ;;  %v213_v51 = vld [vmem:[%s1188_s22 + $0x68] sm:$0xff]  ;;  %v1075_v29 = vcombine.high %v258_v23, %v262_v24  ;;  %v251_v34 = vld [vmem:[%s1188_s22 + $0x198] sm:$0xff] }
  0x1d   : > { %700 = vmatprep.subr.bf16.mxu0 %v1047_v30  ;;  %741 = vmatprep.subr.bf16.mxu1 %v1049_v31  ;;  %v1023_v54 = vcombine.high %v208_v48, %v212_v49  ;;  %v1025_v55 = vcombine.high %v209_v50, %v213_v51  ;;  %v200_v56 = vld [vmem:[%s1188_s22] sm:$0xff]  ;;  %v201_v59 = vld [vmem:[%s1188_s22 + $0x8] sm:$0xff]  ;;  %v1022_v2 = vcombine.low %v208_v48, %v212_v49  ;;  %v250_v31 = vld [vmem:[%s1188_s22 + $0x190] sm:$0xff] }
  0x1e   : > { %v204_v57 = vld [vmem:[%s1188_s22 + $0x20] sm:$0xff]  ;;  %v205_v60 = vld [vmem:[%s1188_s22 + $0x28] sm:$0xff]  ;;  %v1024_v3 = vcombine.low %v209_v50, %v213_v51  ;;  %v1077_v30 = vcombine.high %v259_v25, %v263_v26  ;;  %v255_v35 = vld [vmem:[%s1188_s22 + $0x1b8] sm:$0xff]  ;;  %v1066_v43 = vcombine.low %v250_v31, %v254_v32 }
  0x1f   : > { %v272_v58 = vld [vmem:[%s1188_s22 + $0x240] sm:$0x33]  ;;  %v273_v63 = vld [vmem:[%s1188_s22 + $0x248] sm:$0x33]  ;;  %v1015_v4 = vcombine.high %v200_v56, %v204_v57  ;;  %v1017_v6 = vcombine.high %v201_v59, %v205_v60  ;;  %v1014_v9 = vcombine.low %v200_v56, %v204_v57  ;;  %v1016_v11 = vcombine.low %v201_v59, %v205_v60  ;;  %v242_v40 = vld [vmem:[%s1188_s22 + $0x150] sm:$0xff] }
  0x20   : > { %701 = vmatpush1.bf16.msra.mxu0 %v1046_v36  ;;  %742 = vmatpush1.bf16.msra.mxu1 %v1048_v37  ;;  %v1087_v5 = vcombine.high %v272_v58, %v272_v58  ;;  %v1089_v8 = vcombine.high %v273_v63, %v273_v63  ;;  %v1086_v10 = vcombine.low %v272_v58, %v272_v58  ;;  %v264_v15 = vld [vmem:[%s1188_s22 + $0x200] sm:$0xff]  ;;  %v265_v17 = vld [vmem:[%s1188_s22 + $0x208] sm:$0xff]  ;;  %v246_v41 = vld [vmem:[%s1188_s22 + $0x170] sm:$0xff] }
  0x21   : > { %702 = vmatprep.subr.bf16.mxu0 %v1039_v38  ;;  %743 = vmatprep.subr.bf16.mxu1 %v1041_v39  ;;  %v1088_v13 = vcombine.low %v273_v63, %v273_v63  ;;  %v268_v16 = vld [vmem:[%s1188_s22 + $0x220] sm:$0xff]  ;;  %v269_v18 = vld [vmem:[%s1188_s22 + $0x228] sm:$0xff]  ;;  %v1074_v36 = vcombine.low %v258_v23, %v262_v24  ;;  %v1076_v37 = vcombine.low %v259_v25, %v263_v26  ;;  %v243_v0 = vld [vmem:[%s1188_s22 + $0x158] sm:$0xff] }
  0x22   : > { %v674_v12 = vand.u32 %v1087_v5, %v1224_v7  ;;  %v680_v14 = vand.u32 %v1089_v8, %v1224_v7  ;;  %v671_v19 = vand.u32 %v1086_v10, %v1224_v7  ;;  %v1079_v21 = vcombine.high %v264_v15, %v268_v16  ;;  %v247_v42 = vld [vmem:[%s1188_s22 + $0x178] sm:$0xff]  ;;  %v238_v48 = vld [vmem:[%s1188_s22 + $0x130] sm:$0xff] }
  0x23   : > { %v677_v20 = vand.u32 %v1088_v13, %v1224_v7  ;;  %v1081_v22 = vcombine.high %v265_v17, %v269_v18  ;;  %v1078_v27 = vcombine.low %v264_v15, %v268_v16  ;;  %v1080_v28 = vcombine.low %v265_v17, %v269_v18  ;;  %v235_v49 = vld [vmem:[%s1188_s22 + $0x118] sm:$0xff]  ;;  %v230_v56 = vld [vmem:[%s1188_s22 + $0xf0] sm:$0xff] }
  0x24   : > { %703 = vmatpush1.bf16.msra.mxu0 %v1038_v44  ;;  %744 = vmatpush1.bf16.msra.mxu1 %v1040_v45  ;;  %v1067_v38 = vcombine.high %v250_v31, %v254_v32  ;;  %v1069_v39 = vcombine.high %v251_v34, %v255_v35  ;;  %v1068_v44 = vcombine.low %v251_v34, %v255_v35  ;;  %v239_v50 = vld [vmem:[%s1188_s22 + $0x138] sm:$0xff]  ;;  %v222_v63 = vld [vmem:[%s1188_s22 + $0xb0] sm:$0xff] }
  0x25   : > { %704 = vmatprep.subr.bf16.mxu0 %v1031_v46  ;;  %745 = vmatprep.subr.bf16.mxu1 %v1033_v47  ;;  %v1059_v45 = vcombine.high %v242_v40, %v246_v41  ;;  %v1061_v46 = vcombine.high %v243_v0, %v247_v42  ;;  %v234_v47 = vld [vmem:[%s1188_s22 + $0x110] sm:$0xff]  ;;  %v1058_v51 = vcombine.low %v242_v40, %v246_v41  ;;  %v227_v57 = vld [vmem:[%s1188_s22 + $0xd8] sm:$0xff] }
  0x26   : > { %v231_v58 = vld [vmem:[%s1188_s22 + $0xf8] sm:$0xff]  ;;  %v1050_v59 = vcombine.low %v234_v47, %v238_v48  ;;  %v214_v10 = vld [vmem:[%s1188_s22 + $0x70] sm:$0xff]  ;;  %v1034_v13 = vcombine.low %v218_v62, %v222_v63 }
  0x27   : > { %v1045_v61 = vcombine.high %v227_v57, %v231_v58  ;;  %v1044_v5 = vcombine.low %v227_v57, %v231_v58  ;;  %v202_v17 = vld [vmem:[%s1188_s22 + $0x10] sm:$0xff] }
  0x28   : > { %705 = vmatpush1.bf16.msra.mxu0 %v1030_v52  ;;  %746 = vmatpush1.bf16.msra.mxu1 %v1032_v53  ;;  %v1060_v52 = vcombine.low %v243_v0, %v247_v42  ;;  %v1051_v53 = vcombine.high %v234_v47, %v238_v48  ;;  %v206_v18 = vld [vmem:[%s1188_s22 + $0x30] sm:$0xff] }
  0x29   : > { %706 = vmatprep.subr.bf16.mxu0 %v1023_v54  ;;  %747 = vmatprep.subr.bf16.mxu1 %v1025_v55  ;;  %v1053_v54 = vcombine.high %v235_v49, %v239_v50  ;;  %v226_v55 = vld [vmem:[%s1188_s22 + $0xd0] sm:$0xff]  ;;  %v1019_v25 = vcombine.high %v202_v17, %v206_v18 }
  0x2a   : > { %v1043_v60 = vcombine.high %v226_v55, %v230_v56 }
  0x2c   : > { %707 = vmatpush1.bf16.msra.mxu0 %v1022_v2  ;;  %748 = vmatpush1.bf16.msra.mxu1 %v1024_v3  ;;  %v219_v2 = vld [vmem:[%s1188_s22 + $0x98] sm:$0xff] }
  0x2d   : > { %708 = vmatprep.subr.bf16.mxu0 %v1015_v4  ;;  %749 = vmatprep.subr.bf16.mxu1 %v1017_v6  ;;  %v223_v3 = vld [vmem:[%s1188_s22 + $0xb8] sm:$0xff]  ;;  %v1042_v4 = vcombine.low %v226_v55, %v230_v56  ;;  %v1035_v6 = vcombine.high %v218_v62, %v222_v63 }
  0x2e   : > { %v1037_v8 = vcombine.high %v219_v2, %v223_v3 }
  0x30   : > { %709 = vmatpush1.bf16.msra.mxu0 %v1014_v9  ;;  %750 = vmatpush1.bf16.msra.mxu1 %v1016_v11  ;;  %v210_v9 = vld [vmem:[%s1188_s22 + $0x50] sm:$0xff]  ;;  %v211_v11 = vld [vmem:[%s1188_s22 + $0x58] sm:$0xff] }
  0x31   : > { %722 = vmatprep.subr.bf16.mxu0 %v674_v12  ;;  %763 = vmatprep.subr.bf16.mxu1 %v680_v14  ;;  %v215_v12 = vld [vmem:[%s1188_s22 + $0x78] sm:$0xff]  ;;  %v1036_v14 = vcombine.low %v219_v2, %v223_v3  ;;  %v1027_v15 = vcombine.high %v210_v9, %v214_v10  ;;  %v1026_v23 = vcombine.low %v210_v9, %v214_v10  ;;  %v905_v3 = vld [vmem:[%s1303_s2] sm:$0xff] }
  0x32   : > { %v1029_v16 = vcombine.high %v211_v11, %v215_v12  ;;  %v1028_v24 = vcombine.low %v211_v11, %v215_v12 }
  0x34   : > { %723 = vmatpush2.bf16.msra.mxu0 %v671_v19  ;;  %764 = vmatpush2.bf16.msra.mxu1 %v677_v20  ;;  %v274_v19 = vld [vmem:[%s1188_s22 + $0x250] sm:$0x33]  ;;  %v203_v20 = vld [vmem:[%s1188_s22 + $0x18] sm:$0xff] }
  0x35   : > { %724 = vmatprep.subr.bf16.mxu0 %v1079_v21  ;;  %765 = vmatprep.subr.bf16.mxu1 %v1081_v22  ;;  %v207_v21 = vld [vmem:[%s1188_s22 + $0x38] sm:$0xff]  ;;  %v1091_v26 = vcombine.high %v274_v19, %v274_v19 }
  0x36   : > { %v275_v22 = vld [vmem:[%s1188_s22 + $0x258] sm:$0x33]  ;;  %v1020_v31 = vcombine.low %v203_v20, %v207_v21 }
  0x37   : > { %v686_v32 = vand.u32 %v1091_v26, %v1224_v7  ;;  %v1092_v34 = vcombine.low %v275_v22, %v275_v22 }
  0x38   : > { %725 = vmatpush2.bf16.msra.mxu0 %v1078_v27  ;;  %766 = vmatpush2.bf16.msra.mxu1 %v1080_v28  ;;  %v1021_v27 = vcombine.high %v203_v20, %v207_v21  ;;  %v1093_v28 = vcombine.high %v275_v22, %v275_v22 }
  0x39   : > { %776 = vmatprep.subr.bf16.mxu0 %v1075_v29  ;;  %817 = vmatprep.subr.bf16.mxu1 %v1077_v30  ;;  %v1018_v29 = vcombine.low %v202_v17, %v206_v18  ;;  %v1090_v30 = vcombine.low %v274_v19, %v274_v19  ;;  %v689_v41 = vand.u32 %v1092_v34, %v1224_v7 }
  0x3a   : > { %v692_v35 = vand.u32 %v1093_v28, %v1224_v7 }
  0x3b   : > { %727 = vmatmul.mubr.bf16.vlgmr.msra.gmra.mxu0 %v1242_v33  ;;  %768 = vmatmul.mubr.bf16.vlgmr.msra.gmra.mxu1 %v1242_v33  ;;  %v683_v40 = vand.u32 %v1090_v30, %v1224_v7 }
  0x3c   : > { %777 = vmatpush1.bf16.msra.mxu0 %v1074_v36  ;;  %818 = vmatpush1.bf16.msra.mxu1 %v1076_v37  ;;  %v266_v36 = vld [vmem:[%s1188_s22 + $0x210] sm:$0xff] }
  0x3d   : > { %778 = vmatprep.subr.bf16.mxu0 %v1067_v38  ;;  %819 = vmatprep.subr.bf16.mxu1 %v1069_v39  ;;  %v270_v37 = vld [vmem:[%s1188_s22 + $0x230] sm:$0xff]  ;;  %v267_v38 = vld [vmem:[%s1188_s22 + $0x218] sm:$0xff] }
  0x3e   : > { %1096 = vmatprep.mubr.msk.bf16.mxu0 %vm662_vm0, %v1176_v1  ;;  %1097 = vmatprep.mubr.msk.bf16.mxu1 %vm662_vm0, %v1176_v1  ;;  %v1052_v1 = vcombine.low %v235_v49, %v239_v50  ;;  %v271_v39 = vld [vmem:[%s1188_s22 + $0x238] sm:$0xff]  ;;  %v1083_v0 = vcombine.high %v266_v36, %v270_v37 }
  0x3f   : > { %v1085_v42 = vcombine.high %v267_v38, %v271_v39 }
  0x40   : > { %779 = vmatpush1.bf16.msra.mxu0 %v1066_v43  ;;  %820 = vmatpush1.bf16.msra.mxu1 %v1068_v44  ;;  %v1082_v43 = vcombine.low %v266_v36, %v270_v37  ;;  %v1084_v44 = vcombine.low %v267_v38, %v271_v39 }
  0x41   : > { %780 = vmatprep.subr.bf16.mxu0 %v1059_v45  ;;  %821 = vmatprep.subr.bf16.mxu1 %v1061_v46 }
  0x44   : > { %781 = vmatpush1.bf16.msra.mxu0 %v1058_v51  ;;  %822 = vmatpush1.bf16.msra.mxu1 %v1060_v52 }
  0x45   : > { %782 = vmatprep.subr.bf16.mxu0 %v1051_v53  ;;  %823 = vmatprep.subr.bf16.mxu1 %v1053_v54 }
  0x48   : > { %783 = vmatpush1.bf16.msra.mxu0 %v1050_v59  ;;  %824 = vmatpush1.bf16.msra.mxu1 %v1052_v1 }
  0x49   : > { %784 = vmatprep.subr.bf16.mxu0 %v1043_v60  ;;  %825 = vmatprep.subr.bf16.mxu1 %v1045_v61 }
  0x4c   : > { %785 = vmatpush1.bf16.msra.mxu0 %v1042_v4  ;;  %826 = vmatpush1.bf16.msra.mxu1 %v1044_v5  ;;  %v1135_v4 = vmov 0   ;;  %v919_v5 = vld [vmem:[%s1304_s3] sm:$0xff] }
  0x4d   : > { %786 = vmatprep.subr.bf16.mxu0 %v1035_v6  ;;  %827 = vmatprep.subr.bf16.mxu1 %v1037_v8 }
  0x4e   : > { %1112 = vset.pattern.permute.xlu1 %v1135_v4  ;;  %1113 = vset.pattern.permute.xlu0 %v1135_v4 }
  0x4f   : > { %908 = vperm.xlu1 %1112, %v905_v3  }
  0x50   : > { %787 = vmatpush1.bf16.msra.mxu0 %v1034_v13  ;;  %828 = vmatpush1.bf16.msra.mxu1 %v1036_v14 }
  0x51   : > { %788 = vmatprep.subr.bf16.mxu0 %v1027_v15  ;;  %829 = vmatprep.subr.bf16.mxu1 %v1029_v16 }
  0x53   : > { %922 = vperm.xlu1 %1112, %v919_v5  }
  0x54   : > { %789 = vmatpush1.bf16.msra.mxu0 %v1026_v23  ;;  %830 = vmatpush1.bf16.msra.mxu1 %v1028_v24 }
  0x55   : > { %790 = vmatprep.subr.bf16.mxu0 %v1019_v25  ;;  %831 = vmatprep.subr.bf16.mxu1 %v1021_v27 }
  0x58   : > { %791 = vmatpush1.bf16.msra.mxu0 %v1018_v29  ;;  %832 = vmatpush1.bf16.msra.mxu1 %v1020_v31 }
  0x59   : > { %804 = vmatprep.subr.bf16.mxu0 %v686_v32  ;;  %845 = vmatprep.subr.bf16.mxu1 %v692_v35 }
  0x5c   : > { %805 = vmatpush2.bf16.msra.mxu0 %v683_v40  ;;  %846 = vmatpush2.bf16.msra.mxu1 %v689_v41 }
  0x5d   : > { %806 = vmatprep.subr.bf16.mxu0 %v1083_v0  ;;  %847 = vmatprep.subr.bf16.mxu1 %v1085_v42 }
  0x60   : > { %807 = vmatpush2.bf16.msra.mxu0 %v1082_v43  ;;  %848 = vmatpush2.bf16.msra.mxu1 %v1084_v44 }
  0x63   : > { %809 = vmatmul.mubr.bf16.vlgmr.msra.gmra.mxu0 %v1242_v33  ;;  %850 = vmatmul.mubr.bf16.vlgmr.msra.gmra.mxu1 %v1242_v33 }
  0xca   : > { %v909_v36 = vpop.permute.xlu1 %908 }
  0xfb   : > { %v728_v45 = vpop.f32.mrf.mxu0  ;;  %v769_v46 = vpop.f32.mrf.mxu1 }
  0xfd   : > { %v730_v47 = vpop.f32.mrf.mxu0  ;;  %v771_v48 = vpop.f32.mrf.mxu1 }
  0xfe   : > { %v858_v52 = vadd.f32 %v730_v47, %v728_v45 }
  0xff   : > { %v732_v7 = vpop.f32.mrf.mxu0  ;;  %v773_v49 = vpop.f32.mrf.mxu1 }
 0x100   : > { %v859_v53 = vadd.f32 %v858_v52, %v769_v46  ;;  %v923_v7 = vpop.permute.xlu1 %922 }
 0x101   : > { %v733_v50 = vpop.f32.mrf.mxu0  ;;  %v774_v51 = vpop.f32.mrf.mxu1 }
 0x102   : > { %v860_v54 = vadd.f32 %v859_v53, %v771_v48 }
 0x123   : > { %v810_v55 = vpop.f32.mrf.mxu0  ;;  %v851_v57 = vpop.f32.mrf.mxu1 }
 0x124   : > { %v861_v56 = vadd.f32 %v860_v54, %v810_v55 }
 0x125   : > { %v812_v58 = vpop.f32.mrf.mxu0  ;;  %v853_v1 = vpop.f32.mrf.mxu1 }
 0x126   : > { %v862_v59 = vadd.f32 %v861_v56, %v812_v58 }
 0x127   : > { %v814_v60 = vpop.f32.mrf.mxu0  ;;  %v855_v61 = vpop.f32.mrf.mxu1 }
 0x128   : > { %v863_v33 = vadd.f32 %v862_v59, %v851_v57 }
 0x129   : > { %v815_v62 = vpop.f32.mrf.mxu0  ;;  %v856_v63 = vpop.f32.mrf.mxu1 }
 0x12a   : > { %v864_v2 = vadd.f32 %v863_v33, %v853_v1 }
 0x12c   : > { %865 = vadd.xlane.f32.xlu0 %v864_v2 }
 0x1b5   : > { %v866_v6 = vpop.xlane.xlu0 %865 }
 0x1b6   : > { %v868_v8 = vmul.f32 0.0009765625, %v866_v6 }
 0x1b8   : > { %v869_v9 = vsub.f32 %v728_v45, %v868_v8  ;;  %v870_v10 = vsub.f32 %v730_v47, %v868_v8  ;;  %v871_v11 = vsub.f32 %v769_v46, %v868_v8  ;;  %v872_v12 = vsub.f32 %v771_v48, %v868_v8 }
 0x1b9   : > { %v873_v15 = vsub.f32 %v810_v55, %v868_v8  ;;  %v874_v18 = vsub.f32 %v812_v58, %v868_v8  ;;  %v875_v21 = vsub.f32 %v851_v57, %v868_v8  ;;  %v876_v24 = vsub.f32 %v853_v1, %v868_v8 }
 0x1ba   : > { %v877_v13 = vmul.f32 %v869_v9, %v869_v9  ;;  %v878_v14 = vmul.f32 %v870_v10, %v870_v10  ;;  %v879_v16 = vmul.f32 %v871_v11, %v871_v11  ;;  %v880_v19 = vmul.f32 %v872_v12, %v872_v12 }
 0x1bb   : > { %v881_v22 = vmul.f32 %v873_v15, %v873_v15  ;;  %v882_v25 = vmul.f32 %v874_v18, %v874_v18  ;;  %v883_v27 = vmul.f32 %v875_v21, %v875_v21  ;;  %v884_v29 = vmul.f32 %v876_v24, %v876_v24 }
 0x1bc   : > { %v885_v17 = vadd.f32 %v878_v14, %v877_v13 }
 0x1be   : > { %v886_v20 = vadd.f32 %v885_v17, %v879_v16 }
 0x1c0   : > { %v887_v23 = vadd.f32 %v886_v20, %v880_v19 }
 0x1c2   : > { %v888_v26 = vadd.f32 %v887_v23, %v881_v22 }
 0x1c4   : > { %v889_v28 = vadd.f32 %v888_v26, %v882_v25 }
 0x1c6   : > { %v890_v30 = vadd.f32 %v889_v28, %v883_v27 }
 0x1c8   : > { %v891_v31 = vadd.f32 %v890_v30, %v884_v29 }
 0x1ca   : > { %892 = vadd.xlane.f32.xlu0 %v891_v31 }
 0x253   : > { %v893_v32 = vpop.xlane.xlu0 %892 }
 0x254   : > { %v894_v34 = vmul.f32 0.0009765625, %v893_v32 }
 0x256   : > { %v895_v35 = vadd.f32 1e-05, %v894_v34 }
 0x258   : > { %1124 = vrsqrt.f32 %v895_v35 }
 0x265   : > { %v1125_v37 = vpop.eup %1124 }
 0x266   : > { %v897_v38 = vmul.f32 %v1125_v37, %v869_v9  ;;  %v898_v39 = vmul.f32 %v1125_v37, %v870_v10  ;;  %v899_v40 = vmul.f32 %v1125_v37, %v871_v11  ;;  %v900_v41 = vmul.f32 %v1125_v37, %v872_v12 }
 0x267   : > { %v901_v0 = vmul.f32 %v1125_v37, %v873_v15  ;;  %v902_v42 = vmul.f32 %v1125_v37, %v874_v18  ;;  %v903_v43 = vmul.f32 %v1125_v37, %v875_v21  ;;  %v904_v44 = vmul.f32 %v1125_v37, %v876_v24 }
 0x268   : > { %v911_v45 = vmul.f32 %v909_v36, %v897_v38  ;;  %v912_v46 = vmul.f32 %v909_v36, %v898_v39  ;;  %v913_v47 = vmul.f32 %v909_v36, %v899_v40  ;;  %v914_v48 = vmul.f32 %v909_v36, %v900_v41 }
 0x269   : > { %v915_v49 = vmul.f32 %v909_v36, %v901_v0  ;;  %v916_v50 = vmul.f32 %v909_v36, %v902_v42  ;;  %v917_v51 = vmul.f32 %v909_v36, %v903_v43  ;;  %v918_v52 = vmul.f32 %v909_v36, %v904_v44 }
 0x26a   : > { %v925_v53 = vadd.f32 %v923_v7, %v911_v45  ;;  %v926_v54 = vadd.f32 %v923_v7, %v912_v46  ;;  %v927_v55 = vadd.f32 %v923_v7, %v913_v47  ;;  %v928_v56 = vadd.f32 %v923_v7, %v914_v48 }
 0x26b   : > { %v929_v57 = vadd.f32 %v923_v7, %v915_v49  ;;  %v930_v58 = vadd.f32 %v923_v7, %v916_v50  ;;  %v931_v59 = vadd.f32 %v923_v7, %v917_v51  ;;  %v932_v1 = vadd.f32 %v923_v7, %v918_v52 }
 0x26c   : > { %v933_v60 = vmax.f32 %v925_v53, 0.0  ;;  %v934_v61 = vmax.f32 %v926_v54, 0.0  ;;  %v935_v33 = vmax.f32 %v927_v55, 0.0  ;;  %v936_v62 = vmax.f32 %v928_v56, 0.0 }
 0x26d   : > { %v937_v63 = vmax.f32 %v929_v57, 0.0  ;;  %v938_v2 = vmax.f32 %v930_v58, 0.0  ;;  %v939_v3 = vmax.f32 %v931_v59, 0.0  ;;  %v940_v4 = vmax.f32 %v932_v1, 0.0 }
 0x26e   : > { %941 = vst [vmem:[%s197_s30] sm:$0xff] %v933_v60  ;;  %942 = vst [vmem:[%s197_s30 + $0x8] sm:$0xff] %v934_v61 }
 0x26f   : > { %943 = vst [vmem:[%s197_s30 + $0x10] sm:$0xff] %v935_v33  ;;  %944 = vst [vmem:[%s197_s30 + $0x18] sm:$0xff] %v936_v62 }
 0x270   : > { %945 = vst [vmem:[%s197_s30 + $0x20] sm:$0xff] %v937_v63  ;;  %946 = vst [vmem:[%s197_s30 + $0x28] sm:$0xff] %v938_v2 }
 0x271   : > { %947 = vst [vmem:[%s197_s30 + $0x30] sm:$0xff] %v939_v3  ;;  %948 = vst [vmem:[%s197_s30 + $0x38] sm:$0xff] %v940_v4 }
 0x272 PF: > { %s14_s15 = sadd.s32 1, %s1132_s15  }
 0x273   : > { %p11_p4 = scmp.ge.s32.totalorder %s14_s15, 4  }
 0x275   :  { %13 = sbr.rel (!%p11_p4) target bundleno = 1 (0x1), region = 66 }

// kernel: landmarks_detect_forward.11
= control target key start
LH: loop header
LB: loop body
LE: loop exit
PB: predicated region body
PF: predicated region fallthrough
CT: control target
= control target key end

     0   :  { %s578_s15 = smov 0   ;;  %s614_s0 = inlined_call_operand.vmem [shape: bf16[2,128,256], index: 0, kind: input, shape index: {}]   ;;  %s615_s1 = inlined_call_operand.vmem [shape: bf16[16,128], index: 1, kind: input, shape index: {}]   ;;  %s616_s2 = inlined_call_operand.vmem [shape: f32[16,1], index: 2, kind: input, shape index: {}]   ;;  %s617_s3 = inlined_call_operand.vmem [shape: f32[16,1], index: 3, kind: input, shape index: {}]   ;;  %s618_s4 = inlined_call_operand.vmem [shape: f32[2,16,256], index: 4, kind: output, shape index: {}]  }
   0x1 LB: > { %s474_s16 = sadd.s32 4294967295, %s550_s15   ;;  %p478_p0 = scmp.ge.s32.totalorder %s550_s15, 1  ;;  %s550_s15 = sphi %s578_s15, %s14_s15  }
   0x2   : > { %p162_p1 = scmp.lt.s32.totalorder %s550_s15, 3 }
   0x4   : > { %p163_p2 = pnand %p478_p0, %p162_p1 }
   0x5   : > { %p188_p3 = scmp.lt.s32.totalorder (!%p163_p2), %s474_s16, 1 }
   0x6   : > { %166 = sbr.rel (%p163_p2) target bundleno = 559 (0x22f), region = 36 }
   0xb   : > { %v552_v0 = vmov 0   ;;  %s620_s16 = smov (!%p188_p3, %s474_s16), 1  ;;  %v539_v17 = vld [vmem:[%s615_s1] sm:$0xff]   ;;  %v380_v18 = vld [vmem:[%s616_s2 + $0x8] sm:$0xff] }
   0xc   : > { %335 = vmatprep.mubr.bf16.mxu0 %v552_v0  ;;  %514 = vset.pattern.permute.xlu1 %v552_v0  ;;  %s502_s17 = sshll.u32 %s620_s16, 7  ;;  %v395_v19 = vld [vmem:[%s617_s3] sm:$0xff]  ;;  %v396_v41 = vld [vmem:[%s617_s3 + $0x8] sm:$0xff]  ;;  %s503_s5 = sshll.u32 %s620_s16, 5 }
   0xd   : > { %513 = vset.pattern.permute.xlu0 %v552_v0  ;;  %s192_s20 = scalar_lea.vmem %s614_s0, %s502_s17  ;;  %388 = vperm.xlu1 %514, %v380_v18   ;;  %v379_v26 = vld [vmem:[%s616_s2] sm:$0xff]  ;;  %s197_s8 = scalar_lea.vmem %s618_s4, %s503_s5 }
   0xe   : > { %v515_v1 = vld [vmem:[%s192_s20 + $0x74] ss:$8 sps:$4 sm:$0xff]   ;;  %v517_v2 = vld [vmem:[%s192_s20 + $0x70] ss:$8 sps:$4 sm:$0xff]   ;;  %v518_v3 = vld [vmem:[%s192_s20 + $0x64] ss:$8 sps:$4 sm:$0xff]  }
   0xf   : > { %303 = vmatprep.subr.bf16.mxu0 %v515_v1  ;;  %v520_v4 = vld [vmem:[%s192_s20 + $0x60] ss:$8 sps:$4 sm:$0xff]   ;;  %v521_v5 = vld [vmem:[%s192_s20 + $0x54] ss:$8 sps:$4 sm:$0xff]   ;;  %v523_v6 = vld [vmem:[%s192_s20 + $0x50] ss:$8 sps:$4 sm:$0xff]  }
  0x10   : > { %304 = vmatpush1.bf16.msra.mxu0 %v517_v2  ;;  %v524_v7 = vld [vmem:[%s192_s20 + $0x44] ss:$8 sps:$4 sm:$0xff]   ;;  %v526_v8 = vld [vmem:[%s192_s20 + $0x40] ss:$8 sps:$4 sm:$0xff]   ;;  %v527_v9 = vld [vmem:[%s192_s20 + $0x34] ss:$8 sps:$4 sm:$0xff]  }
  0x11   : > { %305 = vmatprep.subr.bf16.mxu0 %v518_v3  ;;  %v529_v10 = vld [vmem:[%s192_s20 + $0x30] ss:$8 sps:$4 sm:$0xff]   ;;  %v530_v11 = vld [vmem:[%s192_s20 + $0x24] ss:$8 sps:$4 sm:$0xff]   ;;  %v532_v12 = vld [vmem:[%s192_s20 + $0x20] ss:$8 sps:$4 sm:$0xff]   ;;  %399 = vperm.xlu1 %514, %v395_v19  }
  0x12   : > { %v533_v13 = vld [vmem:[%s192_s20 + $0x14] ss:$8 sps:$4 sm:$0xff]   ;;  %v535_v14 = vld [vmem:[%s192_s20 + $0x10] ss:$8 sps:$4 sm:$0xff]   ;;  %v536_v15 = vld [vmem:[%s192_s20 + $0x4] ss:$8 sps:$4 sm:$0xff]  }
  0x13   : > { %v538_v16 = vld [vmem:[%s192_s20] ss:$8 sps:$4 sm:$0xff]  }
  0x14   : > { %306 = vmatpush1.bf16.msra.mxu0 %v520_v4 }
  0x15   : > { %307 = vmatprep.subr.bf16.mxu0 %v521_v5 }
  0x18   : > { %308 = vmatpush1.bf16.msra.mxu0 %v523_v6 }
  0x19   : > { %309 = vmatprep.subr.bf16.mxu0 %v524_v7 }
  0x1c   : > { %310 = vmatpush1.bf16.msra.mxu0 %v526_v8 }
  0x1d   : > { %311 = vmatprep.subr.bf16.mxu0 %v527_v9 }
  0x20   : > { %312 = vmatpush1.bf16.msra.mxu0 %v529_v10 }
  0x21   : > { %313 = vmatprep.subr.bf16.mxu0 %v530_v11 }
  0x24   : > { %314 = vmatpush1.bf16.msra.mxu0 %v532_v12 }
  0x25   : > { %315 = vmatprep.subr.bf16.mxu0 %v533_v13 }
  0x28   : > { %316 = vmatpush1.bf16.msra.mxu0 %v535_v14 }
  0x29   : > { %317 = vmatprep.subr.bf16.mxu0 %v536_v15 }
  0x2c   : > { %318 = vmatpush1.bf16.msra.mxu0 %v538_v16 }
  0x2f   : > { %336 = vmatmul.mubr.bf16.vlgmr.msra.gmra.mxu0 %v539_v17 }
  0x88   : > { %v389_v42 = vpop.permute.xlu1 %388 }
  0x8c   : > { %v400_v43 = vpop.permute.xlu1 %399 }
  0xef   : > { %v337_v20 = vpop.f32.mrf.mxu0 }
  0xf1   : > { %v339_v21 = vpop.f32.mrf.mxu0 }
  0xf2   : > { %v346_v22 = vadd.f32 %v339_v21, %v337_v20 }
  0xf3   : > { %v341_v23 = vpop.f32.mrf.mxu0 }
  0xf4   : > { %347 = vadd.xlane.f32.xlu0 %v346_v22 }
  0xf5   : > { %v343_v24 = vpop.f32.mrf.mxu0 }
  0xf6   : > { %v349_v25 = vadd.f32 %v343_v24, %v341_v23 }
  0xf8   : > { %350 = vadd.xlane.f32.xlu0 %v349_v25 }
 0x10e   : > { %383 = vperm.xlu0 %513, %v379_v26  }
 0x17d   : > { %v348_v27 = vpop.xlane.xlu0 %347 }
 0x17e   : > { %v353_v28 = vmul.f32 0.00390625, %v348_v27 }
 0x180   : > { %v355_v29 = vsub.f32 %v337_v20, %v353_v28  ;;  %v356_v30 = vsub.f32 %v339_v21, %v353_v28 }
 0x181   : > { %v351_v31 = vpop.xlane.xlu0 %350 }
 0x182   : > { %v354_v32 = vmul.f32 0.00390625, %v351_v31  ;;  %v359_v33 = vmul.f32 %v355_v29, %v355_v29  ;;  %v360_v34 = vmul.f32 %v356_v30, %v356_v30 }
 0x184   : > { %v357_v35 = vsub.f32 %v341_v23, %v354_v32  ;;  %v358_v36 = vsub.f32 %v343_v24, %v354_v32  ;;  %v363_v37 = vadd.f32 %v360_v34, %v359_v33 }
 0x186   : > { %364 = vadd.xlane.f32.xlu1 %v363_v37  ;;  %v361_v38 = vmul.f32 %v357_v35, %v357_v35  ;;  %v362_v39 = vmul.f32 %v358_v36, %v358_v36 }
 0x188   : > { %v366_v40 = vadd.f32 %v362_v39, %v361_v38 }
 0x189   : > { %v384_v51 = vpop.permute.xlu0 %383 }
 0x18a   : > { %367 = vadd.xlane.f32.xlu1 %v366_v40 }
 0x19b   : > { %404 = vperm.xlu1 %514, %v396_v41  }
 0x20f   : > { %v365_v44 = vpop.xlane.xlu1 %364 }
 0x210   : > { %v369_v45 = vmul.f32 0.00390625, %v365_v44 }
 0x212   : > { %v371_v46 = vadd.f32 1e-05, %v369_v45 }
 0x213   : > { %v368_v47 = vpop.xlane.xlu1 %367 }
 0x214   : > { %540 = vrsqrt.f32 %v371_v46  ;;  %v370_v48 = vmul.f32 0.00390625, %v368_v47 }
 0x216   : > { %v372_v49 = vadd.f32 1e-05, %v370_v48 }
 0x217   : > { %v405_v1 = vpop.permute.xlu1 %404 }
 0x218   : > { %542 = vrsqrt.f32 %v372_v49 }
 0x221   : > { %v541_v50 = vpop.eup %540 }
 0x222   : > { %v375_v52 = vmul.f32 %v541_v50, %v355_v29  ;;  %v376_v53 = vmul.f32 %v541_v50, %v356_v30 }
 0x224   : > { %v391_v54 = vmul.f32 %v384_v51, %v375_v52  ;;  %v392_v55 = vmul.f32 %v384_v51, %v376_v53 }
 0x225   : > { %v543_v56 = vpop.eup %542 }
 0x226   : > { %v377_v57 = vmul.f32 %v543_v56, %v357_v35  ;;  %v378_v58 = vmul.f32 %v543_v56, %v358_v36  ;;  %v407_v59 = vadd.f32 %v400_v43, %v391_v54  ;;  %v408_v60 = vadd.f32 %v400_v43, %v392_v55 }
 0x228   : > { %v393_v61 = vmul.f32 %v389_v42, %v377_v57  ;;  %v394_v62 = vmul.f32 %v389_v42, %v378_v58  ;;  %v411_v63 = vmax.f32 %v407_v59, 0.0  ;;  %v412_v0 = vmax.f32 %v408_v60, 0.0 }
 0x22a   : > { %v409_v2 = vadd.f32 %v405_v1, %v393_v61  ;;  %v410_v3 = vadd.f32 %v405_v1, %v394_v62  ;;  %415 = vst [vmem:[%s197_s8] sm:$0xff] %v411_v63  ;;  %416 = vst [vmem:[%s197_s8 + $0x8] sm:$0xff] %v412_v0 }
 0x22c   : > { %v413_v4 = vmax.f32 %v409_v2, 0.0  ;;  %v414_v5 = vmax.f32 %v410_v3, 0.0 }
 0x22e   : > { %417 = vst [vmem:[%s197_s8 + $0x10] sm:$0xff] %v413_v4  ;;  %418 = vst [vmem:[%s197_s8 + $0x18] sm:$0xff] %v414_v5 }
 0x22f PF: > { %s14_s15 = sadd.s32 1, %s550_s15  }
 0x230   : > { %p11_p4 = scmp.ge.s32.totalorder %s14_s15, 4  }
 0x232   :  { %13 = sbr.rel (!%p11_p4) target bundleno = 1 (0x1), region = 66 }

// kernel: landmarks_detect_forward.12
= control target key start
LH: loop header
LB: loop body
LE: loop exit
PB: predicated region body
PF: predicated region fallthrough
CT: control target
= control target key end

     0   :  { %s725_s15 = smov 0   ;;  %s812_s0 = inlined_call_operand.vmem [shape: bf16[2,256,64], index: 0, kind: input, shape index: {}]   ;;  %s813_s1 = inlined_call_operand.vmem [shape: bf16[32,256], index: 1, kind: input, shape index: {}]   ;;  %s814_s2 = inlined_call_operand.vmem [shape: f32[32,1], index: 2, kind: input, shape index: {}]   ;;  %s815_s3 = inlined_call_operand.vmem [shape: f32[32,1], index: 3, kind: input, shape index: {}]   ;;  %s816_s4 = inlined_call_operand.vmem [shape: f32[2,32,64], index: 4, kind: output, shape index: {}]  }
   0x1 LB: > { %s573_s16 = sadd.s32 4294967295, %s697_s15   ;;  %p577_p0 = scmp.ge.s32.totalorder %s697_s15, 1  ;;  %s697_s15 = sphi %s725_s15, %s14_s15  }
   0x2   : > { %p162_p1 = scmp.lt.s32.totalorder %s697_s15, 3 }
   0x4   : > { %p163_p2 = pnand %p577_p0, %p162_p1 }
   0x5   : > { %p188_p3 = scmp.lt.s32.totalorder (!%p163_p2), %s573_s16, 1 }
   0x6   : > { %166 = sbr.rel (%p163_p2) target bundleno = 563 (0x233), region = 36 }
   0xb   : > { %v679_v0 = vld [vmem:[%s813_s1 + $0x4] ss:$8 sps:$4 sm:$0xff]   ;;  %s818_s16 = smov (!%p188_p3, %s573_s16), 1  ;;  %v682_v1 = vld [vmem:[%s813_s1 + $0x14] ss:$8 sps:$4 sm:$0xff]   ;;  %v699_v20 = vmov 0  }
   0xc   : > { %383 = vmatprep.mubr.bf16.mxu0 %v679_v0  ;;  %s604_s21 = sshll.u32 %s818_s16, 7  ;;  %391 = vmatprep.mubr.bf16.mxu1 %v682_v1  ;;  %v677_v18 = vld [vmem:[%s813_s1] ss:$8 sps:$4 sm:$0xff]   ;;  %v680_v19 = vld [vmem:[%s813_s1 + $0x10] ss:$8 sps:$4 sm:$0xff]   ;;  %vm400_vm0 = vcmask 523264  }
   0xd   : > { %s745_s24 = scalar_lea.vmem %s812_s0, %s604_s21  ;;  %660 = vset.pattern.permute.xlu1 %v699_v20  ;;  %659 = vset.pattern.permute.xlu0 %v699_v20  ;;  %v455_v37 = vld [vmem:[%s814_s2 + $0x8] sm:$0xff]  ;;  %v456_v38 = vld [vmem:[%s814_s2 + $0x10] sm:$0xff]  ;;  %v457_v39 = vld [vmem:[%s814_s2 + $0x18] sm:$0xff]  ;;  %s605_s21 = sshll.u32 %s818_s16, 5 }
   0xe   : > { %v661_v2 = vld [vmem:[%s745_s24 + $0x78] sm:$0xff]   ;;  %v663_v4 = vld [vmem:[%s745_s24 + $0x70] sm:$0xff]   ;;  %v665_v6 = vld [vmem:[%s745_s24 + $0x68] sm:$0xff]  }
   0xf   : > { %v662_v3 = vld [vmem:[%s745_s24 + $0x38] sm:$0xff]   ;;  %606 = vmatprep.subr.bf16.mxu0 %v661_v2  ;;  %634 = vmatprep.subr.bf16.mxu1 %v661_v2  ;;  %v664_v5 = vld [vmem:[%s745_s24 + $0x30] sm:$0xff]   ;;  %v666_v7 = vld [vmem:[%s745_s24 + $0x28] sm:$0xff]  }
  0x10   : > { %607 = vmatpush3.bf16.msra.mxu0 %v662_v3  ;;  %642 = vmatpush3.bf16.msra.mxu1 %v662_v3  ;;  %v667_v8 = vld [vmem:[%s745_s24 + $0x60] sm:$0xff]   ;;  %v669_v10 = vld [vmem:[%s745_s24 + $0x58] sm:$0xff]   ;;  %v671_v12 = vld [vmem:[%s745_s24 + $0x50] sm:$0xff]  }
  0x11   : > { %608 = vmatprep.subr.bf16.mxu0 %v663_v4  ;;  %635 = vmatprep.subr.bf16.mxu1 %v663_v4  ;;  %v668_v9 = vld [vmem:[%s745_s24 + $0x20] sm:$0xff]   ;;  %v670_v11 = vld [vmem:[%s745_s24 + $0x18] sm:$0xff]   ;;  %v672_v13 = vld [vmem:[%s745_s24 + $0x10] sm:$0xff]  }
  0x12   : > { %v673_v14 = vld [vmem:[%s745_s24 + $0x48] sm:$0xff]   ;;  %v675_v16 = vld [vmem:[%s745_s24 + $0x40] sm:$0xff]   ;;  %v484_v42 = vld [vmem:[%s815_s3 + $0x10] sm:$0xff] }
  0x13   : > { %v674_v15 = vld [vmem:[%s745_s24 + $0x8] sm:$0xff]   ;;  %v676_v17 = vld [vmem:[%s745_s24] sm:$0xff]   ;;  %v485_v63 = vld [vmem:[%s815_s3 + $0x18] sm:$0xff]  ;;  %s197_s24 = scalar_lea.vmem %s816_s4, %s605_s21 }
  0x14   : > { %609 = vmatpush3.bf16.msra.mxu0 %v664_v5  ;;  %643 = vmatpush3.bf16.msra.mxu1 %v664_v5  ;;  %v482_v40 = vld [vmem:[%s815_s3] sm:$0xff]  ;;  %v483_v41 = vld [vmem:[%s815_s3 + $0x8] sm:$0xff] }
  0x15   : > { %610 = vmatprep.subr.bf16.mxu0 %v665_v6  ;;  %636 = vmatprep.subr.bf16.mxu1 %v665_v6  ;;  %v454_v0 = vld [vmem:[%s814_s2] sm:$0xff] }
  0x18   : > { %611 = vmatpush3.bf16.msra.mxu0 %v666_v7  ;;  %644 = vmatpush3.bf16.msra.mxu1 %v666_v7 }
  0x19   : > { %612 = vmatprep.subr.bf16.mxu0 %v667_v8  ;;  %637 = vmatprep.subr.bf16.mxu1 %v667_v8 }
  0x1c   : > { %613 = vmatpush3.bf16.msra.mxu0 %v668_v9  ;;  %645 = vmatpush3.bf16.msra.mxu1 %v668_v9 }
  0x1d   : > { %614 = vmatprep.subr.bf16.mxu0 %v669_v10  ;;  %638 = vmatprep.subr.bf16.mxu1 %v669_v10 }
  0x20   : > { %615 = vmatpush3.bf16.msra.mxu0 %v670_v11  ;;  %646 = vmatpush3.bf16.msra.mxu1 %v670_v11 }
  0x21   : > { %616 = vmatprep.subr.bf16.mxu0 %v671_v12  ;;  %639 = vmatprep.subr.bf16.mxu1 %v671_v12 }
  0x24   : > { %617 = vmatpush3.bf16.msra.mxu0 %v672_v13  ;;  %647 = vmatpush3.bf16.msra.mxu1 %v672_v13 }
  0x25   : > { %618 = vmatprep.subr.bf16.mxu0 %v673_v14  ;;  %640 = vmatprep.subr.bf16.mxu1 %v673_v14 }
  0x28   : > { %619 = vmatpush3.bf16.msra.mxu0 %v674_v15  ;;  %648 = vmatpush3.bf16.msra.mxu1 %v674_v15 }
  0x29   : > { %620 = vmatprep.subr.bf16.mxu0 %v675_v16  ;;  %641 = vmatprep.subr.bf16.mxu1 %v675_v16 }
  0x2c   : > { %621 = vmatpush3.bf16.msra.mxu0 %v676_v17  ;;  %649 = vmatpush3.bf16.msra.mxu1 %v676_v17 }
  0x2f   : > { %384 = vmatmul.mubr.bf16.vlgmr.msra.gmra.mxu0 %v677_v18  ;;  %392 = vmatmul.mubr.bf16.vlgmr.msra.gmra.mxu1 %v680_v19 }
  0xef   : > { %v622_v21 = vpop.f32.mrf.mxu0  ;;  %v628_v22 = vpop.f32.mrf.mxu1 }
  0xf1   : > { %v623_v23 = vpop.f32.mrf.mxu0  ;;  %v629_v24 = vpop.f32.mrf.mxu1 }
  0xf2   : > { %v624_v25 = vadd.f32 %v623_v23, %v622_v21  ;;  %v630_v26 = vadd.f32 %v629_v24, %v628_v22 }
  0xf3   : > { %v625_v27 = vpop.f32.mrf.mxu0  ;;  %v631_v28 = vpop.f32.mrf.mxu1 }
  0xf4   : > { %v407_v29 = vsel %vm400_vm0, %v630_v26, 0.0  ;;  %v401_v30 = vsel %vm400_vm0, %v624_v25, 0.0 }
  0xf5   : > { %v632_v31 = vpop.f32.mrf.mxu1  ;;  %408 = vadd.xlane.f32.xlu1 %v407_v29  ;;  %v626_v32 = vpop.f32.mrf.mxu0  ;;  %402 = vadd.xlane.f32.xlu0 %v401_v30 }
  0xf6   : > { %v633_v33 = vadd.f32 %v632_v31, %v631_v28  ;;  %v627_v34 = vadd.f32 %v626_v32, %v625_v27 }
  0xf8   : > { %v410_v35 = vsel %vm400_vm0, %v633_v33, 0.0  ;;  %v404_v36 = vsel %vm400_vm0, %v627_v34, 0.0 }
  0xf9   : > { %411 = vadd.xlane.f32.xlu1 %v410_v35  ;;  %405 = vadd.xlane.f32.xlu0 %v404_v36 }
 0x10a   : > { %465 = vperm.xlu1 %660, %v455_v37  }
 0x10e   : > { %470 = vperm.xlu1 %660, %v456_v38  }
 0x112   : > { %475 = vperm.xlu1 %660, %v457_v39  }
 0x116   : > { %488 = vperm.xlu1 %660, %v482_v40  }
 0x11a   : > { %493 = vperm.xlu1 %660, %v483_v41  }
 0x11e   : > { %498 = vperm.xlu1 %660, %v484_v42  }
 0x17e   : > { %v409_v43 = vpop.xlane.xlu1 %408  ;;  %v403_v44 = vpop.xlane.xlu0 %402 }
 0x17f   : > { %v416_v45 = vmul.f32 0.015625, %v409_v43  ;;  %v414_v46 = vmul.f32 0.015625, %v403_v44 }
 0x181   : > { %v420_v47 = vsub.f32 %v630_v26, %v416_v45  ;;  %v418_v48 = vsub.f32 %v624_v25, %v414_v46 }
 0x182   : > { %v412_v49 = vpop.xlane.xlu1 %411  ;;  %v406_v50 = vpop.xlane.xlu0 %405 }
 0x183   : > { %v417_v51 = vmul.f32 0.015625, %v412_v49  ;;  %v415_v52 = vmul.f32 0.015625, %v406_v50  ;;  %v422_v53 = vmul.f32 %v418_v48, %v418_v48  ;;  %v424_v57 = vmul.f32 %v420_v47, %v420_v47 }
 0x185   : > { %v421_v54 = vsub.f32 %v633_v33, %v417_v51  ;;  %v419_v55 = vsub.f32 %v627_v34, %v415_v52  ;;  %v426_v56 = vsel %vm400_vm0, %v422_v53, 0.0  ;;  %v432_v59 = vsel %vm400_vm0, %v424_v57, 0.0 }
 0x186   : > { %427 = vadd.xlane.f32.xlu0 %v426_v56  ;;  %v466_v1 = vpop.permute.xlu1 %465 }
 0x187   : > { %v423_v58 = vmul.f32 %v419_v55, %v419_v55  ;;  %v425_v61 = vmul.f32 %v421_v54, %v421_v54 }
 0x189   : > { %v429_v60 = vsel %vm400_vm0, %v423_v58, 0.0  ;;  %v435_v62 = vsel %vm400_vm0, %v425_v61, 0.0 }
 0x18a   : > { %433 = vadd.xlane.f32.xlu0 %v432_v59  ;;  %430 = vadd.xlane.f32.xlu1 %v429_v60  ;;  %v471_v2 = vpop.permute.xlu1 %470 }
 0x18e   : > { %436 = vadd.xlane.f32.xlu1 %v435_v62  ;;  %v476_v3 = vpop.permute.xlu1 %475 }
 0x192   : > { %v489_v4 = vpop.permute.xlu1 %488 }
 0x196   : > { %v494_v5 = vpop.permute.xlu1 %493 }
 0x19a   : > { %v499_v6 = vpop.permute.xlu1 %498 }
 0x19f   : > { %503 = vperm.xlu1 %660, %v485_v63  }
 0x1a0   : > { %460 = vperm.xlu0 %659, %v454_v0  }
 0x20f   : > { %v428_v7 = vpop.xlane.xlu0 %427 }
 0x210   : > { %v438_v8 = vmul.f32 0.015625, %v428_v7 }
 0x212   : > { %v442_v9 = vadd.f32 1e-05, %v438_v8 }
 0x213   : > { %v431_v10 = vpop.xlane.xlu1 %430  ;;  %v434_v11 = vpop.xlane.xlu0 %433 }
 0x214   : > { %683 = vrsqrt.f32 %v442_v9  ;;  %v439_v12 = vmul.f32 0.015625, %v431_v10  ;;  %v440_v13 = vmul.f32 0.015625, %v434_v11 }
 0x216   : > { %v443_v14 = vadd.f32 1e-05, %v439_v12  ;;  %v444_v15 = vadd.f32 1e-05, %v440_v13 }
 0x217   : > { %v437_v16 = vpop.xlane.xlu1 %436 }
 0x218   : > { %685 = vrsqrt.f32 %v443_v14  ;;  %v441_v17 = vmul.f32 0.015625, %v437_v16 }
 0x219   : > { %687 = vrsqrt.f32 %v444_v15 }
 0x21a   : > { %v445_v18 = vadd.f32 1e-05, %v441_v17 }
 0x21b   : > { %v461_v20 = vpop.permute.xlu0 %460  ;;  %v504_v37 = vpop.permute.xlu1 %503 }
 0x21c   : > { %689 = vrsqrt.f32 %v445_v18 }
 0x221   : > { %v684_v19 = vpop.eup %683 }
 0x222   : > { %v450_v21 = vmul.f32 %v684_v19, %v418_v48 }
 0x224   : > { %v478_v22 = vmul.f32 %v461_v20, %v450_v21 }
 0x225   : > { %v686_v23 = vpop.eup %685 }
 0x226   : > { %v688_v24 = vpop.eup %687  ;;  %v451_v25 = vmul.f32 %v686_v23, %v419_v55  ;;  %v506_v26 = vadd.f32 %v489_v4, %v478_v22 }
 0x227   : > { %v452_v27 = vmul.f32 %v688_v24, %v420_v47 }
 0x228   : > { %v479_v28 = vmul.f32 %v466_v1, %v451_v25  ;;  %v510_v29 = vmax.f32 %v506_v26, 0.0 }
 0x229   : > { %v690_v30 = vpop.eup %689  ;;  %v480_v31 = vmul.f32 %v471_v2, %v452_v27 }
 0x22a   : > { %v453_v32 = vmul.f32 %v690_v30, %v421_v54  ;;  %v507_v33 = vadd.f32 %v494_v5, %v479_v28  ;;  %514 = vst.msk [vmem:[%s197_s24] sm:$0xff] %vm400_vm0, %v510_v29 }
 0x22b   : > { %v508_v34 = vadd.f32 %v499_v6, %v480_v31 }
 0x22c   : > { %v481_v35 = vmul.f32 %v476_v3, %v453_v32  ;;  %v511_v36 = vmax.f32 %v507_v33, 0.0 }
 0x22d   : > { %v512_v38 = vmax.f32 %v508_v34, 0.0 }
 0x22e   : > { %515 = vst.msk [vmem:[%s197_s24 + $0x8] sm:$0xff] %vm400_vm0, %v511_v36  ;;  %v509_v39 = vadd.f32 %v504_v37, %v481_v35 }
 0x22f   : > { %516 = vst.msk [vmem:[%s197_s24 + $0x10] sm:$0xff] %vm400_vm0, %v512_v38 }
 0x230   : > { %v513_v40 = vmax.f32 %v509_v39, 0.0 }
 0x232   : > { %517 = vst.msk [vmem:[%s197_s24 + $0x18] sm:$0xff] %vm400_vm0, %v513_v40 }
 0x233 PF: > { %s14_s15 = sadd.s32 1, %s697_s15  }
 0x234   : > { %p11_p4 = scmp.ge.s32.totalorder %s14_s15, 4  }
 0x236   :  { %13 = sbr.rel (!%p11_p4) target bundleno = 1 (0x1), region = 66 }

// kernel: landmarks_detect_forward.13
= control target key start
LH: loop header
LB: loop body
LE: loop exit
PB: predicated region body
PF: predicated region fallthrough
CT: control target
= control target key end

     0   :  { %s816_s15 = smov 0   ;;  %s913_s0 = inlined_call_operand.vmem [shape: bf16[2,288,64], index: 0, kind: input, shape index: {}]   ;;  %s914_s1 = inlined_call_operand.vmem [shape: bf16[32,288], index: 1, kind: input, shape index: {}]   ;;  %s915_s2 = inlined_call_operand.vmem [shape: f32[32,1], index: 2, kind: input, shape index: {}]   ;;  %s916_s3 = inlined_call_operand.vmem [shape: f32[32,1], index: 3, kind: input, shape index: {}]   ;;  %s917_s4 = inlined_call_operand.vmem [shape: f32[2,32,64], index: 4, kind: output, shape index: {}]  }
   0x1 LB: > { %s659_s16 = sadd.s32 4294967295, %s788_s15   ;;  %p663_p0 = scmp.ge.s32.totalorder %s788_s15, 1  ;;  %s788_s15 = sphi %s816_s15, %s14_s15  }
   0x2   : > { %p162_p1 = scmp.lt.s32.totalorder %s788_s15, 3 }
   0x4   : > { %p163_p2 = pnand %p663_p0, %p162_p1 }
   0x5   : > { %p188_p3 = scmp.lt.s32.totalorder (!%p163_p2), %s659_s16, 1 }
   0x6   : > { %166 = sbr.rel (%p163_p2) target bundleno = 635 (0x27b), region = 36 }
   0xb   : > { %vm381_vm0 = vcmask 261120   ;;  %v764_v0 = vld [vmem:[%s914_s1 + $0x8] ss:$12 sps:$4 sm:$0xff]   ;;  %s919_s16 = smov (!%p188_p3, %s659_s16), 1  ;;  %v770_v1 = vld [vmem:[%s914_s1 + $0x4] ss:$12 sps:$4 sm:$0xff]  }
   0xc   : > { %732 = vmatprep.mubr.msk.bf16.mxu1 %vm381_vm0, %v764_v0  ;;  %s736_s21 = smul.u32 144, %s919_s16  ;;  %420 = vmatprep.mubr.bf16.mxu0 %v770_v1  ;;  %v766_v15 = vld [vmem:[%s914_s1 + $0x20] ss:$12 sps:$4 sm:$0xff]   ;;  %v771_v22 = vld [vmem:[%s914_s1 + $0x1c] ss:$12 sps:$4 sm:$0xff]   ;;  %vm486_vm1 = vcmask 523264  }
   0xd   : > { %v768_v21 = vld [vmem:[%s914_s1] ss:$12 sps:$4 sm:$0xff]   ;;  %v773_v23 = vld [vmem:[%s914_s1 + $0x18] ss:$12 sps:$4 sm:$0xff]   ;;  %v790_v48 = vmov 0   ;;  %v542_v1 = vld [vmem:[%s915_s2 + $0x10] sm:$0xff] }
   0xe   : > { %s837_s24 = scalar_lea.vmem %s913_s0, %s736_s21  ;;  %747 = vset.pattern.permute.xlu1 %v790_v48  ;;  %746 = vset.pattern.permute.xlu0 %v790_v48  ;;  %v541_v0 = vld [vmem:[%s915_s2 + $0x8] sm:$0xff]  ;;  %s695_s25 = sshll.u32 %s919_s16, 5 }
   0xf   : > { %v748_v2 = vld [vmem:[%s837_s24 + $0x78] sm:$0xff]   ;;  %v750_v4 = vld [vmem:[%s837_s24 + $0x70] sm:$0xff]   ;;  %v752_v6 = vld [vmem:[%s837_s24 + $0x68] sm:$0xff]   ;;  %s197_s28 = scalar_lea.vmem %s917_s4, %s695_s25 }
  0x10   : > { %v749_v3 = vld [vmem:[%s837_s24 + $0x38] sm:$0xff]   ;;  %696 = vmatprep.subr.bf16.mxu0 %v748_v2  ;;  %v751_v5 = vld [vmem:[%s837_s24 + $0x30] sm:$0xff]   ;;  %v753_v7 = vld [vmem:[%s837_s24 + $0x28] sm:$0xff]  }
  0x11   : > { %697 = vmatpush3.bf16.msra.mxu0 %v749_v3  ;;  %v754_v8 = vld [vmem:[%s837_s24 + $0x60] sm:$0xff]   ;;  %v759_v10 = vld [vmem:[%s837_s24 + $0x88] sm:$0xff]   ;;  %v756_v11 = vld [vmem:[%s837_s24 + $0x58] sm:$0xff]  }
  0x12   : > { %698 = vmatprep.subr.bf16.mxu0 %v750_v4  ;;  %v755_v9 = vld [vmem:[%s837_s24 + $0x20] sm:$0xff]   ;;  %728 = vmatprep.subr.bf16.mxu1 %v759_v10  ;;  %v757_v13 = vld [vmem:[%s837_s24 + $0x18] sm:$0xff]   ;;  %v758_v14 = vld [vmem:[%s837_s24 + $0x50] sm:$0xff]  }
  0x13   : > { %729 = vmatpush3.bf16.msra.mxu1 %v759_v10  ;;  %v762_v12 = vld [vmem:[%s837_s24 + $0x80] sm:$0xff]   ;;  %v760_v16 = vld [vmem:[%s837_s24 + $0x10] sm:$0xff]   ;;  %v761_v17 = vld [vmem:[%s837_s24 + $0x48] sm:$0xff]  }
  0x14   : > { %730 = vmatprep.subr.bf16.mxu1 %v762_v12  ;;  %v763_v18 = vld [vmem:[%s837_s24 + $0x8] sm:$0xff]   ;;  %v765_v19 = vld [vmem:[%s837_s24 + $0x40] sm:$0xff]   ;;  %v543_v2 = vld [vmem:[%s915_s2 + $0x18] sm:$0xff] }
  0x15   : > { %699 = vmatpush3.bf16.msra.mxu0 %v751_v5  ;;  %v767_v20 = vld [vmem:[%s837_s24] sm:$0xff]   ;;  %v569_v5 = vld [vmem:[%s916_s3 + $0x8] sm:$0xff] }
  0x16   : > { %700 = vmatprep.subr.bf16.mxu0 %v752_v6  ;;  %v540_v3 = vld [vmem:[%s915_s2] sm:$0xff]  ;;  %v570_v6 = vld [vmem:[%s916_s3 + $0x10] sm:$0xff] }
  0x17   : > { %731 = vmatpush3.bf16.msra.mxu1 %v762_v12  ;;  %v568_v4 = vld [vmem:[%s916_s3] sm:$0xff]  ;;  %v571_v12 = vld [vmem:[%s916_s3 + $0x18] sm:$0xff] }
  0x19   : > { %701 = vmatpush3.bf16.msra.mxu0 %v753_v7 }
  0x1a   : > { %702 = vmatprep.subr.bf16.mxu0 %v754_v8  ;;  %733 = vmatmul.mubr.msk.bf16.vlgmr.msra.gmra.mxu1 %vm381_vm0, %v766_v15 }
  0x1d   : > { %703 = vmatpush3.bf16.msra.mxu0 %v755_v9 }
  0x1e   : > { %704 = vmatprep.subr.bf16.mxu0 %v756_v11 }
  0x21   : > { %705 = vmatpush3.bf16.msra.mxu0 %v757_v13 }
  0x22   : > { %706 = vmatprep.subr.bf16.mxu0 %v758_v14 }
  0x25   : > { %707 = vmatpush3.bf16.msra.mxu0 %v760_v16 }
  0x26   : > { %708 = vmatprep.subr.bf16.mxu0 %v761_v17 }
  0x29   : > { %709 = vmatpush3.bf16.msra.mxu0 %v763_v18 }
  0x2a   : > { %710 = vmatprep.subr.bf16.mxu0 %v765_v19 }
  0x2d   : > { %711 = vmatpush3.bf16.msra.mxu0 %v767_v20 }
  0x30   : > { %421 = vmatmul.mubr.bf16.vlgmr.msra.gmra.mxu0 %v768_v21 }
  0x31   : > { %428 = vmatprep.mubr.bf16.mxu0 %v771_v22 }
  0x38   : > { %429 = vmatmul.mubr.bf16.gmra.mxu0 %v773_v23 }
  0xda   : > { %v734_v24 = vpop.f32.mrf.mxu1 }
  0xdc   : > { %v471_v25 = vpop.f32.mrf.mxu1 }
  0xde   : > { %v735_v29 = vpop.f32.mrf.mxu1 }
  0xe0   : > { %v474_v35 = vpop.f32.mrf.mxu1 }
  0xf0   : > { %v712_v26 = vpop.f32.mrf.mxu0 }
  0xf2   : > { %v713_v27 = vpop.f32.mrf.mxu0 }
  0xf3   : > { %v714_v28 = vadd.f32 %v713_v27, %v712_v26 }
  0xf4   : > { %v715_v30 = vpop.f32.mrf.mxu0 }
  0xf5   : > { %v472_v31 = vadd.f32 %v714_v28, %v471_v25 }
  0xf6   : > { %v716_v32 = vpop.f32.mrf.mxu0 }
  0xf7   : > { %v717_v33 = vadd.f32 %v716_v32, %v715_v30  ;;  %v487_v34 = vsel %vm486_vm1, %v472_v31, 0.0 }
  0xf8   : > { %v718_v36 = vpop.f32.mrf.mxu0  ;;  %488 = vadd.xlane.f32.xlu0 %v487_v34 }
  0xf9   : > { %v475_v37 = vadd.f32 %v717_v33, %v474_v35 }
  0xfa   : > { %v719_v38 = vpop.f32.mrf.mxu0 }
  0xfb   : > { %v720_v39 = vadd.f32 %v719_v38, %v718_v36  ;;  %v490_v40 = vsel %vm486_vm1, %v475_v37, 0.0 }
  0xfc   : > { %v721_v41 = vpop.f32.mrf.mxu0  ;;  %491 = vadd.xlane.f32.xlu0 %v490_v40 }
  0xfd   : > { %v480_v42 = vadd.f32 %v734_v24, %v720_v39 }
  0xfe   : > { %v722_v43 = vpop.f32.mrf.mxu0 }
  0xff   : > { %v723_v44 = vadd.f32 %v722_v43, %v721_v41  ;;  %v493_v45 = vsel %vm486_vm1, %v480_v42, 0.0 }
 0x100   : > { %494 = vadd.xlane.f32.xlu1 %v493_v45 }
 0x101   : > { %v483_v46 = vadd.f32 %v735_v29, %v723_v44 }
 0x103   : > { %v496_v47 = vsel %vm486_vm1, %v483_v46, 0.0 }
 0x104   : > { %497 = vadd.xlane.f32.xlu1 %v496_v47 }
 0x181   : > { %v489_v49 = vpop.xlane.xlu0 %488 }
 0x182   : > { %v500_v50 = vmul.f32 0.015625, %v489_v49 }
 0x184   : > { %v504_v51 = vsub.f32 %v472_v31, %v500_v50 }
 0x185   : > { %v492_v52 = vpop.xlane.xlu0 %491 }
 0x186   : > { %v501_v53 = vmul.f32 0.015625, %v492_v52  ;;  %v508_v54 = vmul.f32 %v504_v51, %v504_v51 }
 0x188   : > { %v505_v55 = vsub.f32 %v475_v37, %v501_v53  ;;  %v512_v56 = vsel %vm486_vm1, %v508_v54, 0.0 }
 0x189   : > { %v495_v57 = vpop.xlane.xlu1 %494  ;;  %513 = vadd.xlane.f32.xlu0 %v512_v56 }
 0x18a   : > { %v502_v58 = vmul.f32 0.015625, %v495_v57  ;;  %v509_v59 = vmul.f32 %v505_v55, %v505_v55 }
 0x18c   : > { %v506_v60 = vsub.f32 %v480_v42, %v502_v58  ;;  %v515_v61 = vsel %vm486_vm1, %v509_v59, 0.0 }
 0x18d   : > { %516 = vadd.xlane.f32.xlu1 %v515_v61  ;;  %v498_v7 = vpop.xlane.xlu1 %497 }
 0x18e   : > { %v510_v62 = vmul.f32 %v506_v60, %v506_v60  ;;  %v503_v8 = vmul.f32 0.015625, %v498_v7 }
 0x190   : > { %v518_v63 = vsel %vm486_vm1, %v510_v62, 0.0  ;;  %v507_v9 = vsub.f32 %v483_v46, %v503_v8 }
 0x191   : > { %519 = vadd.xlane.f32.xlu0 %v518_v63 }
 0x192   : > { %v511_v10 = vmul.f32 %v507_v9, %v507_v9 }
 0x194   : > { %v521_v11 = vsel %vm486_vm1, %v511_v10, 0.0 }
 0x19e   : > { %551 = vperm.xlu1 %747, %v541_v0  }
 0x1a2   : > { %556 = vperm.xlu1 %747, %v542_v1  }
 0x1a6   : > { %561 = vperm.xlu1 %747, %v543_v2  }
 0x1a7   : > { %546 = vperm.xlu0 %746, %v540_v3  }
 0x1aa   : > { %574 = vperm.xlu1 %747, %v568_v4  }
 0x1ae   : > { %579 = vperm.xlu1 %747, %v569_v5  }
 0x1b2   : > { %584 = vperm.xlu1 %747, %v570_v6  }
 0x1d6   : > { %522 = vadd.xlane.f32.xlu1 %v521_v11 }
 0x1e7   : > { %589 = vperm.xlu1 %747, %v571_v12  }
 0x212   : > { %v514_v13 = vpop.xlane.xlu0 %513 }
 0x213   : > { %v524_v14 = vmul.f32 0.015625, %v514_v13 }
 0x215   : > { %v528_v15 = vadd.f32 1e-05, %v524_v14 }
 0x216   : > { %v517_v16 = vpop.xlane.xlu1 %516 }
 0x217   : > { %774 = vrsqrt.f32 %v528_v15  ;;  %v525_v17 = vmul.f32 0.015625, %v517_v16 }
 0x219   : > { %v529_v18 = vadd.f32 1e-05, %v525_v17 }
 0x21a   : > { %v552_v19 = vpop.permute.xlu1 %551  ;;  %v520_v20 = vpop.xlane.xlu0 %519 }
 0x21b   : > { %776 = vrsqrt.f32 %v529_v18  ;;  %v526_v21 = vmul.f32 0.015625, %v520_v20 }
 0x21d   : > { %v530_v22 = vadd.f32 1e-05, %v526_v21 }
 0x21e   : > { %v557_v23 = vpop.permute.xlu1 %556 }
 0x21f   : > { %778 = vrsqrt.f32 %v530_v22 }
 0x222   : > { %v562_v24 = vpop.permute.xlu1 %561  ;;  %v547_v26 = vpop.permute.xlu0 %546 }
 0x224   : > { %v775_v25 = vpop.eup %774 }
 0x225   : > { %v536_v27 = vmul.f32 %v775_v25, %v504_v51 }
 0x226   : > { %v575_v28 = vpop.permute.xlu1 %574 }
 0x227   : > { %v564_v29 = vmul.f32 %v547_v26, %v536_v27 }
 0x228   : > { %v777_v30 = vpop.eup %776 }
 0x229   : > { %v537_v31 = vmul.f32 %v777_v30, %v505_v55  ;;  %v592_v32 = vadd.f32 %v575_v28, %v564_v29 }
 0x22a   : > { %v580_v33 = vpop.permute.xlu1 %579 }
 0x22b   : > { %v565_v34 = vmul.f32 %v552_v19, %v537_v31  ;;  %v596_v35 = vmax.f32 %v592_v32, 0.0 }
 0x22c   : > { %v779_v36 = vpop.eup %778 }
 0x22d   : > { %v538_v37 = vmul.f32 %v779_v36, %v506_v60  ;;  %600 = vst.msk [vmem:[%s197_s28] sm:$0xff] %vm486_vm1, %v596_v35  ;;  %v593_v38 = vadd.f32 %v580_v33, %v565_v34 }
 0x22e   : > { %v585_v41 = vpop.permute.xlu1 %584 }
 0x22f   : > { %v566_v39 = vmul.f32 %v557_v23, %v538_v37  ;;  %v597_v40 = vmax.f32 %v593_v38, 0.0 }
 0x231   : > { %601 = vst.msk [vmem:[%s197_s28 + $0x8] sm:$0xff] %vm486_vm1, %v597_v40  ;;  %v594_v42 = vadd.f32 %v585_v41, %v566_v39 }
 0x233   : > { %v598_v43 = vmax.f32 %v594_v42, 0.0 }
 0x235   : > { %602 = vst.msk [vmem:[%s197_s28 + $0x10] sm:$0xff] %vm486_vm1, %v598_v43 }
 0x25f   : > { %v523_v44 = vpop.xlane.xlu1 %522 }
 0x260   : > { %v527_v45 = vmul.f32 0.015625, %v523_v44 }
 0x262   : > { %v531_v46 = vadd.f32 1e-05, %v527_v45 }
 0x263   : > { %v590_v50 = vpop.permute.xlu1 %589 }
 0x264   : > { %780 = vrsqrt.f32 %v531_v46 }
 0x271   : > { %v781_v47 = vpop.eup %780 }
 0x272   : > { %v539_v48 = vmul.f32 %v781_v47, %v507_v9 }
 0x274   : > { %v567_v49 = vmul.f32 %v562_v24, %v539_v48 }
 0x276   : > { %v595_v51 = vadd.f32 %v590_v50, %v567_v49 }
 0x278   : > { %v599_v52 = vmax.f32 %v595_v51, 0.0 }
 0x27a   : > { %603 = vst.msk [vmem:[%s197_s28 + $0x18] sm:$0xff] %vm486_vm1, %v599_v52 }
 0x27b PF: > { %s14_s15 = sadd.s32 1, %s788_s15  }
 0x27c   : > { %p11_p4 = scmp.ge.s32.totalorder %s14_s15, 4  }
 0x27e   :  { %13 = sbr.rel (!%p11_p4) target bundleno = 1 (0x1), region = 66 }

// kernel: landmarks_detect_forward.14
= control target key start
LH: loop header
LB: loop body
LE: loop exit
PB: predicated region body
PF: predicated region fallthrough
CT: control target
= control target key end

     0   :  { %s887_s18 = smov 0   ;;  %s993_s0 = inlined_call_operand.vmem [shape: bf16[2,288,64], index: 0, kind: input, shape index: {}]   ;;  %s994_s1 = inlined_call_operand.vmem [shape: bf16[32,288], index: 1, kind: input, shape index: {}]   ;;  %s995_s2 = inlined_call_operand.vmem [shape: f32[32,1], index: 2, kind: input, shape index: {}]   ;;  %s996_s3 = inlined_call_operand.vmem [shape: f32[32,1], index: 3, kind: input, shape index: {}]   ;;  %s997_s4 = inlined_call_operand.vmem [shape: f32[2,32,64], index: 4, kind: input, shape index: {}]   ;;  %s998_s5 = inlined_call_operand.vmem [shape: f32[2,32,64], index: 5, kind: output, shape index: {}]  }
   0x1 LB: > { %s722_s19 = sadd.s32 4294967295, %s854_s18   ;;  %p726_p0 = scmp.ge.s32.totalorder %s854_s18, 1  ;;  %s854_s18 = sphi %s887_s18, %s15_s18  }
   0x2   : > { %p197_p1 = scmp.lt.s32.totalorder %s854_s18, 3 }
   0x4   : > { %p198_p2 = pnand %p726_p0, %p197_p1 }
   0x5   : > { %p230_p3 = scmp.lt.s32.totalorder (!%p198_p2), %s722_s19, 1 }
   0x6   : > { %201 = sbr.rel (%p198_p2) target bundleno = 635 (0x27b), region = 40 }
   0xb   : > { %vm428_vm0 = vcmask 261120   ;;  %v830_v0 = vld [vmem:[%s994_s1 + $0x8] ss:$12 sps:$4 sm:$0xff]   ;;  %s1000_s19 = smov (!%p230_p3, %s722_s19), 1  ;;  %v836_v1 = vld [vmem:[%s994_s1 + $0x4] ss:$12 sps:$4 sm:$0xff]  }
   0xc   : > { %798 = vmatprep.mubr.msk.bf16.mxu1 %vm428_vm0, %v830_v0  ;;  %s802_s24 = smul.u32 144, %s1000_s19  ;;  %467 = vmatprep.mubr.bf16.mxu0 %v836_v1  ;;  %v832_v15 = vld [vmem:[%s994_s1 + $0x20] ss:$12 sps:$4 sm:$0xff]   ;;  %v837_v22 = vld [vmem:[%s994_s1 + $0x1c] ss:$12 sps:$4 sm:$0xff]   ;;  %vm533_vm1 = vcmask 523264  }
   0xd   : > { %v834_v21 = vld [vmem:[%s994_s1] ss:$12 sps:$4 sm:$0xff]   ;;  %v839_v23 = vld [vmem:[%s994_s1 + $0x18] ss:$12 sps:$4 sm:$0xff]   ;;  %v856_v48 = vmov 0   ;;  %v589_v1 = vld [vmem:[%s995_s2 + $0x10] sm:$0xff] }
   0xe   : > { %s908_s27 = scalar_lea.vmem %s993_s0, %s802_s24  ;;  %813 = vset.pattern.permute.xlu1 %v856_v48  ;;  %812 = vset.pattern.permute.xlu0 %v856_v48  ;;  %v588_v0 = vld [vmem:[%s995_s2 + $0x8] sm:$0xff]  ;;  %s760_s29 = sshll.u32 %s1000_s19, 5 }
   0xf   : > { %v814_v2 = vld [vmem:[%s908_s27 + $0x78] sm:$0xff]   ;;  %v816_v4 = vld [vmem:[%s908_s27 + $0x70] sm:$0xff]   ;;  %v818_v6 = vld [vmem:[%s908_s27 + $0x68] sm:$0xff]   ;;  %s977_s7 = scalar_lea.vmem %s997_s4, %s760_s29  ;;  %s244_s19 = scalar_lea.vmem %s998_s5, %s760_s29 }
  0x10   : > { %v815_v3 = vld [vmem:[%s908_s27 + $0x38] sm:$0xff]   ;;  %762 = vmatprep.subr.bf16.mxu0 %v814_v2  ;;  %v817_v5 = vld [vmem:[%s908_s27 + $0x30] sm:$0xff]   ;;  %v819_v7 = vld [vmem:[%s908_s27 + $0x28] sm:$0xff]  }
  0x11   : > { %763 = vmatpush3.bf16.msra.mxu0 %v815_v3  ;;  %v820_v8 = vld [vmem:[%s908_s27 + $0x60] sm:$0xff]   ;;  %v825_v10 = vld [vmem:[%s908_s27 + $0x88] sm:$0xff]   ;;  %v822_v11 = vld [vmem:[%s908_s27 + $0x58] sm:$0xff]  }
  0x12   : > { %764 = vmatprep.subr.bf16.mxu0 %v816_v4  ;;  %v821_v9 = vld [vmem:[%s908_s27 + $0x20] sm:$0xff]   ;;  %794 = vmatprep.subr.bf16.mxu1 %v825_v10  ;;  %v823_v13 = vld [vmem:[%s908_s27 + $0x18] sm:$0xff]   ;;  %v824_v14 = vld [vmem:[%s908_s27 + $0x50] sm:$0xff]  }
  0x13   : > { %795 = vmatpush3.bf16.msra.mxu1 %v825_v10  ;;  %v828_v12 = vld [vmem:[%s908_s27 + $0x80] sm:$0xff]   ;;  %v826_v16 = vld [vmem:[%s908_s27 + $0x10] sm:$0xff]   ;;  %v827_v17 = vld [vmem:[%s908_s27 + $0x48] sm:$0xff]  }
  0x14   : > { %796 = vmatprep.subr.bf16.mxu1 %v828_v12  ;;  %v829_v18 = vld [vmem:[%s908_s27 + $0x8] sm:$0xff]   ;;  %v831_v19 = vld [vmem:[%s908_s27 + $0x40] sm:$0xff]   ;;  %v590_v2 = vld [vmem:[%s995_s2 + $0x18] sm:$0xff] }
  0x15   : > { %765 = vmatpush3.bf16.msra.mxu0 %v817_v5  ;;  %v833_v20 = vld [vmem:[%s908_s27] sm:$0xff]   ;;  %v616_v5 = vld [vmem:[%s996_s3 + $0x8] sm:$0xff] }
  0x16   : > { %766 = vmatprep.subr.bf16.mxu0 %v818_v6  ;;  %v587_v3 = vld [vmem:[%s995_s2] sm:$0xff]  ;;  %v617_v6 = vld [vmem:[%s996_s3 + $0x10] sm:$0xff] }
  0x17   : > { %797 = vmatpush3.bf16.msra.mxu1 %v828_v12  ;;  %v615_v4 = vld [vmem:[%s996_s3] sm:$0xff]  ;;  %v618_v12 = vld [vmem:[%s996_s3 + $0x18] sm:$0xff] }
  0x19   : > { %767 = vmatpush3.bf16.msra.mxu0 %v819_v7 }
  0x1a   : > { %768 = vmatprep.subr.bf16.mxu0 %v820_v8  ;;  %799 = vmatmul.mubr.msk.bf16.vlgmr.msra.gmra.mxu1 %vm428_vm0, %v832_v15 }
  0x1d   : > { %769 = vmatpush3.bf16.msra.mxu0 %v821_v9 }
  0x1e   : > { %770 = vmatprep.subr.bf16.mxu0 %v822_v11 }
  0x21   : > { %771 = vmatpush3.bf16.msra.mxu0 %v823_v13 }
  0x22   : > { %772 = vmatprep.subr.bf16.mxu0 %v824_v14 }
  0x25   : > { %773 = vmatpush3.bf16.msra.mxu0 %v826_v16 }
  0x26   : > { %774 = vmatprep.subr.bf16.mxu0 %v827_v17 }
  0x29   : > { %775 = vmatpush3.bf16.msra.mxu0 %v829_v18 }
  0x2a   : > { %776 = vmatprep.subr.bf16.mxu0 %v831_v19 }
  0x2d   : > { %777 = vmatpush3.bf16.msra.mxu0 %v833_v20 }
  0x30   : > { %468 = vmatmul.mubr.bf16.vlgmr.msra.gmra.mxu0 %v834_v21 }
  0x31   : > { %475 = vmatprep.mubr.bf16.mxu0 %v837_v22 }
  0x38   : > { %476 = vmatmul.mubr.bf16.gmra.mxu0 %v839_v23 }
  0xda   : > { %v800_v24 = vpop.f32.mrf.mxu1 }
  0xdc   : > { %v518_v25 = vpop.f32.mrf.mxu1 }
  0xde   : > { %v801_v29 = vpop.f32.mrf.mxu1 }
  0xe0   : > { %v521_v35 = vpop.f32.mrf.mxu1 }
  0xf0   : > { %v778_v26 = vpop.f32.mrf.mxu0 }
  0xf2   : > { %v779_v27 = vpop.f32.mrf.mxu0 }
  0xf3   : > { %v780_v28 = vadd.f32 %v779_v27, %v778_v26 }
  0xf4   : > { %v781_v30 = vpop.f32.mrf.mxu0 }
  0xf5   : > { %v519_v31 = vadd.f32 %v780_v28, %v518_v25 }
  0xf6   : > { %v782_v32 = vpop.f32.mrf.mxu0 }
  0xf7   : > { %v783_v33 = vadd.f32 %v782_v32, %v781_v30  ;;  %v534_v34 = vsel %vm533_vm1, %v519_v31, 0.0 }
  0xf8   : > { %v784_v36 = vpop.f32.mrf.mxu0  ;;  %535 = vadd.xlane.f32.xlu0 %v534_v34 }
  0xf9   : > { %v522_v37 = vadd.f32 %v783_v33, %v521_v35 }
  0xfa   : > { %v785_v38 = vpop.f32.mrf.mxu0 }
  0xfb   : > { %v786_v39 = vadd.f32 %v785_v38, %v784_v36  ;;  %v537_v40 = vsel %vm533_vm1, %v522_v37, 0.0  ;;  %v644_v38 = vld [vmem:[%s977_s7 + $0x8] sm:$0xff] }
  0xfc   : > { %v787_v41 = vpop.f32.mrf.mxu0  ;;  %538 = vadd.xlane.f32.xlu0 %v537_v40 }
  0xfd   : > { %v527_v42 = vadd.f32 %v800_v24, %v786_v39 }
  0xfe   : > { %v788_v43 = vpop.f32.mrf.mxu0 }
  0xff   : > { %v789_v44 = vadd.f32 %v788_v43, %v787_v41  ;;  %v540_v45 = vsel %vm533_vm1, %v527_v42, 0.0  ;;  %v645_v43 = vld [vmem:[%s977_s7 + $0x10] sm:$0xff] }
 0x100   : > { %541 = vadd.xlane.f32.xlu1 %v540_v45 }
 0x101   : > { %v530_v46 = vadd.f32 %v801_v29, %v789_v44 }
 0x103   : > { %v543_v47 = vsel %vm533_vm1, %v530_v46, 0.0 }
 0x104   : > { %544 = vadd.xlane.f32.xlu1 %v543_v47 }
 0x181   : > { %v536_v49 = vpop.xlane.xlu0 %535 }
 0x182   : > { %v547_v50 = vmul.f32 0.015625, %v536_v49 }
 0x184   : > { %v551_v51 = vsub.f32 %v519_v31, %v547_v50  ;;  %v643_v31 = vld [vmem:[%s977_s7] sm:$0xff] }
 0x185   : > { %v539_v52 = vpop.xlane.xlu0 %538 }
 0x186   : > { %v548_v53 = vmul.f32 0.015625, %v539_v52  ;;  %v555_v54 = vmul.f32 %v551_v51, %v551_v51 }
 0x188   : > { %v552_v55 = vsub.f32 %v522_v37, %v548_v53  ;;  %v559_v56 = vsel %vm533_vm1, %v555_v54, 0.0  ;;  %v646_v53 = vld [vmem:[%s977_s7 + $0x18] sm:$0xff] }
 0x189   : > { %v542_v57 = vpop.xlane.xlu1 %541  ;;  %560 = vadd.xlane.f32.xlu0 %v559_v56 }
 0x18a   : > { %v549_v58 = vmul.f32 0.015625, %v542_v57  ;;  %v556_v59 = vmul.f32 %v552_v55, %v552_v55 }
 0x18c   : > { %v553_v60 = vsub.f32 %v527_v42, %v549_v58  ;;  %v562_v61 = vsel %vm533_vm1, %v556_v59, 0.0 }
 0x18d   : > { %563 = vadd.xlane.f32.xlu1 %v562_v61  ;;  %v545_v7 = vpop.xlane.xlu1 %544 }
 0x18e   : > { %v557_v62 = vmul.f32 %v553_v60, %v553_v60  ;;  %v550_v8 = vmul.f32 0.015625, %v545_v7 }
 0x190   : > { %v565_v63 = vsel %vm533_vm1, %v557_v62, 0.0  ;;  %v554_v9 = vsub.f32 %v530_v46, %v550_v8 }
 0x191   : > { %566 = vadd.xlane.f32.xlu0 %v565_v63 }
 0x192   : > { %v558_v10 = vmul.f32 %v554_v9, %v554_v9 }
 0x194   : > { %v568_v11 = vsel %vm533_vm1, %v558_v10, 0.0 }
 0x19e   : > { %598 = vperm.xlu1 %813, %v588_v0  }
 0x1a2   : > { %603 = vperm.xlu1 %813, %v589_v1  }
 0x1a6   : > { %608 = vperm.xlu1 %813, %v590_v2  }
 0x1a7   : > { %593 = vperm.xlu0 %812, %v587_v3  }
 0x1aa   : > { %621 = vperm.xlu1 %813, %v615_v4  }
 0x1ae   : > { %626 = vperm.xlu1 %813, %v616_v5  }
 0x1b2   : > { %631 = vperm.xlu1 %813, %v617_v6  }
 0x1d6   : > { %569 = vadd.xlane.f32.xlu1 %v568_v11 }
 0x1e7   : > { %636 = vperm.xlu1 %813, %v618_v12  }
 0x212   : > { %v561_v13 = vpop.xlane.xlu0 %560 }
 0x213   : > { %v571_v14 = vmul.f32 0.015625, %v561_v13 }
 0x215   : > { %v575_v15 = vadd.f32 1e-05, %v571_v14 }
 0x216   : > { %v564_v16 = vpop.xlane.xlu1 %563 }
 0x217   : > { %840 = vrsqrt.f32 %v575_v15  ;;  %v572_v17 = vmul.f32 0.015625, %v564_v16 }
 0x219   : > { %v576_v18 = vadd.f32 1e-05, %v572_v17 }
 0x21a   : > { %v599_v19 = vpop.permute.xlu1 %598  ;;  %v567_v20 = vpop.xlane.xlu0 %566 }
 0x21b   : > { %842 = vrsqrt.f32 %v576_v18  ;;  %v573_v21 = vmul.f32 0.015625, %v567_v20 }
 0x21d   : > { %v577_v22 = vadd.f32 1e-05, %v573_v21 }
 0x21e   : > { %v604_v23 = vpop.permute.xlu1 %603 }
 0x21f   : > { %844 = vrsqrt.f32 %v577_v22 }
 0x222   : > { %v609_v24 = vpop.permute.xlu1 %608  ;;  %v594_v26 = vpop.permute.xlu0 %593 }
 0x224   : > { %v841_v25 = vpop.eup %840 }
 0x225   : > { %v583_v27 = vmul.f32 %v841_v25, %v551_v51 }
 0x226   : > { %v622_v28 = vpop.permute.xlu1 %621 }
 0x227   : > { %v611_v29 = vmul.f32 %v594_v26, %v583_v27 }
 0x228   : > { %v843_v30 = vpop.eup %842 }
 0x229   : > { %v584_v32 = vmul.f32 %v843_v30, %v552_v55  ;;  %v639_v33 = vadd.f32 %v622_v28, %v611_v29 }
 0x22a   : > { %v627_v34 = vpop.permute.xlu1 %626 }
 0x22b   : > { %v612_v35 = vmul.f32 %v599_v19, %v584_v32  ;;  %v647_v36 = vadd.f32 %v643_v31, %v639_v33 }
 0x22c   : > { %v845_v37 = vpop.eup %844 }
 0x22d   : > { %v585_v39 = vmul.f32 %v845_v37, %v553_v60  ;;  %651 = vst.msk [vmem:[%s244_s19] sm:$0xff] %vm533_vm1, %v647_v36  ;;  %v640_v40 = vadd.f32 %v627_v34, %v612_v35 }
 0x22e   : > { %v632_v44 = vpop.permute.xlu1 %631 }
 0x22f   : > { %v613_v41 = vmul.f32 %v604_v23, %v585_v39  ;;  %v648_v42 = vadd.f32 %v644_v38, %v640_v40 }
 0x231   : > { %652 = vst.msk [vmem:[%s244_s19 + $0x8] sm:$0xff] %vm533_vm1, %v648_v42  ;;  %v641_v45 = vadd.f32 %v632_v44, %v613_v41 }
 0x233   : > { %v649_v46 = vadd.f32 %v645_v43, %v641_v45 }
 0x235   : > { %653 = vst.msk [vmem:[%s244_s19 + $0x10] sm:$0xff] %vm533_vm1, %v649_v46 }
 0x25f   : > { %v570_v47 = vpop.xlane.xlu1 %569 }
 0x260   : > { %v574_v48 = vmul.f32 0.015625, %v570_v47 }
 0x262   : > { %v578_v49 = vadd.f32 1e-05, %v574_v48 }
 0x263   : > { %v637_v54 = vpop.permute.xlu1 %636 }
 0x264   : > { %846 = vrsqrt.f32 %v578_v49 }
 0x271   : > { %v847_v50 = vpop.eup %846 }
 0x272   : > { %v586_v51 = vmul.f32 %v847_v50, %v554_v9 }
 0x274   : > { %v614_v52 = vmul.f32 %v609_v24, %v586_v51 }
 0x276   : > { %v642_v55 = vadd.f32 %v637_v54, %v614_v52 }
 0x278   : > { %v650_v56 = vadd.f32 %v646_v53, %v642_v55 }
 0x27a   : > { %654 = vst.msk [vmem:[%s244_s19 + $0x18] sm:$0xff] %vm533_vm1, %v650_v56 }
 0x27b PF: > { %s15_s18 = sadd.s32 1, %s854_s18  }
 0x27c   : > { %p12_p4 = scmp.ge.s32.totalorder %s15_s18, 4  }
 0x27e   :  { %14 = sbr.rel (!%p12_p4) target bundleno = 1 (0x1), region = 73 }

// kernel: landmarks_detect_forward.17
= control target key start
LH: loop header
LB: loop body
LE: loop exit
PB: predicated region body
PF: predicated region fallthrough
CT: control target
= control target key end

     0   :  { %s1052_s15 = smov 0   ;;  %s1163_s0 = inlined_call_operand.vmem [shape: bf16[2,512,256], index: 0, kind: input, shape index: {}]   ;;  %s1164_s1 = inlined_call_operand.vmem [shape: bf16[16,512], index: 1, kind: input, shape index: {}]   ;;  %s1165_s2 = inlined_call_operand.vmem [shape: f32[16,1], index: 2, kind: input, shape index: {}]   ;;  %s1166_s3 = inlined_call_operand.vmem [shape: f32[16,1], index: 3, kind: input, shape index: {}]   ;;  %s1167_s4 = inlined_call_operand.vmem [shape: f32[2,16,256], index: 4, kind: output, shape index: {}]  }
   0x1 LB: > { %s820_s16 = sadd.s32 4294967295, %s1024_s15   ;;  %p824_p0 = scmp.ge.s32.totalorder %s1024_s15, 1  ;;  %s1024_s15 = sphi %s1052_s15, %s14_s15  }
   0x2   : > { %p162_p1 = scmp.lt.s32.totalorder %s1024_s15, 3 }
   0x4   : > { %p163_p2 = pnand %p824_p0, %p162_p1 }
   0x5   : > { %p188_p3 = scmp.lt.s32.totalorder (!%p163_p2), %s820_s16, 1 }
   0x6   : > { %166 = sbr.rel (%p163_p2) target bundleno = 594 (0x252), region = 36 }
   0xb   : > { %v1010_v0 = vld [vmem:[%s1164_s1 + $0x4] ss:$16 sps:$4 sm:$0xff]   ;;  %s1169_s16 = smov (!%p188_p3, %s820_s16), 1  ;;  %v1013_v1 = vld [vmem:[%s1164_s1 + $0xc] ss:$16 sps:$4 sm:$0xff]  }
   0xc   : > { %638 = vmatprep.mubr.bf16.mxu0 %v1010_v0  ;;  %s899_s21 = sshll.u32 %s1169_s16, 9  ;;  %681 = vmatprep.mubr.bf16.mxu1 %v1013_v1  ;;  %s900_s11 = sshll.u32 %s1169_s16, 5 }
   0xd   : > { %s1072_s24 = scalar_lea.vmem %s1163_s0, %s899_s21  ;;  %s197_s14 = scalar_lea.vmem %s1167_s4, %s900_s11 }
   0xe   : > { %v912_v2 = vld [vmem:[%s1072_s24 + $0x74] ss:$8 sps:$4 sm:$0xff]   ;;  %v916_v4 = vld [vmem:[%s1072_s24 + $0x70] ss:$8 sps:$4 sm:$0xff]   ;;  %v918_v6 = vld [vmem:[%s1072_s24 + $0x64] ss:$8 sps:$4 sm:$0xff]  }
   0xf   : > { %v914_v3 = vld [vmem:[%s1072_s24 + $0x174] ss:$8 sps:$4 sm:$0xff]   ;;  %606 = vmatprep.subr.bf16.mxu0 %v912_v2  ;;  %v917_v5 = vld [vmem:[%s1072_s24 + $0x170] ss:$8 sps:$4 sm:$0xff]   ;;  %v920_v7 = vld [vmem:[%s1072_s24 + $0x164] ss:$8 sps:$4 sm:$0xff]  }
  0x10   : > { %649 = vmatprep.subr.bf16.mxu1 %v914_v3  ;;  %607 = vmatpush1.bf16.msra.mxu0 %v916_v4  ;;  %v922_v8 = vld [vmem:[%s1072_s24 + $0x60] ss:$8 sps:$4 sm:$0xff]   ;;  %v924_v10 = vld [vmem:[%s1072_s24 + $0x54] ss:$8 sps:$4 sm:$0xff]   ;;  %v928_v12 = vld [vmem:[%s1072_s24 + $0x50] ss:$8 sps:$4 sm:$0xff]  }
  0x11   : > { %650 = vmatpush1.bf16.msra.mxu1 %v917_v5  ;;  %608 = vmatprep.subr.bf16.mxu0 %v918_v6  ;;  %v923_v9 = vld [vmem:[%s1072_s24 + $0x160] ss:$8 sps:$4 sm:$0xff]   ;;  %v926_v11 = vld [vmem:[%s1072_s24 + $0x154] ss:$8 sps:$4 sm:$0xff]   ;;  %v929_v13 = vld [vmem:[%s1072_s24 + $0x150] ss:$8 sps:$4 sm:$0xff]  }
  0x12   : > { %651 = vmatprep.subr.bf16.mxu1 %v920_v7  ;;  %v930_v14 = vld [vmem:[%s1072_s24 + $0x44] ss:$8 sps:$4 sm:$0xff]   ;;  %v934_v16 = vld [vmem:[%s1072_s24 + $0x40] ss:$8 sps:$4 sm:$0xff]   ;;  %v936_v18 = vld [vmem:[%s1072_s24 + $0x34] ss:$8 sps:$4 sm:$0xff]  }
  0x13   : > { %v932_v15 = vld [vmem:[%s1072_s24 + $0x144] ss:$8 sps:$4 sm:$0xff]   ;;  %v935_v17 = vld [vmem:[%s1072_s24 + $0x140] ss:$8 sps:$4 sm:$0xff]   ;;  %v938_v19 = vld [vmem:[%s1072_s24 + $0x134] ss:$8 sps:$4 sm:$0xff]  }
  0x14   : > { %609 = vmatpush1.bf16.msra.mxu0 %v922_v8  ;;  %v940_v20 = vld [vmem:[%s1072_s24 + $0x30] ss:$8 sps:$4 sm:$0xff]   ;;  %v942_v22 = vld [vmem:[%s1072_s24 + $0x24] ss:$8 sps:$4 sm:$0xff]   ;;  %v946_v24 = vld [vmem:[%s1072_s24 + $0x20] ss:$8 sps:$4 sm:$0xff]  }
  0x15   : > { %652 = vmatpush1.bf16.msra.mxu1 %v923_v9  ;;  %610 = vmatprep.subr.bf16.mxu0 %v924_v10  ;;  %v941_v21 = vld [vmem:[%s1072_s24 + $0x130] ss:$8 sps:$4 sm:$0xff]   ;;  %v944_v23 = vld [vmem:[%s1072_s24 + $0x124] ss:$8 sps:$4 sm:$0xff]   ;;  %v947_v25 = vld [vmem:[%s1072_s24 + $0x120] ss:$8 sps:$4 sm:$0xff]  }
  0x16   : > { %653 = vmatprep.subr.bf16.mxu1 %v926_v11  ;;  %v948_v26 = vld [vmem:[%s1072_s24 + $0x14] ss:$8 sps:$4 sm:$0xff]   ;;  %v952_v28 = vld [vmem:[%s1072_s24 + $0x10] ss:$8 sps:$4 sm:$0xff]   ;;  %v954_v30 = vld [vmem:[%s1072_s24 + $0x4] ss:$8 sps:$4 sm:$0xff]  }
  0x17   : > { %v950_v27 = vld [vmem:[%s1072_s24 + $0x114] ss:$8 sps:$4 sm:$0xff]   ;;  %v953_v29 = vld [vmem:[%s1072_s24 + $0x110] ss:$8 sps:$4 sm:$0xff]   ;;  %v956_v31 = vld [vmem:[%s1072_s24 + $0x104] ss:$8 sps:$4 sm:$0xff]  }
  0x18   : > { %611 = vmatpush1.bf16.msra.mxu0 %v928_v12  ;;  %v958_v32 = vld [vmem:[%s1072_s24] ss:$8 sps:$4 sm:$0xff]   ;;  %v960_v34 = vld [vmem:[%s1072_s24 + $0xf4] ss:$8 sps:$4 sm:$0xff]   ;;  %v964_v36 = vld [vmem:[%s1072_s24 + $0xf0] ss:$8 sps:$4 sm:$0xff]  }
  0x19   : > { %654 = vmatpush1.bf16.msra.mxu1 %v929_v13  ;;  %612 = vmatprep.subr.bf16.mxu0 %v930_v14  ;;  %v959_v33 = vld [vmem:[%s1072_s24 + $0x100] ss:$8 sps:$4 sm:$0xff]   ;;  %v962_v35 = vld [vmem:[%s1072_s24 + $0x1f4] ss:$8 sps:$4 sm:$0xff]   ;;  %v965_v37 = vld [vmem:[%s1072_s24 + $0x1f0] ss:$8 sps:$4 sm:$0xff]  }
  0x1a   : > { %655 = vmatprep.subr.bf16.mxu1 %v932_v15  ;;  %v966_v38 = vld [vmem:[%s1072_s24 + $0xe4] ss:$8 sps:$4 sm:$0xff]   ;;  %v970_v40 = vld [vmem:[%s1072_s24 + $0xe0] ss:$8 sps:$4 sm:$0xff]   ;;  %v972_v42 = vld [vmem:[%s1072_s24 + $0xd4] ss:$8 sps:$4 sm:$0xff]  }
  0x1b   : > { %v968_v39 = vld [vmem:[%s1072_s24 + $0x1e4] ss:$8 sps:$4 sm:$0xff]   ;;  %v971_v41 = vld [vmem:[%s1072_s24 + $0x1e0] ss:$8 sps:$4 sm:$0xff]   ;;  %v974_v43 = vld [vmem:[%s1072_s24 + $0x1d4] ss:$8 sps:$4 sm:$0xff]  }
  0x1c   : > { %613 = vmatpush1.bf16.msra.mxu0 %v934_v16  ;;  %v976_v44 = vld [vmem:[%s1072_s24 + $0xd0] ss:$8 sps:$4 sm:$0xff]   ;;  %v978_v46 = vld [vmem:[%s1072_s24 + $0xc4] ss:$8 sps:$4 sm:$0xff]   ;;  %v982_v48 = vld [vmem:[%s1072_s24 + $0xc0] ss:$8 sps:$4 sm:$0xff]  }
  0x1d   : > { %656 = vmatpush1.bf16.msra.mxu1 %v935_v17  ;;  %614 = vmatprep.subr.bf16.mxu0 %v936_v18  ;;  %v977_v45 = vld [vmem:[%s1072_s24 + $0x1d0] ss:$8 sps:$4 sm:$0xff]   ;;  %v980_v47 = vld [vmem:[%s1072_s24 + $0x1c4] ss:$8 sps:$4 sm:$0xff]   ;;  %v983_v49 = vld [vmem:[%s1072_s24 + $0x1c0] ss:$8 sps:$4 sm:$0xff]  }
  0x1e   : > { %657 = vmatprep.subr.bf16.mxu1 %v938_v19  ;;  %v984_v50 = vld [vmem:[%s1072_s24 + $0xb4] ss:$8 sps:$4 sm:$0xff]   ;;  %v988_v52 = vld [vmem:[%s1072_s24 + $0xb0] ss:$8 sps:$4 sm:$0xff]   ;;  %v990_v54 = vld [vmem:[%s1072_s24 + $0xa4] ss:$8 sps:$4 sm:$0xff]  }
  0x1f   : > { %v986_v51 = vld [vmem:[%s1072_s24 + $0x1b4] ss:$8 sps:$4 sm:$0xff]   ;;  %v989_v53 = vld [vmem:[%s1072_s24 + $0x1b0] ss:$8 sps:$4 sm:$0xff]   ;;  %v992_v55 = vld [vmem:[%s1072_s24 + $0x1a4] ss:$8 sps:$4 sm:$0xff]  }
  0x20   : > { %615 = vmatpush1.bf16.msra.mxu0 %v940_v20  ;;  %v994_v56 = vld [vmem:[%s1072_s24 + $0xa0] ss:$8 sps:$4 sm:$0xff]   ;;  %v996_v58 = vld [vmem:[%s1072_s24 + $0x94] ss:$8 sps:$4 sm:$0xff]   ;;  %v1000_v60 = vld [vmem:[%s1072_s24 + $0x90] ss:$8 sps:$4 sm:$0xff]  }
  0x21   : > { %658 = vmatpush1.bf16.msra.mxu1 %v941_v21  ;;  %616 = vmatprep.subr.bf16.mxu0 %v942_v22  ;;  %v995_v57 = vld [vmem:[%s1072_s24 + $0x1a0] ss:$8 sps:$4 sm:$0xff]   ;;  %v998_v59 = vld [vmem:[%s1072_s24 + $0x194] ss:$8 sps:$4 sm:$0xff]   ;;  %v1001_v61 = vld [vmem:[%s1072_s24 + $0x190] ss:$8 sps:$4 sm:$0xff]  }
  0x22   : > { %659 = vmatprep.subr.bf16.mxu1 %v944_v23  ;;  %v1002_v62 = vld [vmem:[%s1072_s24 + $0x84] ss:$8 sps:$4 sm:$0xff]   ;;  %v1006_v0 = vld [vmem:[%s1072_s24 + $0x80] ss:$8 sps:$4 sm:$0xff]   ;;  %v1026_v5 = vmov 0  }
  0x23   : > { %v1004_v63 = vld [vmem:[%s1072_s24 + $0x184] ss:$8 sps:$4 sm:$0xff]   ;;  %v1007_v1 = vld [vmem:[%s1072_s24 + $0x180] ss:$8 sps:$4 sm:$0xff]   ;;  %911 = vset.pattern.permute.xlu1 %v1026_v5  ;;  %910 = vset.pattern.permute.xlu0 %v1026_v5 }
  0x24   : > { %617 = vmatpush1.bf16.msra.mxu0 %v946_v24  ;;  %v1008_v2 = vld [vmem:[%s1164_s1] ss:$16 sps:$4 sm:$0xff]   ;;  %v1011_v3 = vld [vmem:[%s1164_s1 + $0x8] ss:$16 sps:$4 sm:$0xff]  }
  0x25   : > { %660 = vmatpush1.bf16.msra.mxu1 %v947_v25  ;;  %618 = vmatprep.subr.bf16.mxu0 %v948_v26  ;;  %v726_v4 = vld [vmem:[%s1165_s2 + $0x8] sm:$0xff]  ;;  %v741_v6 = vld [vmem:[%s1166_s3] sm:$0xff] }
  0x26   : > { %661 = vmatprep.subr.bf16.mxu1 %v950_v27  ;;  %734 = vperm.xlu1 %911, %v726_v4   ;;  %v725_v21 = vld [vmem:[%s1165_s2] sm:$0xff] }
  0x28   : > { %619 = vmatpush1.bf16.msra.mxu0 %v952_v28 }
  0x29   : > { %662 = vmatpush1.bf16.msra.mxu1 %v953_v29  ;;  %620 = vmatprep.subr.bf16.mxu0 %v954_v30 }
  0x2a   : > { %663 = vmatprep.subr.bf16.mxu1 %v956_v31  ;;  %745 = vperm.xlu1 %911, %v741_v6  }
  0x2c   : > { %621 = vmatpush1.bf16.msra.mxu0 %v958_v32 }
  0x2d   : > { %664 = vmatpush1.bf16.msra.mxu1 %v959_v33  ;;  %622 = vmatprep.subr.bf16.mxu0 %v960_v34 }
  0x2e   : > { %665 = vmatprep.subr.bf16.mxu1 %v962_v35 }
  0x30   : > { %623 = vmatpush2.bf16.msra.mxu0 %v964_v36  ;;  %v742_v36 = vld [vmem:[%s1166_s3 + $0x8] sm:$0xff] }
  0x31   : > { %666 = vmatpush2.bf16.msra.mxu1 %v965_v37  ;;  %624 = vmatprep.subr.bf16.mxu0 %v966_v38 }
  0x32   : > { %667 = vmatprep.subr.bf16.mxu1 %v968_v39 }
  0x34   : > { %625 = vmatpush2.bf16.msra.mxu0 %v970_v40 }
  0x35   : > { %668 = vmatpush2.bf16.msra.mxu1 %v971_v41  ;;  %626 = vmatprep.subr.bf16.mxu0 %v972_v42 }
  0x36   : > { %669 = vmatprep.subr.bf16.mxu1 %v974_v43 }
  0x38   : > { %627 = vmatpush2.bf16.msra.mxu0 %v976_v44 }
  0x39   : > { %670 = vmatpush2.bf16.msra.mxu1 %v977_v45  ;;  %628 = vmatprep.subr.bf16.mxu0 %v978_v46 }
  0x3a   : > { %671 = vmatprep.subr.bf16.mxu1 %v980_v47 }
  0x3c   : > { %629 = vmatpush2.bf16.msra.mxu0 %v982_v48 }
  0x3d   : > { %672 = vmatpush2.bf16.msra.mxu1 %v983_v49  ;;  %630 = vmatprep.subr.bf16.mxu0 %v984_v50 }
  0x3e   : > { %673 = vmatprep.subr.bf16.mxu1 %v986_v51 }
  0x40   : > { %631 = vmatpush2.bf16.msra.mxu0 %v988_v52 }
  0x41   : > { %674 = vmatpush2.bf16.msra.mxu1 %v989_v53  ;;  %632 = vmatprep.subr.bf16.mxu0 %v990_v54 }
  0x42   : > { %675 = vmatprep.subr.bf16.mxu1 %v992_v55 }
  0x44   : > { %633 = vmatpush2.bf16.msra.mxu0 %v994_v56 }
  0x45   : > { %676 = vmatpush2.bf16.msra.mxu1 %v995_v57  ;;  %634 = vmatprep.subr.bf16.mxu0 %v996_v58 }
  0x46   : > { %677 = vmatprep.subr.bf16.mxu1 %v998_v59 }
  0x48   : > { %635 = vmatpush2.bf16.msra.mxu0 %v1000_v60 }
  0x49   : > { %678 = vmatpush2.bf16.msra.mxu1 %v1001_v61  ;;  %636 = vmatprep.subr.bf16.mxu0 %v1002_v62 }
  0x4a   : > { %679 = vmatprep.subr.bf16.mxu1 %v1004_v63 }
  0x4c   : > { %637 = vmatpush2.bf16.msra.mxu0 %v1006_v0 }
  0x4d   : > { %680 = vmatpush2.bf16.msra.mxu1 %v1007_v1 }
  0x4f   : > { %639 = vmatmul.mubr.bf16.vlgmr.msra.gmra.mxu0 %v1008_v2 }
  0x50   : > { %682 = vmatmul.mubr.bf16.vlgmr.msra.gmra.mxu1 %v1011_v3 }
  0xa1   : > { %v735_v37 = vpop.permute.xlu1 %734 }
  0xa5   : > { %v746_v38 = vpop.permute.xlu1 %745 }
 0x10f   : > { %v640_v7 = vpop.f32.mrf.mxu0 }
 0x110   : > { %v683_v8 = vpop.f32.mrf.mxu1 }
 0x111   : > { %v642_v9 = vpop.f32.mrf.mxu0  ;;  %v684_v11 = vadd.f32 %v683_v8, %v640_v7 }
 0x112   : > { %v685_v10 = vpop.f32.mrf.mxu1 }
 0x113   : > { %v686_v12 = vadd.f32 %v685_v10, %v642_v9  ;;  %v644_v13 = vpop.f32.mrf.mxu0 }
 0x114   : > { %v687_v14 = vpop.f32.mrf.mxu1 }
 0x115   : > { %v692_v15 = vadd.f32 %v686_v12, %v684_v11  ;;  %v646_v16 = vpop.f32.mrf.mxu0  ;;  %v688_v18 = vadd.f32 %v687_v14, %v644_v13 }
 0x116   : > { %v689_v17 = vpop.f32.mrf.mxu1 }
 0x117   : > { %v690_v19 = vadd.f32 %v689_v17, %v646_v16  ;;  %693 = vadd.xlane.f32.xlu0 %v692_v15 }
 0x119   : > { %v695_v20 = vadd.f32 %v690_v19, %v688_v18 }
 0x11b   : > { %696 = vadd.xlane.f32.xlu0 %v695_v20 }
 0x131   : > { %729 = vperm.xlu0 %910, %v725_v21  }
 0x1a0   : > { %v694_v22 = vpop.xlane.xlu0 %693 }
 0x1a1   : > { %v699_v23 = vmul.f32 0.00390625, %v694_v22 }
 0x1a3   : > { %v701_v24 = vsub.f32 %v684_v11, %v699_v23  ;;  %v702_v25 = vsub.f32 %v686_v12, %v699_v23 }
 0x1a4   : > { %v697_v26 = vpop.xlane.xlu0 %696 }
 0x1a5   : > { %v700_v27 = vmul.f32 0.00390625, %v697_v26  ;;  %v705_v28 = vmul.f32 %v701_v24, %v701_v24  ;;  %v706_v29 = vmul.f32 %v702_v25, %v702_v25 }
 0x1a7   : > { %v703_v30 = vsub.f32 %v688_v18, %v700_v27  ;;  %v704_v31 = vsub.f32 %v690_v19, %v700_v27  ;;  %v709_v32 = vadd.f32 %v706_v29, %v705_v28 }
 0x1a9   : > { %710 = vadd.xlane.f32.xlu1 %v709_v32  ;;  %v707_v33 = vmul.f32 %v703_v30, %v703_v30  ;;  %v708_v34 = vmul.f32 %v704_v31, %v704_v31 }
 0x1ab   : > { %v712_v35 = vadd.f32 %v708_v34, %v707_v33 }
 0x1ac   : > { %v730_v46 = vpop.permute.xlu0 %729 }
 0x1ad   : > { %713 = vadd.xlane.f32.xlu1 %v712_v35 }
 0x1be   : > { %750 = vperm.xlu1 %911, %v742_v36  }
 0x232   : > { %v711_v39 = vpop.xlane.xlu1 %710 }
 0x233   : > { %v715_v40 = vmul.f32 0.00390625, %v711_v39 }
 0x235   : > { %v717_v41 = vadd.f32 1e-05, %v715_v40 }
 0x236   : > { %v714_v42 = vpop.xlane.xlu1 %713 }
 0x237   : > { %1014 = vrsqrt.f32 %v717_v41  ;;  %v716_v43 = vmul.f32 0.00390625, %v714_v42 }
 0x239   : > { %v718_v44 = vadd.f32 1e-05, %v716_v43 }
 0x23a   : > { %v751_v60 = vpop.permute.xlu1 %750 }
 0x23b   : > { %1016 = vrsqrt.f32 %v718_v44 }
 0x244   : > { %v1015_v45 = vpop.eup %1014 }
 0x245   : > { %v721_v47 = vmul.f32 %v1015_v45, %v701_v24  ;;  %v722_v48 = vmul.f32 %v1015_v45, %v702_v25 }
 0x247   : > { %v737_v49 = vmul.f32 %v730_v46, %v721_v47  ;;  %v738_v50 = vmul.f32 %v730_v46, %v722_v48 }
 0x248   : > { %v1017_v51 = vpop.eup %1016 }
 0x249   : > { %v723_v52 = vmul.f32 %v1017_v51, %v703_v30  ;;  %v724_v53 = vmul.f32 %v1017_v51, %v704_v31  ;;  %v753_v54 = vadd.f32 %v746_v38, %v737_v49  ;;  %v754_v55 = vadd.f32 %v746_v38, %v738_v50 }
 0x24b   : > { %v739_v56 = vmul.f32 %v735_v37, %v723_v52  ;;  %v740_v57 = vmul.f32 %v735_v37, %v724_v53  ;;  %v757_v58 = vmax.f32 %v753_v54, 0.0  ;;  %v758_v59 = vmax.f32 %v754_v55, 0.0 }
 0x24d   : > { %v755_v61 = vadd.f32 %v751_v60, %v739_v56  ;;  %v756_v62 = vadd.f32 %v751_v60, %v740_v57  ;;  %761 = vst [vmem:[%s197_s14] sm:$0xff] %v757_v58  ;;  %762 = vst [vmem:[%s197_s14 + $0x8] sm:$0xff] %v758_v59 }
 0x24f   : > { %v759_v63 = vmax.f32 %v755_v61, 0.0  ;;  %v760_v0 = vmax.f32 %v756_v62, 0.0 }
 0x251   : > { %763 = vst [vmem:[%s197_s14 + $0x10] sm:$0xff] %v759_v63  ;;  %764 = vst [vmem:[%s197_s14 + $0x18] sm:$0xff] %v760_v0 }
 0x252 PF: > { %s14_s15 = sadd.s32 1, %s1024_s15  }
 0x253   : > { %p11_p4 = scmp.ge.s32.totalorder %s14_s15, 4  }
 0x255   :  { %13 = sbr.rel (!%p11_p4) target bundleno = 1 (0x1), region = 66 }

// kernel: landmarks_detect_forward.18
= control target key start
LH: loop header
LB: loop body
LE: loop exit
PB: predicated region body
PF: predicated region fallthrough
CT: control target
= control target key end

     0   :  { %s1476_s15 = smov 0   ;;  %s1654_s0 = inlined_call_operand.vmem [shape: bf16[2,256,1024], index: 0, kind: input, shape index: {}]   ;;  %s1655_s1 = inlined_call_operand.vmem [shape: bf16[8,256], index: 1, kind: input, shape index: {}]   ;;  %s1656_s2 = inlined_call_operand.vmem [shape: f32[8,1], index: 2, kind: input, shape index: {}]   ;;  %s1657_s3 = inlined_call_operand.vmem [shape: f32[8,1], index: 3, kind: input, shape index: {}]   ;;  %s1658_s4 = inlined_call_operand.vmem [shape: f32[2,8,1024], index: 4, kind: output, shape index: {}]  }
   0x1 LB: > { %s1284_s16 = sadd.s32 4294967295, %s1448_s15   ;;  %p1288_p0 = scmp.ge.s32.totalorder %s1448_s15, 1  ;;  %s1448_s15 = sphi %s1476_s15, %s14_s15  }
   0x2   : > { %p162_p1 = scmp.lt.s32.totalorder %s1448_s15, 3 }
   0x4   : > { %p163_p2 = pnand %p1288_p0, %p162_p1 }
   0x5   : > { %p188_p3 = scmp.lt.s32.totalorder (!%p163_p2), %s1284_s16, 1 }
   0x6   : > { %166 = sbr.rel (%p163_p2) target bundleno = 673 (0x2a1), region = 36 }
   0xb   : > { %v1487_v0 = vld [vmem:[%s1655_s1] sm:$0xff]  ;;  %s1660_s16 = smov (!%p188_p3, %s1284_s16), 1 }
   0xc   : > { %v1491_v1 = vcombine.high %v1487_v0, %v1487_v0  ;;  %s1425_s19 = sshll.u32 %s1660_s16, 10  ;;  %s1426_s27 = sshll.u32 %s1660_s16, 6 }
   0xd   : > { %s1501_s22 = scalar_lea.vmem %s1654_s0, %s1425_s19  ;;  %s197_s30 = scalar_lea.vmem %s1658_s4, %s1426_s27 }
   0xe   : > { %1006 = vmatprep.mubr.bf16.mxu0 %v1491_v1  ;;  %1047 = vmatprep.mubr.bf16.mxu1 %v1491_v1  ;;  %v255_v2 = vld [vmem:[%s1501_s22 + $0x1c0] sm:$0xff]  ;;  %v256_v4 = vld [vmem:[%s1501_s22 + $0x1c8] sm:$0xff] }
   0xf   : > { %v259_v3 = vld [vmem:[%s1501_s22 + $0x1e0] sm:$0xff]  ;;  %v260_v6 = vld [vmem:[%s1501_s22 + $0x1e8] sm:$0xff] }
  0x10   : > { %v1352_v5 = vcombine.high %v255_v2, %v259_v3  ;;  %v1351_v7 = vcombine.low %v255_v2, %v259_v3  ;;  %v247_v8 = vld [vmem:[%s1501_s22 + $0x180] sm:$0xff]  ;;  %v1354_v10 = vcombine.high %v256_v4, %v260_v6  ;;  %v1353_v11 = vcombine.low %v256_v4, %v260_v6  ;;  %v248_v13 = vld [vmem:[%s1501_s22 + $0x188] sm:$0xff] }
  0x11   : > { %v251_v9 = vld [vmem:[%s1501_s22 + $0x1a0] sm:$0xff]  ;;  %v252_v14 = vld [vmem:[%s1501_s22 + $0x1a8] sm:$0xff] }
  0x12   : > { %v1344_v12 = vcombine.high %v247_v8, %v251_v9  ;;  %v239_v15 = vld [vmem:[%s1501_s22 + $0x140] sm:$0xff]  ;;  %974 = vmatprep.subr.bf16.mxu0 %v1352_v5  ;;  %v1346_v16 = vcombine.high %v248_v13, %v252_v14  ;;  %v240_v18 = vld [vmem:[%s1501_s22 + $0x148] sm:$0xff]  ;;  %1015 = vmatprep.subr.bf16.mxu1 %v1354_v10  ;;  %v1343_v20 = vcombine.low %v247_v8, %v251_v9 }
  0x13   : > { %v243_v17 = vld [vmem:[%s1501_s22 + $0x160] sm:$0xff]  ;;  %v244_v19 = vld [vmem:[%s1501_s22 + $0x168] sm:$0xff]  ;;  %975 = vmatpush1.bf16.msra.mxu0 %v1351_v7  ;;  %1016 = vmatpush1.bf16.msra.mxu1 %v1353_v11  ;;  %v1345_v21 = vcombine.low %v248_v13, %v252_v14 }
  0x14   : > { %976 = vmatprep.subr.bf16.mxu0 %v1344_v12  ;;  %v1336_v22 = vcombine.high %v239_v15, %v243_v17  ;;  %1017 = vmatprep.subr.bf16.mxu1 %v1346_v16  ;;  %v1338_v23 = vcombine.high %v240_v18, %v244_v19  ;;  %v231_v24 = vld [vmem:[%s1501_s22 + $0x100] sm:$0xff]  ;;  %v232_v26 = vld [vmem:[%s1501_s22 + $0x108] sm:$0xff]  ;;  %v1335_v28 = vcombine.low %v239_v15, %v243_v17 }
  0x15   : > { %v235_v25 = vld [vmem:[%s1501_s22 + $0x120] sm:$0xff]  ;;  %v236_v27 = vld [vmem:[%s1501_s22 + $0x128] sm:$0xff]  ;;  %v1337_v29 = vcombine.low %v240_v18, %v244_v19 }
  0x16   : > { %v1328_v30 = vcombine.high %v231_v24, %v235_v25  ;;  %v1330_v31 = vcombine.high %v232_v26, %v236_v27  ;;  %v223_v32 = vld [vmem:[%s1501_s22 + $0xc0] sm:$0xff]  ;;  %v224_v34 = vld [vmem:[%s1501_s22 + $0xc8] sm:$0xff]  ;;  %v1327_v36 = vcombine.low %v231_v24, %v235_v25  ;;  %v1329_v37 = vcombine.low %v232_v26, %v236_v27 }
  0x17   : > { %977 = vmatpush1.bf16.msra.mxu0 %v1343_v20  ;;  %1018 = vmatpush1.bf16.msra.mxu1 %v1345_v21  ;;  %v227_v33 = vld [vmem:[%s1501_s22 + $0xe0] sm:$0xff]  ;;  %v228_v35 = vld [vmem:[%s1501_s22 + $0xe8] sm:$0xff] }
  0x18   : > { %978 = vmatprep.subr.bf16.mxu0 %v1336_v22  ;;  %1019 = vmatprep.subr.bf16.mxu1 %v1338_v23  ;;  %v1320_v38 = vcombine.high %v223_v32, %v227_v33  ;;  %v1322_v39 = vcombine.high %v224_v34, %v228_v35  ;;  %v215_v40 = vld [vmem:[%s1501_s22 + $0x80] sm:$0xff]  ;;  %v216_v42 = vld [vmem:[%s1501_s22 + $0x88] sm:$0xff]  ;;  %v1319_v44 = vcombine.low %v223_v32, %v227_v33 }
  0x19   : > { %v219_v41 = vld [vmem:[%s1501_s22 + $0xa0] sm:$0xff]  ;;  %v220_v43 = vld [vmem:[%s1501_s22 + $0xa8] sm:$0xff]  ;;  %v1321_v45 = vcombine.low %v224_v34, %v228_v35 }
  0x1a   : > { %v1312_v46 = vcombine.high %v215_v40, %v219_v41  ;;  %v1314_v47 = vcombine.high %v216_v42, %v220_v43  ;;  %v207_v48 = vld [vmem:[%s1501_s22 + $0x40] sm:$0xff]  ;;  %v208_v50 = vld [vmem:[%s1501_s22 + $0x48] sm:$0xff]  ;;  %v1311_v52 = vcombine.low %v215_v40, %v219_v41  ;;  %v1313_v53 = vcombine.low %v216_v42, %v220_v43 }
  0x1b   : > { %979 = vmatpush1.bf16.msra.mxu0 %v1335_v28  ;;  %1020 = vmatpush1.bf16.msra.mxu1 %v1337_v29  ;;  %v211_v49 = vld [vmem:[%s1501_s22 + $0x60] sm:$0xff]  ;;  %v212_v51 = vld [vmem:[%s1501_s22 + $0x68] sm:$0xff] }
  0x1c   : > { %980 = vmatprep.subr.bf16.mxu0 %v1328_v30  ;;  %1021 = vmatprep.subr.bf16.mxu1 %v1330_v31  ;;  %v1304_v54 = vcombine.high %v207_v48, %v211_v49  ;;  %v1306_v55 = vcombine.high %v208_v50, %v212_v51  ;;  %v199_v56 = vld [vmem:[%s1501_s22] sm:$0xff]  ;;  %v200_v58 = vld [vmem:[%s1501_s22 + $0x8] sm:$0xff]  ;;  %v1303_v60 = vcombine.low %v207_v48, %v211_v49 }
  0x1d   : > { %v203_v57 = vld [vmem:[%s1501_s22 + $0x20] sm:$0xff]  ;;  %v204_v59 = vld [vmem:[%s1501_s22 + $0x28] sm:$0xff]  ;;  %v1305_v61 = vcombine.low %v208_v50, %v212_v51 }
  0x1e   : > { %v1296_v62 = vcombine.high %v199_v56, %v203_v57  ;;  %v1298_v63 = vcombine.high %v200_v58, %v204_v59  ;;  %v319_v2 = vld [vmem:[%s1501_s22 + $0x3c0] sm:$0xff]  ;;  %v320_v4 = vld [vmem:[%s1501_s22 + $0x3c8] sm:$0xff]  ;;  %v1295_v6 = vcombine.low %v199_v56, %v203_v57  ;;  %v1297_v7 = vcombine.low %v200_v58, %v204_v59 }
  0x1f   : > { %981 = vmatpush1.bf16.msra.mxu0 %v1327_v36  ;;  %1022 = vmatpush1.bf16.msra.mxu1 %v1329_v37  ;;  %v323_v3 = vld [vmem:[%s1501_s22 + $0x3e0] sm:$0xff]  ;;  %v324_v5 = vld [vmem:[%s1501_s22 + $0x3e8] sm:$0xff] }
  0x20   : > { %982 = vmatprep.subr.bf16.mxu0 %v1320_v38  ;;  %1023 = vmatprep.subr.bf16.mxu1 %v1322_v39  ;;  %v1416_v8 = vcombine.high %v319_v2, %v323_v3  ;;  %v1418_v9 = vcombine.high %v320_v4, %v324_v5  ;;  %v311_v10 = vld [vmem:[%s1501_s22 + $0x380] sm:$0xff]  ;;  %v312_v12 = vld [vmem:[%s1501_s22 + $0x388] sm:$0xff]  ;;  %v1415_v14 = vcombine.low %v319_v2, %v323_v3 }
  0x21   : > { %v315_v11 = vld [vmem:[%s1501_s22 + $0x3a0] sm:$0xff]  ;;  %v316_v13 = vld [vmem:[%s1501_s22 + $0x3a8] sm:$0xff]  ;;  %v1417_v15 = vcombine.low %v320_v4, %v324_v5  ;;  %v257_v4 = vld [vmem:[%s1501_s22 + $0x1d0] sm:$0xff] }
  0x22   : > { %v1408_v16 = vcombine.high %v311_v10, %v315_v11  ;;  %v1410_v17 = vcombine.high %v312_v12, %v316_v13  ;;  %v303_v18 = vld [vmem:[%s1501_s22 + $0x340] sm:$0xff]  ;;  %v304_v20 = vld [vmem:[%s1501_s22 + $0x348] sm:$0xff]  ;;  %v1407_v22 = vcombine.low %v311_v10, %v315_v11  ;;  %v1409_v23 = vcombine.low %v312_v12, %v316_v13  ;;  %v261_v5 = vld [vmem:[%s1501_s22 + $0x1f0] sm:$0xff] }
  0x23   : > { %983 = vmatpush1.bf16.msra.mxu0 %v1319_v44  ;;  %1024 = vmatpush1.bf16.msra.mxu1 %v1321_v45  ;;  %v307_v19 = vld [vmem:[%s1501_s22 + $0x360] sm:$0xff]  ;;  %v308_v21 = vld [vmem:[%s1501_s22 + $0x368] sm:$0xff]  ;;  %v1356_v10 = vcombine.high %v257_v4, %v261_v5  ;;  %v249_v12 = vld [vmem:[%s1501_s22 + $0x190] sm:$0xff] }
  0x24   : > { %984 = vmatprep.subr.bf16.mxu0 %v1312_v46  ;;  %1025 = vmatprep.subr.bf16.mxu1 %v1314_v47  ;;  %v1400_v24 = vcombine.high %v303_v18, %v307_v19  ;;  %v1402_v25 = vcombine.high %v304_v20, %v308_v21  ;;  %v295_v26 = vld [vmem:[%s1501_s22 + $0x300] sm:$0xff]  ;;  %v296_v28 = vld [vmem:[%s1501_s22 + $0x308] sm:$0xff]  ;;  %v1399_v30 = vcombine.low %v303_v18, %v307_v19  ;;  %v253_v13 = vld [vmem:[%s1501_s22 + $0x1b0] sm:$0xff] }
  0x25   : > { %v299_v27 = vld [vmem:[%s1501_s22 + $0x320] sm:$0xff]  ;;  %v300_v29 = vld [vmem:[%s1501_s22 + $0x328] sm:$0xff]  ;;  %v1401_v31 = vcombine.low %v304_v20, %v308_v21  ;;  %v1348_v19 = vcombine.high %v249_v12, %v253_v13  ;;  %v241_v21 = vld [vmem:[%s1501_s22 + $0x150] sm:$0xff] }
  0x26   : > { %v1392_v32 = vcombine.high %v295_v26, %v299_v27  ;;  %v1394_v33 = vcombine.high %v296_v28, %v300_v29  ;;  %v287_v34 = vld [vmem:[%s1501_s22 + $0x2c0] sm:$0xff]  ;;  %v288_v36 = vld [vmem:[%s1501_s22 + $0x2c8] sm:$0xff]  ;;  %v1391_v38 = vcombine.low %v295_v26, %v299_v27  ;;  %v1393_v39 = vcombine.low %v296_v28, %v300_v29  ;;  %v233_v28 = vld [vmem:[%s1501_s22 + $0x110] sm:$0xff] }
  0x27   : > { %985 = vmatpush1.bf16.msra.mxu0 %v1311_v52  ;;  %1026 = vmatpush1.bf16.msra.mxu1 %v1313_v53  ;;  %v291_v35 = vld [vmem:[%s1501_s22 + $0x2e0] sm:$0xff]  ;;  %v292_v37 = vld [vmem:[%s1501_s22 + $0x2e8] sm:$0xff]  ;;  %v237_v29 = vld [vmem:[%s1501_s22 + $0x130] sm:$0xff] }
  0x28   : > { %986 = vmatprep.subr.bf16.mxu0 %v1304_v54  ;;  %1027 = vmatprep.subr.bf16.mxu1 %v1306_v55  ;;  %v1384_v40 = vcombine.high %v287_v34, %v291_v35  ;;  %v1386_v41 = vcombine.high %v288_v36, %v292_v37  ;;  %v279_v42 = vld [vmem:[%s1501_s22 + $0x280] sm:$0xff]  ;;  %v280_v44 = vld [vmem:[%s1501_s22 + $0x288] sm:$0xff]  ;;  %v1383_v46 = vcombine.low %v287_v34, %v291_v35 }
  0x29   : > { %v283_v43 = vld [vmem:[%s1501_s22 + $0x2a0] sm:$0xff]  ;;  %v284_v45 = vld [vmem:[%s1501_s22 + $0x2a8] sm:$0xff]  ;;  %v1385_v47 = vcombine.low %v288_v36, %v292_v37  ;;  %v1332_v34 = vcombine.high %v233_v28, %v237_v29  ;;  %v225_v36 = vld [vmem:[%s1501_s22 + $0xd0] sm:$0xff] }
  0x2a   : > { %v1376_v48 = vcombine.high %v279_v42, %v283_v43  ;;  %v1378_v49 = vcombine.high %v280_v44, %v284_v45  ;;  %v271_v50 = vld [vmem:[%s1501_s22 + $0x240] sm:$0xff]  ;;  %v272_v52 = vld [vmem:[%s1501_s22 + $0x248] sm:$0xff]  ;;  %v1375_v54 = vcombine.low %v279_v42, %v283_v43  ;;  %v1377_v55 = vcombine.low %v280_v44, %v284_v45  ;;  %v229_v37 = vld [vmem:[%s1501_s22 + $0xf0] sm:$0xff] }
  0x2b   : > { %987 = vmatpush1.bf16.msra.mxu0 %v1303_v60  ;;  %1028 = vmatpush1.bf16.msra.mxu1 %v1305_v61  ;;  %v275_v51 = vld [vmem:[%s1501_s22 + $0x260] sm:$0xff]  ;;  %v276_v53 = vld [vmem:[%s1501_s22 + $0x268] sm:$0xff]  ;;  %v217_v43 = vld [vmem:[%s1501_s22 + $0x90] sm:$0xff] }
  0x2c   : > { %988 = vmatprep.subr.bf16.mxu0 %v1296_v62  ;;  %1029 = vmatprep.subr.bf16.mxu1 %v1298_v63  ;;  %v1368_v56 = vcombine.high %v271_v50, %v275_v51  ;;  %v1370_v57 = vcombine.high %v272_v52, %v276_v53  ;;  %v263_v58 = vld [vmem:[%s1501_s22 + $0x200] sm:$0xff]  ;;  %v264_v60 = vld [vmem:[%s1501_s22 + $0x208] sm:$0xff]  ;;  %v1367_v62 = vcombine.low %v271_v50, %v275_v51  ;;  %v221_v44 = vld [vmem:[%s1501_s22 + $0xb0] sm:$0xff] }
  0x2d   : > { %v267_v59 = vld [vmem:[%s1501_s22 + $0x220] sm:$0xff]  ;;  %v268_v61 = vld [vmem:[%s1501_s22 + $0x228] sm:$0xff]  ;;  %v1369_v63 = vcombine.low %v272_v52, %v276_v53  ;;  %v218_v45 = vld [vmem:[%s1501_s22 + $0x98] sm:$0xff] }
  0x2e   : > { %v1360_v2 = vcombine.high %v263_v58, %v267_v59  ;;  %v1362_v3 = vcombine.high %v264_v60, %v268_v61  ;;  %v209_v51 = vld [vmem:[%s1501_s22 + $0x50] sm:$0xff]  ;;  %v210_v53 = vld [vmem:[%s1501_s22 + $0x58] sm:$0xff] }
  0x2f   : > { %989 = vmatpush1.bf16.msra.mxu0 %v1295_v6  ;;  %1030 = vmatpush1.bf16.msra.mxu1 %v1297_v7  ;;  %v258_v6 = vld [vmem:[%s1501_s22 + $0x1d8] sm:$0xff]  ;;  %v213_v52 = vld [vmem:[%s1501_s22 + $0x70] sm:$0xff] }
  0x30   : > { %990 = vmatprep.subr.bf16.mxu0 %v1416_v8  ;;  %1031 = vmatprep.subr.bf16.mxu1 %v1418_v9  ;;  %v262_v7 = vld [vmem:[%s1501_s22 + $0x1f8] sm:$0xff]  ;;  %v1359_v8 = vcombine.low %v263_v58, %v267_v59  ;;  %v1361_v9 = vcombine.low %v264_v60, %v268_v61  ;;  %v201_v59 = vld [vmem:[%s1501_s22 + $0x10] sm:$0xff] }
  0x31   : > { %v1358_v11 = vcombine.high %v258_v6, %v262_v7  ;;  %v1357_v18 = vcombine.low %v258_v6, %v262_v7  ;;  %v205_v60 = vld [vmem:[%s1501_s22 + $0x30] sm:$0xff]  ;;  %v202_v61 = vld [vmem:[%s1501_s22 + $0x18] sm:$0xff] }
  0x32   : > { %v325_v6 = vld [vmem:[%s1501_s22 + $0x3f0] sm:$0xff]  ;;  %v322_v7 = vld [vmem:[%s1501_s22 + $0x3d8] sm:$0xff] }
  0x33   : > { %991 = vmatpush2.bf16.msra.mxu0 %v1415_v14  ;;  %1032 = vmatpush2.bf16.msra.mxu1 %v1417_v15  ;;  %v1575_v14 = vcombine.low %v1487_v0, %v1487_v0  ;;  %v250_v15 = vld [vmem:[%s1501_s22 + $0x198] sm:$0xff] }
  0x34   : > { %992 = vmatprep.subr.bf16.mxu0 %v1408_v16  ;;  %1033 = vmatprep.subr.bf16.mxu1 %v1410_v17  ;;  %v254_v16 = vld [vmem:[%s1501_s22 + $0x1b8] sm:$0xff]  ;;  %v1355_v17 = vcombine.low %v257_v4, %v261_v5  ;;  %v321_v5 = vld [vmem:[%s1501_s22 + $0x3d0] sm:$0xff] }
  0x35   : > { %v1350_v20 = vcombine.high %v250_v15, %v254_v16  ;;  %v242_v0 = vld [vmem:[%s1501_s22 + $0x158] sm:$0xff] }
  0x37   : > { %993 = vmatpush2.bf16.msra.mxu0 %v1407_v22  ;;  %1034 = vmatpush2.bf16.msra.mxu1 %v1409_v23  ;;  %v245_v22 = vld [vmem:[%s1501_s22 + $0x170] sm:$0xff]  ;;  %v246_v23 = vld [vmem:[%s1501_s22 + $0x178] sm:$0xff] }
  0x38   : > { %994 = vmatprep.subr.bf16.mxu0 %v1400_v24  ;;  %1035 = vmatprep.subr.bf16.mxu1 %v1402_v25  ;;  %v1347_v24 = vcombine.low %v249_v12, %v253_v13  ;;  %v1349_v25 = vcombine.low %v250_v15, %v254_v16  ;;  %v1340_v26 = vcombine.high %v241_v21, %v245_v22  ;;  %v313_v13 = vld [vmem:[%s1501_s22 + $0x390] sm:$0xff]  ;;  %v314_v16 = vld [vmem:[%s1501_s22 + $0x398] sm:$0xff] }
  0x39   : > { %v1342_v27 = vcombine.high %v242_v0, %v246_v23  ;;  %v317_v15 = vld [vmem:[%s1501_s22 + $0x3b0] sm:$0xff] }
  0x3b   : > { %995 = vmatpush2.bf16.msra.mxu0 %v1399_v30  ;;  %1036 = vmatpush2.bf16.msra.mxu1 %v1401_v31  ;;  %v234_v30 = vld [vmem:[%s1501_s22 + $0x118] sm:$0xff] }
  0x3c   : > { %996 = vmatprep.subr.bf16.mxu0 %v1392_v32  ;;  %1037 = vmatprep.subr.bf16.mxu1 %v1394_v33  ;;  %v238_v31 = vld [vmem:[%s1501_s22 + $0x138] sm:$0xff]  ;;  %v1339_v32 = vcombine.low %v241_v21, %v245_v22  ;;  %v1341_v33 = vcombine.low %v242_v0, %v246_v23  ;;  %v305_v22 = vld [vmem:[%s1501_s22 + $0x350] sm:$0xff] }
  0x3d   : > { %v1334_v35 = vcombine.high %v234_v30, %v238_v31  ;;  %v309_v0 = vld [vmem:[%s1501_s22 + $0x370] sm:$0xff]  ;;  %v306_v23 = vld [vmem:[%s1501_s22 + $0x358] sm:$0xff] }
  0x3f   : > { %997 = vmatpush2.bf16.msra.mxu0 %v1391_v38  ;;  %1038 = vmatpush2.bf16.msra.mxu1 %v1393_v39  ;;  %v226_v38 = vld [vmem:[%s1501_s22 + $0xd8] sm:$0xff] }
  0x40   : > { %998 = vmatprep.subr.bf16.mxu0 %v1384_v40  ;;  %1039 = vmatprep.subr.bf16.mxu1 %v1386_v41  ;;  %v230_v39 = vld [vmem:[%s1501_s22 + $0xf8] sm:$0xff]  ;;  %v1331_v40 = vcombine.low %v233_v28, %v237_v29  ;;  %v1324_v41 = vcombine.high %v225_v36, %v229_v37  ;;  %v297_v29 = vld [vmem:[%s1501_s22 + $0x310] sm:$0xff] }
  0x41   : > { %v1326_v42 = vcombine.high %v226_v38, %v230_v39 }
  0x43   : > { %999 = vmatpush2.bf16.msra.mxu0 %v1383_v46  ;;  %1040 = vmatpush2.bf16.msra.mxu1 %v1385_v47  ;;  %v222_v46 = vld [vmem:[%s1501_s22 + $0xb8] sm:$0xff]  ;;  %v1323_v47 = vcombine.low %v225_v36, %v229_v37  ;;  %v289_v37 = vld [vmem:[%s1501_s22 + $0x2d0] sm:$0xff] }
  0x44   : > { %1000 = vmatprep.subr.bf16.mxu0 %v1376_v48  ;;  %1041 = vmatprep.subr.bf16.mxu1 %v1378_v49  ;;  %v1325_v48 = vcombine.low %v226_v38, %v230_v39  ;;  %v1316_v49 = vcombine.high %v217_v43, %v221_v44  ;;  %v1318_v50 = vcombine.high %v218_v45, %v222_v46  ;;  %v293_v38 = vld [vmem:[%s1501_s22 + $0x2f0] sm:$0xff]  ;;  %v290_v39 = vld [vmem:[%s1501_s22 + $0x2d8] sm:$0xff] }
  0x47   : > { %1001 = vmatpush2.bf16.msra.mxu0 %v1375_v54  ;;  %1042 = vmatpush2.bf16.msra.mxu1 %v1377_v55  ;;  %v214_v54 = vld [vmem:[%s1501_s22 + $0x78] sm:$0xff]  ;;  %v1315_v55 = vcombine.low %v217_v43, %v221_v44  ;;  %v281_v44 = vld [vmem:[%s1501_s22 + $0x290] sm:$0xff] }
  0x48   : > { %1002 = vmatprep.subr.bf16.mxu0 %v1368_v56  ;;  %1043 = vmatprep.subr.bf16.mxu1 %v1370_v57  ;;  %v1317_v56 = vcombine.low %v218_v45, %v222_v46  ;;  %v1308_v57 = vcombine.high %v209_v51, %v213_v52  ;;  %v1310_v58 = vcombine.high %v210_v53, %v214_v54  ;;  %v285_v45 = vld [vmem:[%s1501_s22 + $0x2b0] sm:$0xff]  ;;  %v282_v46 = vld [vmem:[%s1501_s22 + $0x298] sm:$0xff] }
  0x4b   : > { %1003 = vmatpush2.bf16.msra.mxu0 %v1367_v62  ;;  %1044 = vmatpush2.bf16.msra.mxu1 %v1369_v63  ;;  %v206_v62 = vld [vmem:[%s1501_s22 + $0x38] sm:$0xff]  ;;  %v1307_v63 = vcombine.low %v209_v51, %v213_v52  ;;  %v273_v52 = vld [vmem:[%s1501_s22 + $0x250] sm:$0xff] }
  0x4c   : > { %1004 = vmatprep.subr.bf16.mxu0 %v1360_v2  ;;  %1045 = vmatprep.subr.bf16.mxu1 %v1362_v3  ;;  %v1309_v2 = vcombine.low %v210_v53, %v214_v54  ;;  %v1300_v3 = vcombine.high %v201_v59, %v205_v60  ;;  %v1302_v4 = vcombine.high %v202_v61, %v206_v62  ;;  %v277_v53 = vld [vmem:[%s1501_s22 + $0x270] sm:$0xff]  ;;  %v274_v54 = vld [vmem:[%s1501_s22 + $0x258] sm:$0xff] }
  0x4f   : > { %1005 = vmatpush2.bf16.msra.mxu0 %v1359_v8  ;;  %1046 = vmatpush2.bf16.msra.mxu1 %v1361_v9  ;;  %v326_v8 = vld [vmem:[%s1501_s22 + $0x3f8] sm:$0xff]  ;;  %v1299_v9 = vcombine.low %v201_v59, %v205_v60  ;;  %v265_v60 = vld [vmem:[%s1501_s22 + $0x210] sm:$0xff] }
  0x50   : > { %1056 = vmatprep.subr.bf16.mxu0 %v1356_v10  ;;  %1097 = vmatprep.subr.bf16.mxu1 %v1358_v11  ;;  %v1301_v10 = vcombine.low %v202_v61, %v206_v62  ;;  %v1420_v11 = vcombine.high %v321_v5, %v325_v6  ;;  %v1422_v12 = vcombine.high %v322_v7, %v326_v8  ;;  %v269_v61 = vld [vmem:[%s1501_s22 + $0x230] sm:$0xff]  ;;  %v266_v62 = vld [vmem:[%s1501_s22 + $0x218] sm:$0xff] }
  0x52   : > { %1007 = vmatmul.mubr.bf16.vlgmr.msra.gmra.mxu0 %v1575_v14  ;;  %1048 = vmatmul.mubr.bf16.vlgmr.msra.gmra.mxu1 %v1575_v14 }
  0x53   : > { %1057 = vmatpush1.bf16.msra.mxu0 %v1355_v17  ;;  %1098 = vmatpush1.bf16.msra.mxu1 %v1357_v18  ;;  %v318_v17 = vld [vmem:[%s1501_s22 + $0x3b8] sm:$0xff]  ;;  %v1419_v18 = vcombine.low %v321_v5, %v325_v6  ;;  %v1363_v6 = vcombine.low %v265_v60, %v269_v61 }
  0x54   : > { %1058 = vmatprep.subr.bf16.mxu0 %v1348_v19  ;;  %1099 = vmatprep.subr.bf16.mxu1 %v1350_v20  ;;  %v1421_v19 = vcombine.low %v322_v7, %v326_v8  ;;  %v1412_v20 = vcombine.high %v313_v13, %v317_v15  ;;  %v1414_v21 = vcombine.high %v314_v16, %v318_v17 }
  0x55   : > { %1088 = vmatprep.mubr.bf16.mxu0 %v1491_v1  ;;  %1129 = vmatprep.mubr.bf16.mxu1 %v1491_v1  ;;  %v1333_v1 = vcombine.low %v234_v30, %v238_v31  ;;  %v301_v30 = vld [vmem:[%s1501_s22 + $0x330] sm:$0xff]  ;;  %v298_v31 = vld [vmem:[%s1501_s22 + $0x318] sm:$0xff] }
  0x57   : > { %1059 = vmatpush1.bf16.msra.mxu0 %v1347_v24  ;;  %1100 = vmatpush1.bf16.msra.mxu1 %v1349_v25  ;;  %v310_v24 = vld [vmem:[%s1501_s22 + $0x378] sm:$0xff]  ;;  %v1411_v25 = vcombine.low %v313_v13, %v317_v15 }
  0x58   : > { %1060 = vmatprep.subr.bf16.mxu0 %v1340_v26  ;;  %1101 = vmatprep.subr.bf16.mxu1 %v1342_v27  ;;  %v1413_v26 = vcombine.low %v314_v16, %v318_v17  ;;  %v1404_v27 = vcombine.high %v305_v22, %v309_v0  ;;  %v1406_v28 = vcombine.high %v306_v23, %v310_v24 }
  0x5b   : > { %1061 = vmatpush1.bf16.msra.mxu0 %v1339_v32  ;;  %1102 = vmatpush1.bf16.msra.mxu1 %v1341_v33  ;;  %v302_v32 = vld [vmem:[%s1501_s22 + $0x338] sm:$0xff]  ;;  %v1403_v33 = vcombine.low %v305_v22, %v309_v0 }
  0x5c   : > { %1062 = vmatprep.subr.bf16.mxu0 %v1332_v34  ;;  %1103 = vmatprep.subr.bf16.mxu1 %v1334_v35  ;;  %v1405_v34 = vcombine.low %v306_v23, %v310_v24  ;;  %v1396_v35 = vcombine.high %v297_v29, %v301_v30  ;;  %v1398_v36 = vcombine.high %v298_v31, %v302_v32 }
  0x5f   : > { %1063 = vmatpush1.bf16.msra.mxu0 %v1331_v40  ;;  %1104 = vmatpush1.bf16.msra.mxu1 %v1333_v1  ;;  %v294_v40 = vld [vmem:[%s1501_s22 + $0x2f8] sm:$0xff]  ;;  %v1395_v1 = vcombine.low %v297_v29, %v301_v30  ;;  %v1185_v30 = vld [vmem:[%s1656_s2] sm:$0xff] }
  0x60   : > { %1064 = vmatprep.subr.bf16.mxu0 %v1324_v41  ;;  %1105 = vmatprep.subr.bf16.mxu1 %v1326_v42  ;;  %v1397_v41 = vcombine.low %v298_v31, %v302_v32  ;;  %v1388_v42 = vcombine.high %v289_v37, %v293_v38  ;;  %v1390_v43 = vcombine.high %v290_v39, %v294_v40  ;;  %v1450_v31 = vmov 0   ;;  %v1199_v32 = vld [vmem:[%s1657_s3] sm:$0xff] }
  0x61   : > { %1436 = vset.pattern.permute.xlu1 %v1450_v31  ;;  %1437 = vset.pattern.permute.xlu0 %v1450_v31 }
  0x62   : > { %1188 = vperm.xlu1 %1436, %v1185_v30  }
  0x63   : > { %1065 = vmatpush1.bf16.msra.mxu0 %v1323_v47  ;;  %1106 = vmatpush1.bf16.msra.mxu1 %v1325_v48  ;;  %v286_v47 = vld [vmem:[%s1501_s22 + $0x2b8] sm:$0xff]  ;;  %v1387_v48 = vcombine.low %v289_v37, %v293_v38 }
  0x64   : > { %1066 = vmatprep.subr.bf16.mxu0 %v1316_v49  ;;  %1107 = vmatprep.subr.bf16.mxu1 %v1318_v50  ;;  %v1389_v49 = vcombine.low %v290_v39, %v294_v40  ;;  %v1380_v50 = vcombine.high %v281_v44, %v285_v45  ;;  %v1382_v51 = vcombine.high %v282_v46, %v286_v47 }
  0x66   : > { %1202 = vperm.xlu1 %1436, %v1199_v32  }
  0x67   : > { %1067 = vmatpush1.bf16.msra.mxu0 %v1315_v55  ;;  %1108 = vmatpush1.bf16.msra.mxu1 %v1317_v56  ;;  %v278_v55 = vld [vmem:[%s1501_s22 + $0x278] sm:$0xff]  ;;  %v1379_v56 = vcombine.low %v281_v44, %v285_v45 }
  0x68   : > { %1068 = vmatprep.subr.bf16.mxu0 %v1308_v57  ;;  %1109 = vmatprep.subr.bf16.mxu1 %v1310_v58  ;;  %v1381_v57 = vcombine.low %v282_v46, %v286_v47  ;;  %v1372_v58 = vcombine.high %v273_v52, %v277_v53  ;;  %v1374_v59 = vcombine.high %v274_v54, %v278_v55 }
  0x6b   : > { %1069 = vmatpush1.bf16.msra.mxu0 %v1307_v63  ;;  %1110 = vmatpush1.bf16.msra.mxu1 %v1309_v2  ;;  %v270_v63 = vld [vmem:[%s1501_s22 + $0x238] sm:$0xff]  ;;  %v1371_v2 = vcombine.low %v273_v52, %v277_v53 }
  0x6c   : > { %1070 = vmatprep.subr.bf16.mxu0 %v1300_v3  ;;  %1111 = vmatprep.subr.bf16.mxu1 %v1302_v4  ;;  %v1373_v3 = vcombine.low %v274_v54, %v278_v55  ;;  %v1364_v4 = vcombine.high %v265_v60, %v269_v61  ;;  %v1366_v5 = vcombine.high %v266_v62, %v270_v63 }
  0x6d   : > { %v1365_v7 = vcombine.low %v266_v62, %v270_v63 }
  0x6f   : > { %1071 = vmatpush1.bf16.msra.mxu0 %v1299_v9  ;;  %1112 = vmatpush1.bf16.msra.mxu1 %v1301_v10 }
  0x70   : > { %1072 = vmatprep.subr.bf16.mxu0 %v1420_v11  ;;  %1113 = vmatprep.subr.bf16.mxu1 %v1422_v12 }
  0x73   : > { %1073 = vmatpush2.bf16.msra.mxu0 %v1419_v18  ;;  %1114 = vmatpush2.bf16.msra.mxu1 %v1421_v19 }
  0x74   : > { %1074 = vmatprep.subr.bf16.mxu0 %v1412_v20  ;;  %1115 = vmatprep.subr.bf16.mxu1 %v1414_v21 }
  0x77   : > { %1075 = vmatpush2.bf16.msra.mxu0 %v1411_v25  ;;  %1116 = vmatpush2.bf16.msra.mxu1 %v1413_v26 }
  0x78   : > { %1076 = vmatprep.subr.bf16.mxu0 %v1404_v27  ;;  %1117 = vmatprep.subr.bf16.mxu1 %v1406_v28 }
  0x7b   : > { %1077 = vmatpush2.bf16.msra.mxu0 %v1403_v33  ;;  %1118 = vmatpush2.bf16.msra.mxu1 %v1405_v34 }
  0x7c   : > { %1078 = vmatprep.subr.bf16.mxu0 %v1396_v35  ;;  %1119 = vmatprep.subr.bf16.mxu1 %v1398_v36 }
  0x7f   : > { %1079 = vmatpush2.bf16.msra.mxu0 %v1395_v1  ;;  %1120 = vmatpush2.bf16.msra.mxu1 %v1397_v41 }
  0x80   : > { %1080 = vmatprep.subr.bf16.mxu0 %v1388_v42  ;;  %1121 = vmatprep.subr.bf16.mxu1 %v1390_v43 }
  0x83   : > { %1081 = vmatpush2.bf16.msra.mxu0 %v1387_v48  ;;  %1122 = vmatpush2.bf16.msra.mxu1 %v1389_v49 }
  0x84   : > { %1082 = vmatprep.subr.bf16.mxu0 %v1380_v50  ;;  %1123 = vmatprep.subr.bf16.mxu1 %v1382_v51 }
  0x87   : > { %1083 = vmatpush2.bf16.msra.mxu0 %v1379_v56  ;;  %1124 = vmatpush2.bf16.msra.mxu1 %v1381_v57 }
  0x88   : > { %1084 = vmatprep.subr.bf16.mxu0 %v1372_v58  ;;  %1125 = vmatprep.subr.bf16.mxu1 %v1374_v59 }
  0x8b   : > { %1085 = vmatpush2.bf16.msra.mxu0 %v1371_v2  ;;  %1126 = vmatpush2.bf16.msra.mxu1 %v1373_v3 }
  0x8c   : > { %1086 = vmatprep.subr.bf16.mxu0 %v1364_v4  ;;  %1127 = vmatprep.subr.bf16.mxu1 %v1366_v5 }
  0x8f   : > { %1087 = vmatpush2.bf16.msra.mxu0 %v1363_v6  ;;  %1128 = vmatpush2.bf16.msra.mxu1 %v1365_v7 }
  0x92   : > { %1089 = vmatmul.mubr.bf16.vlgmr.msra.gmra.mxu0 %v1575_v14  ;;  %1130 = vmatmul.mubr.bf16.vlgmr.msra.gmra.mxu1 %v1575_v14 }
  0xdd   : > { %v1189_v60 = vpop.permute.xlu1 %1188 }
 0x112   : > { %v1008_v8 = vpop.f32.mrf.mxu0  ;;  %v1049_v9 = vpop.f32.mrf.mxu1 }
 0x114   : > { %v1010_v10 = vpop.f32.mrf.mxu0  ;;  %v1051_v11 = vpop.f32.mrf.mxu1 }
 0x115   : > { %v1138_v17 = vadd.f32 %v1010_v10, %v1008_v8 }
 0x116   : > { %v1012_v12 = vpop.f32.mrf.mxu0  ;;  %v1053_v13 = vpop.f32.mrf.mxu1 }
 0x117   : > { %v1139_v18 = vadd.f32 %v1138_v17, %v1049_v9  ;;  %v1203_v12 = vpop.permute.xlu1 %1202 }
 0x118   : > { %v1013_v15 = vpop.f32.mrf.mxu0  ;;  %v1054_v16 = vpop.f32.mrf.mxu1 }
 0x119   : > { %v1140_v19 = vadd.f32 %v1139_v18, %v1051_v11 }
 0x152   : > { %v1090_v20 = vpop.f32.mrf.mxu0  ;;  %v1131_v22 = vpop.f32.mrf.mxu1 }
 0x153   : > { %v1141_v21 = vadd.f32 %v1140_v19, %v1090_v20 }
 0x154   : > { %v1092_v0 = vpop.f32.mrf.mxu0  ;;  %v1133_v24 = vpop.f32.mrf.mxu1 }
 0x155   : > { %v1142_v23 = vadd.f32 %v1141_v21, %v1092_v0 }
 0x156   : > { %v1094_v25 = vpop.f32.mrf.mxu0  ;;  %v1135_v26 = vpop.f32.mrf.mxu1 }
 0x157   : > { %v1143_v14 = vadd.f32 %v1142_v23, %v1131_v22 }
 0x158   : > { %v1095_v27 = vpop.f32.mrf.mxu0  ;;  %v1136_v28 = vpop.f32.mrf.mxu1 }
 0x159   : > { %v1144_v29 = vadd.f32 %v1143_v14, %v1133_v24 }
 0x15b   : > { %1145 = vadd.xlane.f32.xlu0 %v1144_v29 }
 0x1e4   : > { %v1146_v33 = vpop.xlane.xlu0 %1145 }
 0x1e5   : > { %v1148_v34 = vmul.f32 0.0009765625, %v1146_v33 }
 0x1e7   : > { %v1149_v35 = vsub.f32 %v1008_v8, %v1148_v34  ;;  %v1150_v36 = vsub.f32 %v1010_v10, %v1148_v34  ;;  %v1151_v37 = vsub.f32 %v1049_v9, %v1148_v34  ;;  %v1152_v38 = vsub.f32 %v1051_v11, %v1148_v34 }
 0x1e8   : > { %v1153_v1 = vsub.f32 %v1090_v20, %v1148_v34  ;;  %v1154_v43 = vsub.f32 %v1092_v0, %v1148_v34  ;;  %v1155_v46 = vsub.f32 %v1131_v22, %v1148_v34  ;;  %v1156_v49 = vsub.f32 %v1133_v24, %v1148_v34 }
 0x1e9   : > { %v1157_v39 = vmul.f32 %v1149_v35, %v1149_v35  ;;  %v1158_v40 = vmul.f32 %v1150_v36, %v1150_v36  ;;  %v1159_v41 = vmul.f32 %v1151_v37, %v1151_v37  ;;  %v1160_v44 = vmul.f32 %v1152_v38, %v1152_v38 }
 0x1ea   : > { %v1161_v47 = vmul.f32 %v1153_v1, %v1153_v1  ;;  %v1162_v50 = vmul.f32 %v1154_v43, %v1154_v43  ;;  %v1163_v52 = vmul.f32 %v1155_v46, %v1155_v46  ;;  %v1164_v54 = vmul.f32 %v1156_v49, %v1156_v49 }
 0x1eb   : > { %v1165_v42 = vadd.f32 %v1158_v40, %v1157_v39 }
 0x1ed   : > { %v1166_v45 = vadd.f32 %v1165_v42, %v1159_v41 }
 0x1ef   : > { %v1167_v48 = vadd.f32 %v1166_v45, %v1160_v44 }
 0x1f1   : > { %v1168_v51 = vadd.f32 %v1167_v48, %v1161_v47 }
 0x1f3   : > { %v1169_v53 = vadd.f32 %v1168_v51, %v1162_v50 }
 0x1f5   : > { %v1170_v55 = vadd.f32 %v1169_v53, %v1163_v52 }
 0x1f7   : > { %v1171_v56 = vadd.f32 %v1170_v55, %v1164_v54 }
 0x1f9   : > { %1172 = vadd.xlane.f32.xlu0 %v1171_v56 }
 0x282   : > { %v1173_v57 = vpop.xlane.xlu0 %1172 }
 0x283   : > { %v1174_v58 = vmul.f32 0.0009765625, %v1173_v57 }
 0x285   : > { %v1175_v59 = vadd.f32 1e-05, %v1174_v58 }
 0x287   : > { %1440 = vrsqrt.f32 %v1175_v59 }
 0x294   : > { %v1441_v61 = vpop.eup %1440 }
 0x295   : > { %v1177_v62 = vmul.f32 %v1441_v61, %v1149_v35  ;;  %v1178_v63 = vmul.f32 %v1441_v61, %v1150_v36  ;;  %v1179_v2 = vmul.f32 %v1441_v61, %v1151_v37  ;;  %v1180_v3 = vmul.f32 %v1441_v61, %v1152_v38 }
 0x296   : > { %v1181_v4 = vmul.f32 %v1441_v61, %v1153_v1  ;;  %v1182_v5 = vmul.f32 %v1441_v61, %v1154_v43  ;;  %v1183_v6 = vmul.f32 %v1441_v61, %v1155_v46  ;;  %v1184_v7 = vmul.f32 %v1441_v61, %v1156_v49 }
 0x297   : > { %v1191_v8 = vmul.f32 %v1189_v60, %v1177_v62  ;;  %v1192_v9 = vmul.f32 %v1189_v60, %v1178_v63  ;;  %v1193_v10 = vmul.f32 %v1189_v60, %v1179_v2  ;;  %v1194_v11 = vmul.f32 %v1189_v60, %v1180_v3 }
 0x298   : > { %v1195_v13 = vmul.f32 %v1189_v60, %v1181_v4  ;;  %v1196_v15 = vmul.f32 %v1189_v60, %v1182_v5  ;;  %v1197_v16 = vmul.f32 %v1189_v60, %v1183_v6  ;;  %v1198_v17 = vmul.f32 %v1189_v60, %v1184_v7 }
 0x299   : > { %v1205_v18 = vadd.f32 %v1203_v12, %v1191_v8  ;;  %v1206_v19 = vadd.f32 %v1203_v12, %v1192_v9  ;;  %v1207_v20 = vadd.f32 %v1203_v12, %v1193_v10  ;;  %v1208_v21 = vadd.f32 %v1203_v12, %v1194_v11 }
 0x29a   : > { %v1209_v22 = vadd.f32 %v1203_v12, %v1195_v13  ;;  %v1210_v0 = vadd.f32 %v1203_v12, %v1196_v15  ;;  %v1211_v23 = vadd.f32 %v1203_v12, %v1197_v16  ;;  %v1212_v24 = vadd.f32 %v1203_v12, %v1198_v17 }
 0x29b   : > { %v1213_v25 = vmax.f32 %v1205_v18, 0.0  ;;  %v1214_v26 = vmax.f32 %v1206_v19, 0.0  ;;  %v1215_v14 = vmax.f32 %v1207_v20, 0.0  ;;  %v1216_v27 = vmax.f32 %v1208_v21, 0.0 }
 0x29c   : > { %v1217_v28 = vmax.f32 %v1209_v22, 0.0  ;;  %v1218_v29 = vmax.f32 %v1210_v0, 0.0  ;;  %v1219_v30 = vmax.f32 %v1211_v23, 0.0  ;;  %v1220_v31 = vmax.f32 %v1212_v24, 0.0 }
 0x29d   : > { %1221 = vst [vmem:[%s197_s30] sm:$0xff] %v1213_v25  ;;  %1222 = vst [vmem:[%s197_s30 + $0x8] sm:$0xff] %v1214_v26 }
 0x29e   : > { %1223 = vst [vmem:[%s197_s30 + $0x10] sm:$0xff] %v1215_v14  ;;  %1224 = vst [vmem:[%s197_s30 + $0x18] sm:$0xff] %v1216_v27 }
 0x29f   : > { %1225 = vst [vmem:[%s197_s30 + $0x20] sm:$0xff] %v1217_v28  ;;  %1226 = vst [vmem:[%s197_s30 + $0x28] sm:$0xff] %v1218_v29 }
 0x2a0   : > { %1227 = vst [vmem:[%s197_s30 + $0x30] sm:$0xff] %v1219_v30  ;;  %1228 = vst [vmem:[%s197_s30 + $0x38] sm:$0xff] %v1220_v31 }
 0x2a1 PF: > { %s14_s15 = sadd.s32 1, %s1448_s15  }
 0x2a2   : > { %p11_p4 = scmp.ge.s32.totalorder %s14_s15, 4  }
 0x2a4   :  { %13 = sbr.rel (!%p11_p4) target bundleno = 1 (0x1), region = 66 }

// kernel: landmarks_detect_forward.19
= control target key start
LH: loop header
LB: loop body
LE: loop exit
PB: predicated region body
PF: predicated region fallthrough
CT: control target
= control target key end

     0   :  { %s2061_s9 = smov 0   ;;  %s2329_s0 = inlined_call_operand.vmem [shape: bf16[2,392,1024], index: 0, kind: input, shape index: {}]   ;;  %s2330_s1 = inlined_call_operand.vmem [shape: bf16[3,392], index: 1, kind: input, shape index: {}]   ;;  %s2331_s2 = inlined_call_operand.vmem [shape: f32[2,3,1024], index: 2, kind: output, shape index: {}]  }
   0x1 LB: > { %s1783_s10 = sadd.s32 4294967295, %s2043_s9   ;;  %p1787_p0 = scmp.ge.s32.totalorder %s2043_s9, 1  ;;  %s2043_s9 = sphi %s2061_s9, %s12_s9  }
   0x2   : > { %p112_p1 = scmp.lt.s32.totalorder %s2043_s9, 3 }
   0x4   : > { %p113_p2 = pnand %p1787_p0, %p112_p1 }
   0x5   : > { %p134_p3 = scmp.lt.s32.totalorder (!%p113_p2), %s1783_s10, 1 }
   0x6   : > { %116 = sbr.rel (%p113_p2) target bundleno = 435 (0x1b3), region = 28 }
   0xb   : > { %v145_v0 = vld [vmem:[%s2330_s1] sm:$0xff]  ;;  %v347_v1 = vlaneseq  ;;  %v2045_v2 = vmov 1983009808   ;;  %s2333_s10 = smov (!%p134_p3, %s1783_s10), 1  ;;  %vm1343_vm0 = vcmask 64512   ;;  %vm1347_vm1 = vcmask 1043456  }
   0xc   : > { %v345_v3 = vunpack.c.l.s4 %v2045_v2  ;;  %v343_v5 = vcombine.high %v145_v0, %v145_v0  ;;  %s2002_s13 = smul.u32 1568, %s2333_s10  ;;  %s2001_s17 = sshll.u32 %s2333_s10, 5 }
   0xd   : > { %v348_v4 = vshrl.u32 %v347_v1, 7  ;;  %s2320_s20 = scalar_lea.vmem %s2331_s2, %s2001_s17 }
   0xe   : > { %v346_v6 = vunpack.c.0.s8 %v345_v3  ;;  %s2078_s16 = scalar_lea.vmem %s2329_s0, %s2002_s13 }
   0xf   : > { %v202_v8 = vld [vmem:[%s2078_s16 + $0x1c0] sm:$0xff] }
  0x10   : > { %v349_v7 = vsub.s32 %v346_v6, %v348_v4  ;;  %v206_v9 = vld [vmem:[%s2078_s16 + $0x1e0] sm:$0xff] }
  0x11   : > { %v330_v10 = vld [vmem:[%s2078_s16 + $0x5c0] sm:$0xff]  ;;  %v1848_v13 = vcombine.high %v202_v8, %v206_v9  ;;  %v1847_v15 = vcombine.low %v202_v8, %v206_v9 }
  0x12   : > { %v2083_v11 = vrot.slane %v343_v5, %v349_v7  ;;  %v2085_v12 = vrot.slane %v145_v0, %v349_v7  ;;  %v334_v14 = vld [vmem:[%s2078_s16 + $0x5e0] sm:$0xff] }
  0x13   : > { %v194_v16 = vld [vmem:[%s2078_s16 + $0x180] sm:$0xff]  ;;  %v1976_v18 = vcombine.high %v330_v10, %v334_v14  ;;  %v1975_v19 = vcombine.low %v330_v10, %v334_v14  ;;  %1372 = vmatprep.subr.bf16.mxu0 %v1848_v13 }
  0x14   : > { %v198_v17 = vld [vmem:[%s2078_s16 + $0x1a0] sm:$0xff]  ;;  %v2098_v28 = vcombine.high %v2083_v11, %v2083_v11  ;;  %v2102_v29 = vcombine.high %v2085_v12, %v2085_v12  ;;  %1373 = vmatpush1.bf16.msra.mxu0 %v1847_v15 }
  0x15   : > { %v1840_v20 = vcombine.high %v194_v16, %v198_v17  ;;  %v322_v21 = vld [vmem:[%s2078_s16 + $0x580] sm:$0xff]  ;;  %1413 = vmatprep.subr.bf16.mxu1 %v1976_v18  ;;  %v1839_v30 = vcombine.low %v194_v16, %v198_v17 }
  0x16   : > { %v326_v22 = vld [vmem:[%s2078_s16 + $0x5a0] sm:$0xff]  ;;  %1414 = vmatpush1.bf16.msra.mxu1 %v1975_v19  ;;  %1992 = vmatprep.mubr.msk.bf16.mxu1 %vm1343_vm0, %v2098_v28 }
  0x17   : > { %v186_v23 = vld [vmem:[%s2078_s16 + $0x140] sm:$0xff]  ;;  %v1968_v24 = vcombine.high %v322_v21, %v326_v22  ;;  %1374 = vmatprep.subr.bf16.mxu0 %v1840_v20  ;;  %v1967_v31 = vcombine.low %v322_v21, %v326_v22  ;;  %1404 = vmatprep.mubr.bf16.mxu0 %v2102_v29  ;;  %v203_v22 = vld [vmem:[%s2078_s16 + $0x1c8] sm:$0xff] }
  0x18   : > { %v190_v25 = vld [vmem:[%s2078_s16 + $0x160] sm:$0xff]  ;;  %1375 = vmatpush1.bf16.msra.mxu0 %v1839_v30 }
  0x19   : > { %v314_v26 = vld [vmem:[%s2078_s16 + $0x540] sm:$0xff]  ;;  %v1832_v32 = vcombine.high %v186_v23, %v190_v25  ;;  %1415 = vmatprep.subr.bf16.mxu1 %v1968_v24  ;;  %v1831_v38 = vcombine.low %v186_v23, %v190_v25  ;;  %v207_v23 = vld [vmem:[%s2078_s16 + $0x1e8] sm:$0xff] }
  0x1a   : > { %v318_v27 = vld [vmem:[%s2078_s16 + $0x560] sm:$0xff]  ;;  %1416 = vmatpush1.bf16.msra.mxu1 %v1967_v31 }
  0x1b   : > { %v1960_v33 = vcombine.high %v314_v26, %v318_v27  ;;  %v178_v34 = vld [vmem:[%s2078_s16 + $0x100] sm:$0xff]  ;;  %1376 = vmatprep.subr.bf16.mxu0 %v1832_v32  ;;  %v1959_v39 = vcombine.low %v314_v26, %v318_v27  ;;  %v1850_v27 = vcombine.high %v203_v22, %v207_v23  ;;  %v195_v32 = vld [vmem:[%s2078_s16 + $0x188] sm:$0xff] }
  0x1c   : > { %v182_v35 = vld [vmem:[%s2078_s16 + $0x120] sm:$0xff]  ;;  %1377 = vmatpush1.bf16.msra.mxu0 %v1831_v38 }
  0x1d   : > { %v306_v36 = vld [vmem:[%s2078_s16 + $0x500] sm:$0xff]  ;;  %v1824_v40 = vcombine.high %v178_v34, %v182_v35  ;;  %1417 = vmatprep.subr.bf16.mxu1 %v1960_v33  ;;  %v1823_v46 = vcombine.low %v178_v34, %v182_v35  ;;  %v199_v33 = vld [vmem:[%s2078_s16 + $0x1a8] sm:$0xff]  ;;  %v1849_v35 = vcombine.low %v203_v22, %v207_v23 }
  0x1e   : > { %v310_v37 = vld [vmem:[%s2078_s16 + $0x520] sm:$0xff]  ;;  %1418 = vmatpush1.bf16.msra.mxu1 %v1959_v39 }
  0x1f   : > { %v1952_v41 = vcombine.high %v306_v36, %v310_v37  ;;  %v170_v42 = vld [vmem:[%s2078_s16 + $0xc0] sm:$0xff]  ;;  %1378 = vmatprep.subr.bf16.mxu0 %v1824_v40  ;;  %v1951_v47 = vcombine.low %v306_v36, %v310_v37  ;;  %v1842_v37 = vcombine.high %v195_v32, %v199_v33  ;;  %v187_v40 = vld [vmem:[%s2078_s16 + $0x148] sm:$0xff] }
  0x20   : > { %v174_v43 = vld [vmem:[%s2078_s16 + $0xe0] sm:$0xff]  ;;  %1379 = vmatpush1.bf16.msra.mxu0 %v1823_v46 }
  0x21   : > { %v298_v44 = vld [vmem:[%s2078_s16 + $0x4c0] sm:$0xff]  ;;  %v1816_v48 = vcombine.high %v170_v42, %v174_v43  ;;  %1419 = vmatprep.subr.bf16.mxu1 %v1952_v41  ;;  %v1815_v54 = vcombine.low %v170_v42, %v174_v43  ;;  %v191_v41 = vld [vmem:[%s2078_s16 + $0x168] sm:$0xff]  ;;  %v1841_v43 = vcombine.low %v195_v32, %v199_v33 }
  0x22   : > { %v302_v45 = vld [vmem:[%s2078_s16 + $0x4e0] sm:$0xff]  ;;  %1420 = vmatpush1.bf16.msra.mxu1 %v1951_v47 }
  0x23   : > { %v1944_v49 = vcombine.high %v298_v44, %v302_v45  ;;  %v162_v50 = vld [vmem:[%s2078_s16 + $0x80] sm:$0xff]  ;;  %1380 = vmatprep.subr.bf16.mxu0 %v1816_v48  ;;  %v1943_v55 = vcombine.low %v298_v44, %v302_v45  ;;  %v1834_v45 = vcombine.high %v187_v40, %v191_v41  ;;  %v179_v48 = vld [vmem:[%s2078_s16 + $0x108] sm:$0xff] }
  0x24   : > { %v166_v51 = vld [vmem:[%s2078_s16 + $0xa0] sm:$0xff]  ;;  %1381 = vmatpush1.bf16.msra.mxu0 %v1815_v54 }
  0x25   : > { %v290_v52 = vld [vmem:[%s2078_s16 + $0x480] sm:$0xff]  ;;  %v1808_v56 = vcombine.high %v162_v50, %v166_v51  ;;  %1421 = vmatprep.subr.bf16.mxu1 %v1944_v49  ;;  %v1807_v62 = vcombine.low %v162_v50, %v166_v51  ;;  %v183_v49 = vld [vmem:[%s2078_s16 + $0x128] sm:$0xff]  ;;  %v1833_v51 = vcombine.low %v187_v40, %v191_v41 }
  0x26   : > { %v294_v53 = vld [vmem:[%s2078_s16 + $0x4a0] sm:$0xff]  ;;  %1422 = vmatpush1.bf16.msra.mxu1 %v1943_v55 }
  0x27   : > { %v1936_v57 = vcombine.high %v290_v52, %v294_v53  ;;  %v154_v58 = vld [vmem:[%s2078_s16 + $0x40] sm:$0xff]  ;;  %1382 = vmatprep.subr.bf16.mxu0 %v1808_v56  ;;  %v1935_v63 = vcombine.low %v290_v52, %v294_v53  ;;  %v1826_v53 = vcombine.high %v179_v48, %v183_v49  ;;  %v171_v56 = vld [vmem:[%s2078_s16 + $0xc8] sm:$0xff] }
  0x28   : > { %v158_v59 = vld [vmem:[%s2078_s16 + $0x60] sm:$0xff]  ;;  %1383 = vmatpush1.bf16.msra.mxu0 %v1807_v62 }
  0x29   : > { %v282_v60 = vld [vmem:[%s2078_s16 + $0x440] sm:$0xff]  ;;  %v1800_v0 = vcombine.high %v154_v58, %v158_v59  ;;  %1423 = vmatprep.subr.bf16.mxu1 %v1936_v57  ;;  %v1799_v6 = vcombine.low %v154_v58, %v158_v59  ;;  %v175_v57 = vld [vmem:[%s2078_s16 + $0xe8] sm:$0xff]  ;;  %v1825_v59 = vcombine.low %v179_v48, %v183_v49 }
  0x2a   : > { %v286_v61 = vld [vmem:[%s2078_s16 + $0x460] sm:$0xff]  ;;  %1424 = vmatpush1.bf16.msra.mxu1 %v1935_v63 }
  0x2b   : > { %v1928_v1 = vcombine.high %v282_v60, %v286_v61  ;;  %v146_v2 = vld [vmem:[%s2078_s16] sm:$0xff]  ;;  %1384 = vmatprep.subr.bf16.mxu0 %v1800_v0  ;;  %v1927_v7 = vcombine.low %v282_v60, %v286_v61  ;;  %v1818_v61 = vcombine.high %v171_v56, %v175_v57  ;;  %v163_v0 = vld [vmem:[%s2078_s16 + $0x88] sm:$0xff] }
  0x2c   : > { %v150_v3 = vld [vmem:[%s2078_s16 + $0x20] sm:$0xff]  ;;  %1385 = vmatpush1.bf16.msra.mxu0 %v1799_v6 }
  0x2d   : > { %v274_v4 = vld [vmem:[%s2078_s16 + $0x400] sm:$0xff]  ;;  %v1792_v8 = vcombine.high %v146_v2, %v150_v3  ;;  %1425 = vmatprep.subr.bf16.mxu1 %v1928_v1  ;;  %v1791_v15 = vcombine.low %v146_v2, %v150_v3  ;;  %v167_v1 = vld [vmem:[%s2078_s16 + $0xa8] sm:$0xff]  ;;  %v1817_v3 = vcombine.low %v171_v56, %v175_v57 }
  0x2e   : > { %v278_v5 = vld [vmem:[%s2078_s16 + $0x420] sm:$0xff]  ;;  %1426 = vmatpush1.bf16.msra.mxu1 %v1927_v7 }
  0x2f   : > { %v1920_v9 = vcombine.high %v274_v4, %v278_v5  ;;  %v266_v10 = vld [vmem:[%s2078_s16 + $0x3c0] sm:$0xff]  ;;  %1386 = vmatprep.subr.bf16.mxu0 %v1792_v8  ;;  %v1919_v16 = vcombine.low %v274_v4, %v278_v5  ;;  %v1810_v5 = vcombine.high %v163_v0, %v167_v1  ;;  %v155_v8 = vld [vmem:[%s2078_s16 + $0x48] sm:$0xff] }
  0x30   : > { %v270_v13 = vld [vmem:[%s2078_s16 + $0x3e0] sm:$0xff]  ;;  %1387 = vmatpush1.bf16.msra.mxu0 %v1791_v15 }
  0x31   : > { %v338_v14 = vld [vmem:[%s2078_s16 + $0x600] sm:$0xff]  ;;  %v1912_v17 = vcombine.high %v266_v10, %v270_v13  ;;  %1427 = vmatprep.subr.bf16.mxu1 %v1920_v9  ;;  %v1911_v24 = vcombine.low %v266_v10, %v270_v13  ;;  %v159_v9 = vld [vmem:[%s2078_s16 + $0x68] sm:$0xff]  ;;  %v1809_v13 = vcombine.low %v163_v0, %v167_v1 }
  0x32   : > { %v1984_v18 = vcombine.high %v338_v14, %v338_v14  ;;  %v1983_v19 = vcombine.low %v338_v14, %v338_v14  ;;  %v258_v20 = vld [vmem:[%s2078_s16 + $0x380] sm:$0xff]  ;;  %1428 = vmatpush1.bf16.msra.mxu1 %v1919_v16  ;;  %v1802_v15 = vcombine.high %v155_v8, %v159_v9  ;;  %v331_v16 = vld [vmem:[%s2078_s16 + $0x5c8] sm:$0xff] }
  0x33   : > { %v262_v21 = vld [vmem:[%s2078_s16 + $0x3a0] sm:$0xff]  ;;  %1388 = vmatprep.subr.bf16.mxu0 %v1912_v17  ;;  %v335_v17 = vld [vmem:[%s2078_s16 + $0x5e8] sm:$0xff] }
  0x34   : > { %v1904_v25 = vcombine.high %v258_v20, %v262_v21  ;;  %1991 = vmatprep.subr.msk.bf16.mxu1 %vm1347_vm1, %v1984_v18  ;;  %v1349_v26 = vsel %vm1347_vm1, %v1983_v19, 0  ;;  %v250_v30 = vld [vmem:[%s2078_s16 + $0x340] sm:$0xff]  ;;  %1389 = vmatpush2.bf16.msra.mxu0 %v1911_v24  ;;  %v1903_v34 = vcombine.low %v258_v20, %v262_v21  ;;  %v147_v18 = vld [vmem:[%s2078_s16 + $0x8] sm:$0xff]  ;;  %v1801_v21 = vcombine.low %v155_v8, %v159_v9 }
  0x35   : > { %v254_v31 = vld [vmem:[%s2078_s16 + $0x360] sm:$0xff]  ;;  %v151_v19 = vld [vmem:[%s2078_s16 + $0x28] sm:$0xff]  ;;  %v1978_v22 = vcombine.high %v331_v16, %v335_v17 }
  0x36   : > { %1444 = vmatpush2.bf16.msra.mxu1 %v1349_v26  ;;  %1390 = vmatprep.subr.bf16.mxu0 %v1904_v25  ;;  %v1896_v36 = vcombine.high %v250_v30, %v254_v31  ;;  %v242_v38 = vld [vmem:[%s2078_s16 + $0x300] sm:$0xff]  ;;  %v1895_v42 = vcombine.low %v250_v30, %v254_v31  ;;  %v1794_v23 = vcombine.high %v147_v18, %v151_v19  ;;  %v323_v24 = vld [vmem:[%s2078_s16 + $0x588] sm:$0xff] }
  0x37   : > { %1454 = vmatprep.subr.bf16.mxu1 %v1850_v27  ;;  %v246_v39 = vld [vmem:[%s2078_s16 + $0x320] sm:$0xff]  ;;  %v327_v25 = vld [vmem:[%s2078_s16 + $0x5a8] sm:$0xff]  ;;  %v1977_v30 = vcombine.low %v331_v16, %v335_v17  ;;  %v1793_v31 = vcombine.low %v147_v18, %v151_v19 }
  0x38   : > { %1391 = vmatpush2.bf16.msra.mxu0 %v1903_v34  ;;  %v1888_v44 = vcombine.high %v242_v38, %v246_v39  ;;  %v234_v46 = vld [vmem:[%s2078_s16 + $0x2c0] sm:$0xff]  ;;  %v1887_v50 = vcombine.low %v242_v38, %v246_v39  ;;  %v267_v26 = vld [vmem:[%s2078_s16 + $0x3c8] sm:$0xff]  ;;  %v1970_v32 = vcombine.high %v323_v24, %v327_v25  ;;  %v1969_v38 = vcombine.low %v323_v24, %v327_v25 }
  0x39   : > { %1446 = vmatmul.mubr.bf16.vlgmr.msra.gmra.mxu1 %v2083_v11  ;;  %1392 = vmatprep.subr.bf16.mxu0 %v1896_v36  ;;  %v238_v47 = vld [vmem:[%s2078_s16 + $0x2e0] sm:$0xff]  ;;  %v271_v27 = vld [vmem:[%s2078_s16 + $0x3e8] sm:$0xff] }
  0x3a   : > { %1455 = vmatpush1.bf16.msra.mxu1 %v1849_v35  ;;  %1486 = vmatprep.mubr.bf16.mxu1 %v2102_v29  ;;  %v1880_v52 = vcombine.high %v234_v46, %v238_v47  ;;  %v226_v54 = vld [vmem:[%s2078_s16 + $0x280] sm:$0xff]  ;;  %v1879_v58 = vcombine.low %v234_v46, %v238_v47  ;;  %v1914_v33 = vcombine.high %v267_v26, %v271_v27  ;;  %v315_v34 = vld [vmem:[%s2078_s16 + $0x548] sm:$0xff] }
  0x3b   : > { %1456 = vmatprep.subr.bf16.mxu1 %v1842_v37  ;;  %v230_v55 = vld [vmem:[%s2078_s16 + $0x2a0] sm:$0xff]  ;;  %v319_v35 = vld [vmem:[%s2078_s16 + $0x568] sm:$0xff]  ;;  %v1913_v39 = vcombine.low %v267_v26, %v271_v27 }
  0x3c   : > { %1393 = vmatpush2.bf16.msra.mxu0 %v1895_v42  ;;  %v1872_v60 = vcombine.high %v226_v54, %v230_v55  ;;  %v218_v62 = vld [vmem:[%s2078_s16 + $0x240] sm:$0xff]  ;;  %v1871_v2 = vcombine.low %v226_v54, %v230_v55  ;;  %v259_v36 = vld [vmem:[%s2078_s16 + $0x388] sm:$0xff]  ;;  %v1962_v40 = vcombine.high %v315_v34, %v319_v35  ;;  %v1961_v46 = vcombine.low %v315_v34, %v319_v35 }
  0x3d   : > { %1394 = vmatprep.subr.bf16.mxu0 %v1888_v44  ;;  %v222_v63 = vld [vmem:[%s2078_s16 + $0x260] sm:$0xff]  ;;  %v263_v37 = vld [vmem:[%s2078_s16 + $0x3a8] sm:$0xff] }
  0x3e   : > { %1457 = vmatpush1.bf16.msra.mxu1 %v1841_v43  ;;  %v1864_v4 = vcombine.high %v218_v62, %v222_v63  ;;  %v210_v6 = vld [vmem:[%s2078_s16 + $0x200] sm:$0xff]  ;;  %v1863_v10 = vcombine.low %v218_v62, %v222_v63  ;;  %v1906_v41 = vcombine.high %v259_v36, %v263_v37  ;;  %v307_v42 = vld [vmem:[%s2078_s16 + $0x508] sm:$0xff]  ;;  %v1905_v47 = vcombine.low %v259_v36, %v263_v37 }
  0x3f   : > { %1458 = vmatprep.subr.bf16.mxu1 %v1834_v45  ;;  %v214_v7 = vld [vmem:[%s2078_s16 + $0x220] sm:$0xff]  ;;  %v311_v43 = vld [vmem:[%s2078_s16 + $0x528] sm:$0xff] }
  0x40   : > { %1395 = vmatpush2.bf16.msra.mxu0 %v1887_v50  ;;  %v1856_v14 = vcombine.high %v210_v6, %v214_v7  ;;  %v1855_v20 = vcombine.low %v210_v6, %v214_v7  ;;  %v251_v44 = vld [vmem:[%s2078_s16 + $0x348] sm:$0xff]  ;;  %v1954_v48 = vcombine.high %v307_v42, %v311_v43  ;;  %v1953_v54 = vcombine.low %v307_v42, %v311_v43 }
  0x41   : > { %1396 = vmatprep.subr.bf16.mxu0 %v1880_v52  ;;  %v255_v45 = vld [vmem:[%s2078_s16 + $0x368] sm:$0xff] }
  0x42   : > { %1459 = vmatpush1.bf16.msra.mxu1 %v1833_v51  ;;  %v1898_v49 = vcombine.high %v251_v44, %v255_v45  ;;  %v299_v50 = vld [vmem:[%s2078_s16 + $0x4c8] sm:$0xff]  ;;  %v1897_v55 = vcombine.low %v251_v44, %v255_v45 }
  0x43   : > { %1460 = vmatprep.subr.bf16.mxu1 %v1826_v53  ;;  %v303_v51 = vld [vmem:[%s2078_s16 + $0x4e8] sm:$0xff] }
  0x44   : > { %1397 = vmatpush2.bf16.msra.mxu0 %v1879_v58  ;;  %v243_v52 = vld [vmem:[%s2078_s16 + $0x308] sm:$0xff]  ;;  %v1946_v56 = vcombine.high %v299_v50, %v303_v51  ;;  %v1945_v62 = vcombine.low %v299_v50, %v303_v51 }
  0x45   : > { %1398 = vmatprep.subr.bf16.mxu0 %v1872_v60  ;;  %v247_v53 = vld [vmem:[%s2078_s16 + $0x328] sm:$0xff] }
  0x46   : > { %1461 = vmatpush1.bf16.msra.mxu1 %v1825_v59  ;;  %v1890_v57 = vcombine.high %v243_v52, %v247_v53  ;;  %v291_v58 = vld [vmem:[%s2078_s16 + $0x488] sm:$0xff]  ;;  %v1889_v63 = vcombine.low %v243_v52, %v247_v53 }
  0x47   : > { %1462 = vmatprep.subr.bf16.mxu1 %v1818_v61  ;;  %v295_v59 = vld [vmem:[%s2078_s16 + $0x4a8] sm:$0xff] }
  0x48   : > { %1399 = vmatpush2.bf16.msra.mxu0 %v1871_v2  ;;  %v235_v60 = vld [vmem:[%s2078_s16 + $0x2c8] sm:$0xff]  ;;  %v1938_v0 = vcombine.high %v291_v58, %v295_v59  ;;  %v1937_v6 = vcombine.low %v291_v58, %v295_v59 }
  0x49   : > { %1400 = vmatprep.subr.bf16.mxu0 %v1864_v4  ;;  %v239_v61 = vld [vmem:[%s2078_s16 + $0x2e8] sm:$0xff] }
  0x4a   : > { %1463 = vmatpush1.bf16.msra.mxu1 %v1817_v3  ;;  %v1882_v1 = vcombine.high %v235_v60, %v239_v61  ;;  %v283_v2 = vld [vmem:[%s2078_s16 + $0x448] sm:$0xff]  ;;  %v1881_v7 = vcombine.low %v235_v60, %v239_v61 }
  0x4b   : > { %1464 = vmatprep.subr.bf16.mxu1 %v1810_v5  ;;  %v287_v3 = vld [vmem:[%s2078_s16 + $0x468] sm:$0xff] }
  0x4c   : > { %1401 = vmatpush2.bf16.msra.mxu0 %v1863_v10  ;;  %v227_v4 = vld [vmem:[%s2078_s16 + $0x288] sm:$0xff]  ;;  %v1930_v8 = vcombine.high %v283_v2, %v287_v3  ;;  %v1929_v16 = vcombine.low %v283_v2, %v287_v3 }
  0x4d   : > { %1402 = vmatprep.subr.bf16.mxu0 %v1856_v14  ;;  %v231_v5 = vld [vmem:[%s2078_s16 + $0x2a8] sm:$0xff] }
  0x4e   : > { %1465 = vmatpush1.bf16.msra.mxu1 %v1809_v13  ;;  %v1874_v9 = vcombine.high %v227_v4, %v231_v5  ;;  %v275_v10 = vld [vmem:[%s2078_s16 + $0x408] sm:$0xff]  ;;  %v1873_v17 = vcombine.low %v227_v4, %v231_v5 }
  0x4f   : > { %1466 = vmatprep.subr.bf16.mxu1 %v1802_v15  ;;  %v279_v13 = vld [vmem:[%s2078_s16 + $0x428] sm:$0xff] }
  0x50   : > { %1403 = vmatpush2.bf16.msra.mxu0 %v1855_v20  ;;  %v219_v14 = vld [vmem:[%s2078_s16 + $0x248] sm:$0xff]  ;;  %v1922_v18 = vcombine.high %v275_v10, %v279_v13 }
  0x51   : > { %1495 = vmatprep.subr.bf16.mxu0 %v1978_v22  ;;  %v223_v15 = vld [vmem:[%s2078_s16 + $0x268] sm:$0xff] }
  0x52   : > { %1467 = vmatpush1.bf16.msra.mxu1 %v1801_v21  ;;  %v1866_v19 = vcombine.high %v219_v14, %v223_v15  ;;  %v339_v20 = vld [vmem:[%s2078_s16 + $0x608] sm:$0xff]  ;;  %v1865_v24 = vcombine.low %v219_v14, %v223_v15 }
  0x53   : > { %1468 = vmatprep.subr.bf16.mxu1 %v1794_v23  ;;  %1405 = vmatmul.mubr.bf16.vlgmr.msra.gmra.mxu0 %v2085_v12  ;;  %v211_v21 = vld [vmem:[%s2078_s16 + $0x208] sm:$0xff]  ;;  %v1921_v23 = vcombine.low %v275_v10, %v279_v13  ;;  %v1986_v25 = vcombine.high %v339_v20, %v339_v20  ;;  %v1985_v26 = vcombine.low %v339_v20, %v339_v20 }
  0x54   : > { %1496 = vmatpush1.bf16.msra.mxu0 %v1977_v30  ;;  %1994 = vmatprep.mubr.msk.bf16.mxu0 %vm1343_vm0, %v2098_v28  ;;  %v215_v22 = vld [vmem:[%s2078_s16 + $0x228] sm:$0xff]  ;;  %v204_v30 = vld [vmem:[%s2078_s16 + $0x1d0] sm:$0xff] }
  0x55   : > { %1497 = vmatprep.subr.bf16.mxu0 %v1970_v32  ;;  %v1858_v27 = vcombine.high %v211_v21, %v215_v22  ;;  %v332_v32 = vld [vmem:[%s2078_s16 + $0x5d0] sm:$0xff]  ;;  %v1857_v34 = vcombine.low %v211_v21, %v215_v22  ;;  %v1355_v35 = vsel %vm1347_vm1, %v1985_v26, 0 }
  0x56   : > { %1469 = vmatpush1.bf16.msra.mxu1 %v1793_v31  ;;  %v208_v31 = vld [vmem:[%s2078_s16 + $0x1f0] sm:$0xff] }
  0x57   : > { %1470 = vmatprep.subr.bf16.mxu1 %v1914_v33  ;;  %v336_v33 = vld [vmem:[%s2078_s16 + $0x5f0] sm:$0xff]  ;;  %v1852_v36 = vcombine.high %v204_v30, %v208_v31  ;;  %v1851_v42 = vcombine.low %v204_v30, %v208_v31 }
  0x58   : > { %1498 = vmatpush1.bf16.msra.mxu0 %v1969_v38  ;;  %v1980_v37 = vcombine.high %v332_v32, %v336_v33  ;;  %v196_v38 = vld [vmem:[%s2078_s16 + $0x190] sm:$0xff]  ;;  %v1979_v43 = vcombine.low %v332_v32, %v336_v33 }
  0x59   : > { %1499 = vmatprep.subr.bf16.mxu0 %v1962_v40  ;;  %v324_v40 = vld [vmem:[%s2078_s16 + $0x590] sm:$0xff] }
  0x5a   : > { %1471 = vmatpush2.bf16.msra.mxu1 %v1913_v39  ;;  %v200_v39 = vld [vmem:[%s2078_s16 + $0x1b0] sm:$0xff] }
  0x5b   : > { %1472 = vmatprep.subr.bf16.mxu1 %v1906_v41  ;;  %v328_v41 = vld [vmem:[%s2078_s16 + $0x5b0] sm:$0xff]  ;;  %v1844_v44 = vcombine.high %v196_v38, %v200_v39  ;;  %v1843_v50 = vcombine.low %v196_v38, %v200_v39 }
  0x5c   : > { %1500 = vmatpush1.bf16.msra.mxu0 %v1961_v46  ;;  %v1972_v45 = vcombine.high %v324_v40, %v328_v41  ;;  %v188_v46 = vld [vmem:[%s2078_s16 + $0x150] sm:$0xff]  ;;  %v1971_v51 = vcombine.low %v324_v40, %v328_v41 }
  0x5d   : > { %1501 = vmatprep.subr.bf16.mxu0 %v1954_v48  ;;  %v316_v48 = vld [vmem:[%s2078_s16 + $0x550] sm:$0xff] }
  0x5e   : > { %1473 = vmatpush2.bf16.msra.mxu1 %v1905_v47  ;;  %v192_v47 = vld [vmem:[%s2078_s16 + $0x170] sm:$0xff] }
  0x5f   : > { %1474 = vmatprep.subr.bf16.mxu1 %v1898_v49  ;;  %v320_v49 = vld [vmem:[%s2078_s16 + $0x570] sm:$0xff]  ;;  %v1836_v52 = vcombine.high %v188_v46, %v192_v47  ;;  %v1835_v58 = vcombine.low %v188_v46, %v192_v47 }
  0x60   : > { %1502 = vmatpush1.bf16.msra.mxu0 %v1953_v54  ;;  %v1964_v53 = vcombine.high %v316_v48, %v320_v49  ;;  %v180_v54 = vld [vmem:[%s2078_s16 + $0x110] sm:$0xff]  ;;  %v1963_v59 = vcombine.low %v316_v48, %v320_v49 }
  0x61   : > { %1503 = vmatprep.subr.bf16.mxu0 %v1946_v56  ;;  %v308_v56 = vld [vmem:[%s2078_s16 + $0x510] sm:$0xff] }
  0x62   : > { %1475 = vmatpush2.bf16.msra.mxu1 %v1897_v55  ;;  %v184_v55 = vld [vmem:[%s2078_s16 + $0x130] sm:$0xff] }
  0x63   : > { %1476 = vmatprep.subr.bf16.mxu1 %v1890_v57  ;;  %v312_v57 = vld [vmem:[%s2078_s16 + $0x530] sm:$0xff]  ;;  %v1828_v60 = vcombine.high %v180_v54, %v184_v55  ;;  %v1827_v2 = vcombine.low %v180_v54, %v184_v55 }
  0x64   : > { %1504 = vmatpush1.bf16.msra.mxu0 %v1945_v62  ;;  %v1956_v61 = vcombine.high %v308_v56, %v312_v57  ;;  %v172_v62 = vld [vmem:[%s2078_s16 + $0xd0] sm:$0xff]  ;;  %v1955_v3 = vcombine.low %v308_v56, %v312_v57 }
  0x65   : > { %1505 = vmatprep.subr.bf16.mxu0 %v1938_v0  ;;  %v300_v0 = vld [vmem:[%s2078_s16 + $0x4d0] sm:$0xff] }
  0x66   : > { %1477 = vmatpush2.bf16.msra.mxu1 %v1889_v63  ;;  %v176_v63 = vld [vmem:[%s2078_s16 + $0xf0] sm:$0xff] }
  0x67   : > { %1478 = vmatprep.subr.bf16.mxu1 %v1882_v1  ;;  %v304_v1 = vld [vmem:[%s2078_s16 + $0x4f0] sm:$0xff]  ;;  %v1820_v4 = vcombine.high %v172_v62, %v176_v63  ;;  %v1819_v10 = vcombine.low %v172_v62, %v176_v63 }
  0x68   : > { %1506 = vmatpush1.bf16.msra.mxu0 %v1937_v6  ;;  %v1948_v5 = vcombine.high %v300_v0, %v304_v1  ;;  %v164_v6 = vld [vmem:[%s2078_s16 + $0x90] sm:$0xff]  ;;  %v1947_v13 = vcombine.low %v300_v0, %v304_v1 }
  0x69   : > { %1507 = vmatprep.subr.bf16.mxu0 %v1930_v8  ;;  %v292_v8 = vld [vmem:[%s2078_s16 + $0x490] sm:$0xff] }
  0x6a   : > { %1479 = vmatpush2.bf16.msra.mxu1 %v1881_v7  ;;  %v168_v7 = vld [vmem:[%s2078_s16 + $0xb0] sm:$0xff] }
  0x6b   : > { %1480 = vmatprep.subr.bf16.mxu1 %v1874_v9  ;;  %v296_v9 = vld [vmem:[%s2078_s16 + $0x4b0] sm:$0xff]  ;;  %v1812_v14 = vcombine.high %v164_v6, %v168_v7  ;;  %v1811_v20 = vcombine.low %v164_v6, %v168_v7 }
  0x6c   : > { %1508 = vmatpush1.bf16.msra.mxu0 %v1929_v16  ;;  %v1940_v15 = vcombine.high %v292_v8, %v296_v9  ;;  %v156_v16 = vld [vmem:[%s2078_s16 + $0x50] sm:$0xff]  ;;  %v1939_v21 = vcombine.low %v292_v8, %v296_v9 }
  0x6d   : > { %1509 = vmatprep.subr.bf16.mxu0 %v1922_v18  ;;  %v284_v18 = vld [vmem:[%s2078_s16 + $0x450] sm:$0xff] }
  0x6e   : > { %1481 = vmatpush2.bf16.msra.mxu1 %v1873_v17  ;;  %v160_v17 = vld [vmem:[%s2078_s16 + $0x70] sm:$0xff] }
  0x6f   : > { %1482 = vmatprep.subr.bf16.mxu1 %v1866_v19  ;;  %v288_v19 = vld [vmem:[%s2078_s16 + $0x470] sm:$0xff]  ;;  %v1804_v22 = vcombine.high %v156_v16, %v160_v17  ;;  %v1803_v30 = vcombine.low %v156_v16, %v160_v17 }
  0x70   : > { %1510 = vmatpush1.bf16.msra.mxu0 %v1921_v23  ;;  %v1932_v23 = vcombine.high %v284_v18, %v288_v19  ;;  %v276_v26 = vld [vmem:[%s2078_s16 + $0x410] sm:$0xff]  ;;  %v1931_v31 = vcombine.low %v284_v18, %v288_v19 }
  0x71   : > { %1993 = vmatprep.subr.msk.bf16.mxu0 %vm1347_vm1, %v1986_v25  ;;  %v152_v25 = vld [vmem:[%s2078_s16 + $0x30] sm:$0xff] }
  0x72   : > { %1483 = vmatpush2.bf16.msra.mxu1 %v1865_v24  ;;  %v148_v24 = vld [vmem:[%s2078_s16 + $0x10] sm:$0xff] }
  0x73   : > { %1484 = vmatprep.subr.bf16.mxu1 %v1858_v27  ;;  %v280_v27 = vld [vmem:[%s2078_s16 + $0x430] sm:$0xff]  ;;  %v1796_v32 = vcombine.high %v148_v24, %v152_v25 }
  0x74   : > { %1526 = vmatpush2.bf16.msra.mxu0 %v1355_v35  ;;  %v1924_v33 = vcombine.high %v276_v26, %v280_v27  ;;  %v272_v35 = vld [vmem:[%s2078_s16 + $0x3f0] sm:$0xff]  ;;  %v1923_v38 = vcombine.low %v276_v26, %v280_v27 }
  0x75   : > { %1536 = vmatprep.subr.bf16.mxu0 %v1852_v36  ;;  %v340_v36 = vld [vmem:[%s2078_s16 + $0x610] sm:$0xff] }
  0x76   : > { %1485 = vmatpush2.bf16.msra.mxu1 %v1857_v34  ;;  %v268_v34 = vld [vmem:[%s2078_s16 + $0x3d0] sm:$0xff]  ;;  %v1988_v40 = vcombine.high %v340_v36, %v340_v36  ;;  %v1987_v41 = vcombine.low %v340_v36, %v340_v36 }
  0x77   : > { %1577 = vmatprep.subr.bf16.mxu1 %v1980_v37  ;;  %1528 = vmatmul.mubr.bf16.vlgmr.msra.gmra.mxu0 %v2083_v11  ;;  %v1795_v37 = vcombine.low %v148_v24, %v152_v25  ;;  %v1916_v39 = vcombine.high %v268_v34, %v272_v35  ;;  %v1915_v46 = vcombine.low %v268_v34, %v272_v35  ;;  %v220_v19 = vld [vmem:[%s2078_s16 + $0x250] sm:$0xff] }
  0x78   : > { %1537 = vmatpush1.bf16.msra.mxu0 %v1851_v42  ;;  %1568 = vmatprep.mubr.bf16.mxu0 %v2102_v29  ;;  %v260_v42 = vld [vmem:[%s2078_s16 + $0x390] sm:$0xff]  ;;  %v1361_v48 = vsel %vm1347_vm1, %v1987_v41, 0 }
  0x79   : > { %1487 = vmatmul.mubr.bf16.vlgmr.msra.gmra.mxu1 %v2085_v12  ;;  %1538 = vmatprep.subr.bf16.mxu0 %v1844_v44  ;;  %v205_v44 = vld [vmem:[%s2078_s16 + $0x1d8] sm:$0xff]  ;;  %v212_v27 = vld [vmem:[%s2078_s16 + $0x210] sm:$0xff] }
  0x7a   : > { %1578 = vmatpush1.bf16.msra.mxu1 %v1979_v43  ;;  %1996 = vmatprep.mubr.msk.bf16.mxu1 %vm1343_vm0, %v2098_v28  ;;  %v264_v43 = vld [vmem:[%s2078_s16 + $0x3b0] sm:$0xff] }
  0x7b   : > { %1579 = vmatprep.subr.bf16.mxu1 %v1972_v45  ;;  %v209_v45 = vld [vmem:[%s2078_s16 + $0x1f8] sm:$0xff]  ;;  %v1908_v47 = vcombine.high %v260_v42, %v264_v43  ;;  %v1907_v54 = vcombine.low %v260_v42, %v264_v43 }
  0x7c   : > { %1539 = vmatpush1.bf16.msra.mxu0 %v1843_v50  ;;  %v1854_v49 = vcombine.high %v205_v44, %v209_v45  ;;  %v252_v50 = vld [vmem:[%s2078_s16 + $0x350] sm:$0xff]  ;;  %v1853_v55 = vcombine.low %v205_v44, %v209_v45  ;;  %v325_v45 = vld [vmem:[%s2078_s16 + $0x598] sm:$0xff] }
  0x7d   : > { %1540 = vmatprep.subr.bf16.mxu0 %v1836_v52  ;;  %v197_v52 = vld [vmem:[%s2078_s16 + $0x198] sm:$0xff] }
  0x7e   : > { %1580 = vmatpush1.bf16.msra.mxu1 %v1971_v51  ;;  %v256_v51 = vld [vmem:[%s2078_s16 + $0x370] sm:$0xff] }
  0x7f   : > { %1581 = vmatprep.subr.bf16.mxu1 %v1964_v53  ;;  %v201_v53 = vld [vmem:[%s2078_s16 + $0x1b8] sm:$0xff]  ;;  %v1900_v56 = vcombine.high %v252_v50, %v256_v51  ;;  %v1899_v62 = vcombine.low %v252_v50, %v256_v51 }
  0x80   : > { %1541 = vmatpush1.bf16.msra.mxu0 %v1835_v58  ;;  %v1846_v57 = vcombine.high %v197_v52, %v201_v53  ;;  %v244_v58 = vld [vmem:[%s2078_s16 + $0x310] sm:$0xff]  ;;  %v1845_v63 = vcombine.low %v197_v52, %v201_v53  ;;  %v317_v53 = vld [vmem:[%s2078_s16 + $0x558] sm:$0xff] }
  0x81   : > { %1542 = vmatprep.subr.bf16.mxu0 %v1828_v60  ;;  %v189_v60 = vld [vmem:[%s2078_s16 + $0x158] sm:$0xff] }
  0x82   : > { %1582 = vmatpush1.bf16.msra.mxu1 %v1963_v59  ;;  %v248_v59 = vld [vmem:[%s2078_s16 + $0x330] sm:$0xff] }
  0x83   : > { %1583 = vmatprep.subr.bf16.mxu1 %v1956_v61  ;;  %v193_v61 = vld [vmem:[%s2078_s16 + $0x178] sm:$0xff]  ;;  %v1892_v0 = vcombine.high %v244_v58, %v248_v59  ;;  %v1891_v6 = vcombine.low %v244_v58, %v248_v59 }
  0x84   : > { %1543 = vmatpush1.bf16.msra.mxu0 %v1827_v2  ;;  %v1838_v1 = vcombine.high %v189_v60, %v193_v61  ;;  %v236_v2 = vld [vmem:[%s2078_s16 + $0x2d0] sm:$0xff]  ;;  %v1837_v7 = vcombine.low %v189_v60, %v193_v61  ;;  %v309_v61 = vld [vmem:[%s2078_s16 + $0x518] sm:$0xff] }
  0x85   : > { %1544 = vmatprep.subr.bf16.mxu0 %v1820_v4  ;;  %v181_v4 = vld [vmem:[%s2078_s16 + $0x118] sm:$0xff] }
  0x86   : > { %1584 = vmatpush1.bf16.msra.mxu1 %v1955_v3  ;;  %v240_v3 = vld [vmem:[%s2078_s16 + $0x2f0] sm:$0xff] }
  0x87   : > { %1585 = vmatprep.subr.bf16.mxu1 %v1948_v5  ;;  %v185_v5 = vld [vmem:[%s2078_s16 + $0x138] sm:$0xff]  ;;  %v1884_v8 = vcombine.high %v236_v2, %v240_v3 }
  0x88   : > { %1545 = vmatpush1.bf16.msra.mxu0 %v1819_v10  ;;  %v1830_v9 = vcombine.high %v181_v4, %v185_v5  ;;  %v228_v10 = vld [vmem:[%s2078_s16 + $0x290] sm:$0xff]  ;;  %v1829_v16 = vcombine.low %v181_v4, %v185_v5  ;;  %v301_v4 = vld [vmem:[%s2078_s16 + $0x4d8] sm:$0xff] }
  0x89   : > { %1546 = vmatprep.subr.bf16.mxu0 %v1812_v14  ;;  %v173_v14 = vld [vmem:[%s2078_s16 + $0xd8] sm:$0xff] }
  0x8a   : > { %1586 = vmatpush1.bf16.msra.mxu1 %v1947_v13  ;;  %v232_v13 = vld [vmem:[%s2078_s16 + $0x2b0] sm:$0xff]  ;;  %v305_v5 = vld [vmem:[%s2078_s16 + $0x4f8] sm:$0xff] }
  0x8b   : > { %1587 = vmatprep.subr.bf16.mxu1 %v1940_v15  ;;  %v177_v15 = vld [vmem:[%s2078_s16 + $0xf8] sm:$0xff]  ;;  %v1876_v17 = vcombine.high %v228_v10, %v232_v13 }
  0x8c   : > { %1547 = vmatpush1.bf16.msra.mxu0 %v1811_v20  ;;  %v1822_v18 = vcombine.high %v173_v14, %v177_v15  ;;  %v224_v20 = vld [vmem:[%s2078_s16 + $0x270] sm:$0xff]  ;;  %v1821_v24 = vcombine.low %v173_v14, %v177_v15  ;;  %v293_v14 = vld [vmem:[%s2078_s16 + $0x498] sm:$0xff] }
  0x8d   : > { %1548 = vmatprep.subr.bf16.mxu0 %v1804_v22  ;;  %v169_v22 = vld [vmem:[%s2078_s16 + $0xb8] sm:$0xff]  ;;  %v1868_v25 = vcombine.high %v220_v19, %v224_v20 }
  0x8e   : > { %1588 = vmatpush1.bf16.msra.mxu1 %v1939_v21  ;;  %v165_v21 = vld [vmem:[%s2078_s16 + $0x98] sm:$0xff] }
  0x8f   : > { %1589 = vmatprep.subr.bf16.mxu1 %v1932_v23  ;;  %v1875_v23 = vcombine.low %v228_v10, %v232_v13  ;;  %v1814_v26 = vcombine.high %v165_v21, %v169_v22  ;;  %v1813_v34 = vcombine.low %v165_v21, %v169_v22  ;;  %v1950_v10 = vcombine.high %v301_v4, %v305_v5  ;;  %v297_v15 = vld [vmem:[%s2078_s16 + $0x4b8] sm:$0xff] }
  0x90   : > { %1549 = vmatpush1.bf16.msra.mxu0 %v1803_v30  ;;  %v216_v30 = vld [vmem:[%s2078_s16 + $0x230] sm:$0xff]  ;;  %v285_v21 = vld [vmem:[%s2078_s16 + $0x458] sm:$0xff] }
  0x91   : > { %1550 = vmatprep.subr.bf16.mxu0 %v1796_v32  ;;  %v161_v32 = vld [vmem:[%s2078_s16 + $0x78] sm:$0xff]  ;;  %v1860_v35 = vcombine.high %v212_v27, %v216_v30  ;;  %v1859_v41 = vcombine.low %v212_v27, %v216_v30 }
  0x92   : > { %1590 = vmatpush1.bf16.msra.mxu1 %v1931_v31  ;;  %v157_v31 = vld [vmem:[%s2078_s16 + $0x58] sm:$0xff] }
  0x93   : > { %1591 = vmatprep.subr.bf16.mxu1 %v1924_v33  ;;  %v1867_v33 = vcombine.low %v220_v19, %v224_v20  ;;  %v1806_v36 = vcombine.high %v157_v31, %v161_v32  ;;  %v1805_v42 = vcombine.low %v157_v31, %v161_v32  ;;  %v1942_v19 = vcombine.high %v293_v14, %v297_v15  ;;  %v289_v22 = vld [vmem:[%s2078_s16 + $0x478] sm:$0xff] }
  0x94   : > { %1551 = vmatpush1.bf16.msra.mxu0 %v1795_v37  ;;  %v333_v37 = vld [vmem:[%s2078_s16 + $0x5d8] sm:$0xff]  ;;  %v1934_v27 = vcombine.high %v285_v21, %v289_v22 }
  0x95   : > { %1552 = vmatprep.subr.bf16.mxu0 %v1916_v39  ;;  %v149_v39 = vld [vmem:[%s2078_s16 + $0x18] sm:$0xff] }
  0x96   : > { %1592 = vmatpush1.bf16.msra.mxu1 %v1923_v38  ;;  %v337_v38 = vld [vmem:[%s2078_s16 + $0x5f8] sm:$0xff] }
  0x97   : > { %1995 = vmatprep.subr.msk.bf16.mxu1 %vm1347_vm1, %v1988_v40  ;;  %v153_v40 = vld [vmem:[%s2078_s16 + $0x38] sm:$0xff]  ;;  %v1982_v43 = vcombine.high %v333_v37, %v337_v38 }
  0x98   : > { %1553 = vmatpush2.bf16.msra.mxu0 %v1915_v46  ;;  %v1798_v44 = vcombine.high %v149_v39, %v153_v40  ;;  %v329_v46 = vld [vmem:[%s2078_s16 + $0x5b8] sm:$0xff]  ;;  %v1797_v50 = vcombine.low %v149_v39, %v153_v40 }
  0x99   : > { %1554 = vmatprep.subr.bf16.mxu0 %v1908_v47  ;;  %v269_v47 = vld [vmem:[%s2078_s16 + $0x3d8] sm:$0xff]  ;;  %v1974_v51 = vcombine.high %v325_v45, %v329_v46 }
  0x9a   : > { %1608 = vmatpush2.bf16.msra.mxu1 %v1361_v48  ;;  %v273_v48 = vld [vmem:[%s2078_s16 + $0x3f8] sm:$0xff] }
  0x9b   : > { %1618 = vmatprep.subr.bf16.mxu1 %v1854_v49  ;;  %v1981_v49 = vcombine.low %v333_v37, %v337_v38  ;;  %v1918_v52 = vcombine.high %v269_v47, %v273_v48  ;;  %v1917_v58 = vcombine.low %v269_v47, %v273_v48  ;;  %v277_v31 = vld [vmem:[%s2078_s16 + $0x418] sm:$0xff] }
  0x9c   : > { %1555 = vmatpush2.bf16.msra.mxu0 %v1907_v54  ;;  %v321_v54 = vld [vmem:[%s2078_s16 + $0x578] sm:$0xff] }
  0x9d   : > { %1610 = vmatmul.mubr.bf16.vlgmr.msra.gmra.mxu1 %v2083_v11  ;;  %1556 = vmatprep.subr.bf16.mxu0 %v1900_v56  ;;  %v265_v56 = vld [vmem:[%s2078_s16 + $0x3b8] sm:$0xff]  ;;  %v1966_v59 = vcombine.high %v317_v53, %v321_v54 }
  0x9e   : > { %1619 = vmatpush1.bf16.msra.mxu1 %v1853_v55  ;;  %1650 = vmatprep.mubr.bf16.mxu1 %v2102_v29  ;;  %v1883_v29 = vcombine.low %v236_v2, %v240_v3  ;;  %v261_v55 = vld [vmem:[%s2078_s16 + $0x398] sm:$0xff] }
  0x9f   : > { %1620 = vmatprep.subr.bf16.mxu1 %v1846_v57  ;;  %v1973_v57 = vcombine.low %v325_v45, %v329_v46  ;;  %v1910_v60 = vcombine.high %v261_v55, %v265_v56  ;;  %v1909_v2 = vcombine.low %v261_v55, %v265_v56  ;;  %v281_v32 = vld [vmem:[%s2078_s16 + $0x438] sm:$0xff] }
  0xa0   : > { %1557 = vmatpush2.bf16.msra.mxu0 %v1899_v62  ;;  %v313_v62 = vld [vmem:[%s2078_s16 + $0x538] sm:$0xff]  ;;  %v1926_v37 = vcombine.high %v277_v31, %v281_v32 }
  0xa1   : > { %1558 = vmatprep.subr.bf16.mxu0 %v1892_v0  ;;  %v257_v0 = vld [vmem:[%s2078_s16 + $0x378] sm:$0xff] }
  0xa2   : > { %1621 = vmatpush1.bf16.msra.mxu1 %v1845_v63  ;;  %v253_v63 = vld [vmem:[%s2078_s16 + $0x358] sm:$0xff] }
  0xa3   : > { %1622 = vmatprep.subr.bf16.mxu1 %v1838_v1  ;;  %v1965_v1 = vcombine.low %v317_v53, %v321_v54  ;;  %v1902_v3 = vcombine.high %v253_v63, %v257_v0  ;;  %v341_v39 = vld [vmem:[%s2078_s16 + $0x618] sm:$0xff] }
  0xa4   : > { %1559 = vmatpush2.bf16.msra.mxu0 %v1891_v6  ;;  %v245_v6 = vld [vmem:[%s2078_s16 + $0x318] sm:$0xff]  ;;  %v1989_v45 = vcombine.low %v341_v39, %v341_v39 }
  0xa5   : > { %1560 = vmatprep.subr.bf16.mxu0 %v1884_v8  ;;  %v1957_v8 = vcombine.low %v309_v61, %v313_v62  ;;  %v213_v40 = vld [vmem:[%s2078_s16 + $0x218] sm:$0xff] }
  0xa6   : > { %1623 = vmatpush1.bf16.msra.mxu1 %v1837_v7  ;;  %v249_v7 = vld [vmem:[%s2078_s16 + $0x338] sm:$0xff]  ;;  %v1367_v48 = vsel %vm1347_vm1, %v1989_v45, 0 }
  0xa7   : > { %1624 = vmatprep.subr.bf16.mxu1 %v1830_v9  ;;  %v1901_v9 = vcombine.low %v253_v63, %v257_v0  ;;  %v1894_v13 = vcombine.high %v245_v6, %v249_v7 }
  0xa8   : > { %1561 = vmatpush2.bf16.msra.mxu0 %v1883_v29  ;;  %v237_v29 = vld [vmem:[%s2078_s16 + $0x2d8] sm:$0xff] }
  0xa9   : > { %1562 = vmatprep.subr.bf16.mxu0 %v1876_v17  ;;  %v1949_v17 = vcombine.low %v301_v4, %v305_v5 }
  0xaa   : > { %1625 = vmatpush1.bf16.msra.mxu1 %v1829_v16  ;;  %v241_v16 = vld [vmem:[%s2078_s16 + $0x2f8] sm:$0xff] }
  0xab   : > { %1626 = vmatprep.subr.bf16.mxu1 %v1822_v18  ;;  %v1893_v18 = vcombine.low %v245_v6, %v249_v7  ;;  %v1886_v20 = vcombine.high %v237_v29, %v241_v16 }
  0xac   : > { %1563 = vmatpush2.bf16.msra.mxu0 %v1875_v23  ;;  %v229_v23 = vld [vmem:[%s2078_s16 + $0x298] sm:$0xff] }
  0xad   : > { %1564 = vmatprep.subr.bf16.mxu0 %v1868_v25  ;;  %v1941_v25 = vcombine.low %v293_v14, %v297_v15 }
  0xae   : > { %1627 = vmatpush1.bf16.msra.mxu1 %v1821_v24  ;;  %v233_v24 = vld [vmem:[%s2078_s16 + $0x2b8] sm:$0xff] }
  0xaf   : > { %1628 = vmatprep.subr.bf16.mxu1 %v1814_v26  ;;  %v1885_v26 = vcombine.low %v237_v29, %v241_v16  ;;  %v1878_v30 = vcombine.high %v229_v23, %v233_v24 }
  0xb0   : > { %1565 = vmatpush2.bf16.msra.mxu0 %v1867_v33  ;;  %v221_v33 = vld [vmem:[%s2078_s16 + $0x258] sm:$0xff] }
  0xb1   : > { %1566 = vmatprep.subr.bf16.mxu0 %v1860_v35  ;;  %v1933_v35 = vcombine.low %v285_v21, %v289_v22 }
  0xb2   : > { %1629 = vmatpush1.bf16.msra.mxu1 %v1813_v34  ;;  %v225_v34 = vld [vmem:[%s2078_s16 + $0x278] sm:$0xff] }
  0xb3   : > { %1630 = vmatprep.subr.bf16.mxu1 %v1806_v36  ;;  %v1877_v36 = vcombine.low %v229_v23, %v233_v24  ;;  %v1870_v38 = vcombine.high %v221_v33, %v225_v34 }
  0xb4   : > { %1567 = vmatpush2.bf16.msra.mxu0 %v1859_v41  ;;  %v217_v41 = vld [vmem:[%s2078_s16 + $0x238] sm:$0xff] }
  0xb5   : > { %1659 = vmatprep.subr.bf16.mxu0 %v1982_v43  ;;  %v1869_v43 = vcombine.low %v221_v33, %v225_v34  ;;  %v1862_v46 = vcombine.high %v213_v40, %v217_v41  ;;  %v1861_v47 = vcombine.low %v213_v40, %v217_v41 }
  0xb6   : > { %1631 = vmatpush1.bf16.msra.mxu1 %v1805_v42  ;;  %v1925_v42 = vcombine.low %v277_v31, %v281_v32 }
  0xb7   : > { %1632 = vmatprep.subr.bf16.mxu1 %v1798_v44  ;;  %1569 = vmatmul.mubr.bf16.vlgmr.msra.gmra.mxu0 %v2085_v12  ;;  %v1990_v44 = vcombine.high %v341_v39, %v341_v39 }
  0xb8   : > { %1660 = vmatpush1.bf16.msra.mxu0 %v1981_v49  ;;  %1998 = vmatprep.mubr.msk.bf16.mxu0 %vm1343_vm0, %v2098_v28  ;;  %v1958_v28 = vcombine.high %v309_v61, %v313_v62 }
  0xb9   : > { %1661 = vmatprep.subr.bf16.mxu0 %v1974_v51 }
  0xba   : > { %1633 = vmatpush1.bf16.msra.mxu1 %v1797_v50 }
  0xbb   : > { %1634 = vmatprep.subr.bf16.mxu1 %v1918_v52 }
  0xbc   : > { %1662 = vmatpush1.bf16.msra.mxu0 %v1973_v57 }
  0xbd   : > { %1663 = vmatprep.subr.bf16.mxu0 %v1966_v59 }
  0xbe   : > { %1635 = vmatpush2.bf16.msra.mxu1 %v1917_v58 }
  0xbf   : > { %1636 = vmatprep.subr.bf16.mxu1 %v1910_v60 }
  0xc0   : > { %1664 = vmatpush1.bf16.msra.mxu0 %v1965_v1 }
  0xc1   : > { %1665 = vmatprep.subr.bf16.mxu0 %v1958_v28 }
  0xc2   : > { %1637 = vmatpush2.bf16.msra.mxu1 %v1909_v2 }
  0xc3   : > { %1638 = vmatprep.subr.bf16.mxu1 %v1902_v3 }
  0xc4   : > { %1666 = vmatpush1.bf16.msra.mxu0 %v1957_v8 }
  0xc5   : > { %1667 = vmatprep.subr.bf16.mxu0 %v1950_v10 }
  0xc6   : > { %1639 = vmatpush2.bf16.msra.mxu1 %v1901_v9 }
  0xc7   : > { %1640 = vmatprep.subr.bf16.mxu1 %v1894_v13 }
  0xc8   : > { %1668 = vmatpush1.bf16.msra.mxu0 %v1949_v17 }
  0xc9   : > { %1669 = vmatprep.subr.bf16.mxu0 %v1942_v19 }
  0xca   : > { %1641 = vmatpush2.bf16.msra.mxu1 %v1893_v18 }
  0xcb   : > { %1642 = vmatprep.subr.bf16.mxu1 %v1886_v20 }
  0xcc   : > { %1670 = vmatpush1.bf16.msra.mxu0 %v1941_v25 }
  0xcd   : > { %1671 = vmatprep.subr.bf16.mxu0 %v1934_v27 }
  0xce   : > { %1643 = vmatpush2.bf16.msra.mxu1 %v1885_v26 }
  0xcf   : > { %1644 = vmatprep.subr.bf16.mxu1 %v1878_v30 }
  0xd0   : > { %1672 = vmatpush1.bf16.msra.mxu0 %v1933_v35 }
  0xd1   : > { %1673 = vmatprep.subr.bf16.mxu0 %v1926_v37 }
  0xd2   : > { %1645 = vmatpush2.bf16.msra.mxu1 %v1877_v36 }
  0xd3   : > { %1646 = vmatprep.subr.bf16.mxu1 %v1870_v38 }
  0xd4   : > { %1674 = vmatpush1.bf16.msra.mxu0 %v1925_v42 }
  0xd5   : > { %1997 = vmatprep.subr.msk.bf16.mxu0 %vm1347_vm1, %v1990_v44 }
  0xd6   : > { %1647 = vmatpush2.bf16.msra.mxu1 %v1869_v43 }
  0xd7   : > { %1648 = vmatprep.subr.bf16.mxu1 %v1862_v46 }
  0xd8   : > { %1690 = vmatpush2.bf16.msra.mxu0 %v1367_v48 }
  0xda   : > { %1649 = vmatpush2.bf16.msra.mxu1 %v1861_v47 }
  0xdb   : > { %1692 = vmatmul.mubr.bf16.vlgmr.msra.gmra.mxu0 %v2083_v11 }
  0xdd   : > { %1651 = vmatmul.mubr.bf16.vlgmr.msra.gmra.mxu1 %v2085_v12 }
  0xf9   : > { %v1447_v49 = vpop.f32.mrf.mxu1 }
  0xfb   : > { %v1449_v50 = vpop.f32.mrf.mxu1 }
  0xfd   : > { %v1451_v51 = vpop.f32.mrf.mxu1 }
  0xff   : > { %v1452_v52 = vpop.f32.mrf.mxu1 }
 0x113   : > { %v1406_v53 = vpop.f32.mrf.mxu0 }
 0x114   : > { %v1448_v54 = vadd.f32 %v1447_v49, %v1406_v53 }
 0x115   : > { %v1408_v55 = vpop.f32.mrf.mxu0 }
 0x116   : > { %v1450_v56 = vadd.f32 %v1449_v50, %v1408_v55  ;;  %2021 = vtanh.f32 %v1448_v54 }
 0x117   : > { %v1410_v57 = vpop.f32.mrf.mxu0 }
 0x118   : > { %2023 = vtanh.f32 %v1450_v56 }
 0x119   : > { %v1411_v58 = vpop.f32.mrf.mxu0 }
 0x123   : > { %v2022_v59 = vpop.eup %2021 }
 0x125   : > { %v2024_v60 = vpop.eup %2023 }
 0x126   : > { %v1716_v11 = vcombine.low %v2022_v59, %v2024_v60 }
 0x128   : > { %1724 = vst [vmem:[%s2320_s20] sm:$0x77] %v1716_v11 }
 0x137   : > { %v1529_v12 = vpop.f32.mrf.mxu0 }
 0x139   : > { %v1488_v61 = vpop.f32.mrf.mxu1  ;;  %v1531_v63 = vpop.f32.mrf.mxu0 }
 0x13a   : > { %v1530_v62 = vadd.f32 %v1529_v12, %v1488_v61 }
 0x13b   : > { %v1490_v0 = vpop.f32.mrf.mxu1  ;;  %v1533_v2 = vpop.f32.mrf.mxu0 }
 0x13c   : > { %2025 = vtanh.f32 %v1530_v62  ;;  %v1532_v1 = vadd.f32 %v1531_v63, %v1490_v0 }
 0x13d   : > { %v1492_v28 = vpop.f32.mrf.mxu1  ;;  %v1534_v3 = vpop.f32.mrf.mxu0 }
 0x13e   : > { %2027 = vtanh.f32 %v1532_v1 }
 0x13f   : > { %v1493_v4 = vpop.f32.mrf.mxu1 }
 0x149   : > { %v2026_v5 = vpop.eup %2025 }
 0x14b   : > { %v2028_v6 = vpop.eup %2027 }
 0x14c   : > { %v1717_v7 = vcombine.low %v2026_v5, %v2028_v6 }
 0x14e   : > { %1725 = vst [vmem:[%s2320_s20 + $0x8] sm:$0x77] %v1717_v7 }
 0x15d   : > { %v1611_v8 = vpop.f32.mrf.mxu1 }
 0x15f   : > { %v1613_v9 = vpop.f32.mrf.mxu1 }
 0x161   : > { %v1615_v10 = vpop.f32.mrf.mxu1 }
 0x163   : > { %v1616_v13 = vpop.f32.mrf.mxu1 }
 0x177   : > { %v1570_v14 = vpop.f32.mrf.mxu0 }
 0x178   : > { %v1612_v15 = vadd.f32 %v1611_v8, %v1570_v14 }
 0x179   : > { %v1572_v29 = vpop.f32.mrf.mxu0 }
 0x17a   : > { %v1614_v16 = vadd.f32 %v1613_v9, %v1572_v29  ;;  %2029 = vtanh.f32 %v1612_v15 }
 0x17b   : > { %v1574_v17 = vpop.f32.mrf.mxu0 }
 0x17c   : > { %2031 = vtanh.f32 %v1614_v16 }
 0x17d   : > { %v1575_v18 = vpop.f32.mrf.mxu0 }
 0x187   : > { %v2030_v19 = vpop.eup %2029 }
 0x189   : > { %v2032_v20 = vpop.eup %2031 }
 0x18a   : > { %v1718_v21 = vcombine.low %v2030_v19, %v2032_v20 }
 0x18c   : > { %1726 = vst [vmem:[%s2320_s20 + $0x10] sm:$0x77] %v1718_v21 }
 0x19b   : > { %v1693_v22 = vpop.f32.mrf.mxu0 }
 0x19d   : > { %v1652_v23 = vpop.f32.mrf.mxu1  ;;  %v1695_v25 = vpop.f32.mrf.mxu0 }
 0x19e   : > { %v1694_v24 = vadd.f32 %v1693_v22, %v1652_v23 }
 0x19f   : > { %v1654_v26 = vpop.f32.mrf.mxu1  ;;  %v1697_v30 = vpop.f32.mrf.mxu0 }
 0x1a0   : > { %v1696_v27 = vadd.f32 %v1695_v25, %v1654_v26  ;;  %2033 = vtanh.f32 %v1694_v24 }
 0x1a1   : > { %v1656_v31 = vpop.f32.mrf.mxu1  ;;  %v1698_v32 = vpop.f32.mrf.mxu0 }
 0x1a2   : > { %2035 = vtanh.f32 %v1696_v27 }
 0x1a3   : > { %v1657_v33 = vpop.f32.mrf.mxu1 }
 0x1ad   : > { %v2034_v34 = vpop.eup %2033 }
 0x1af   : > { %v2036_v35 = vpop.eup %2035 }
 0x1b0   : > { %v1719_v36 = vcombine.low %v2034_v34, %v2036_v35 }
 0x1b2   : > { %1727 = vst [vmem:[%s2320_s20 + $0x18] sm:$0x77] %v1719_v36 }
 0x1b3 PF: > { %s12_s9 = sadd.s32 1, %s2043_s9  }
 0x1b4   : > { %p9_p4 = scmp.ge.s32.totalorder %s12_s9, 4  }
 0x1b6   :  { %11 = sbr.rel (!%p9_p4) target bundleno = 1 (0x1), region = 58 }

</bundles_post_ra>
